<compile_context>
chip_gen: v7x
topology: tpu7x:2x2x1
jax: 0.10.0
libtpu: 0.0.40
codegen_flags: <defaults>
</compile_context>

<pallas_src>
import jax
import jax.numpy as jnp
from jax import lax
from jax.experimental import pallas as pl
from jax.experimental.pallas import tpu as pltpu

LATENT_DIM = 64            # args.latent_dim (small)
BATCH = 8                  # sublane-aligned; raise to amortize weight DMA
WIDTHS = [LATENT_DIM, 128, 256, 512, 1024]
OUT_FEATURES = 784
OUT_PADDED = 896           # 7 * 128 lanes
BN_EPS = 1e-5
LEAKY_SLOPE = 0.2


def _leaky_relu(x):
    return jnp.where(x > 0, x, LEAKY_SLOPE * x)


def _batch_norm(x, gamma, beta):
    # Training-mode BatchNorm1d, affine folded into scale/shift.
    mean = jnp.mean(x, axis=0, keepdims=True)
    var = jnp.mean(jnp.square(x - mean), axis=0, keepdims=True)
    scale = gamma * lax.rsqrt(var + BN_EPS)
    shift = beta - mean * scale
    return x * scale + shift


def generator_kernel(z_ref,
                     w1_ref, b1_ref,
                     w2_ref, g2_ref, be2_ref,
                     w3_ref, g3_ref, be3_ref,
                     w4_hbm, g4_ref, be4_ref,
                     w5_hbm, b5_ref,
                     out_ref,
                     w4_vmem, w5_vmem, sems):
    # Kick off prefetch of the two large weight matrices (HBM -> VMEM) so
    # their DMA overlaps with the compute of the earlier layers.
    cp4 = pltpu.make_async_copy(w4_hbm, w4_vmem, sems.at[0])
    cp5 = pltpu.make_async_copy(w5_hbm, w5_vmem, sems.at[1])
    cp4.start()
    cp5.start()

    z = z_ref[...]

    # Linear(latent, 128) + LeakyReLU(0.2)
    h = jnp.dot(z.astype(jnp.bfloat16), w1_ref[...],
                preferred_element_type=jnp.float32) + b1_ref[...]
    h = _leaky_relu(h)

    # Linear(128, 256) [bias cancelled by BN] + BatchNorm1d + LeakyReLU
    h = jnp.dot(h.astype(jnp.bfloat16), w2_ref[...],
                preferred_element_type=jnp.float32)
    h = _leaky_relu(_batch_norm(h, g2_ref[...], be2_ref[...]))

    # Linear(256, 512) [bias cancelled by BN] + BatchNorm1d + LeakyReLU
    h = jnp.dot(h.astype(jnp.bfloat16), w3_ref[...],
                preferred_element_type=jnp.float32)
    h = _leaky_relu(_batch_norm(h, g3_ref[...], be3_ref[...]))

    # Linear(512, 1024) [bias cancelled by BN] + BatchNorm1d + LeakyReLU
    cp4.wait()
    h = jnp.dot(h.astype(jnp.bfloat16), w4_vmem[...],
                preferred_element_type=jnp.float32)
    h = _leaky_relu(_batch_norm(h, g4_ref[...], be4_ref[...]))

    # Linear(1024, 896-padded) + Tanh
    cp5.wait()
    h = jnp.dot(h.astype(jnp.bfloat16), w5_vmem[...],
                preferred_element_type=jnp.float32) + b5_ref[...]
    out_ref[...] = jnp.tanh(h)


def init_params(key):
    """PyTorch-style init: Linear ~ U(-1/sqrt(fan_in), 1/sqrt(fan_in)),
    BatchNorm gamma=1, beta=0.  Weights stored (in, out) in bf16; the last
    layer is zero-padded to 896 output features.  Biases of layers 2-4 are
    omitted (they cancel exactly under training-mode BatchNorm)."""
    params = {}
    dims = WIDTHS + [OUT_FEATURES]
    for li in range(5):
        fan_in, fan_out = dims[li], dims[li + 1]
        key, kw, kb = jax.random.split(key, 3)
        bound = 1.0 / (fan_in ** 0.5)
        w = jax.random.uniform(kw, (fan_in, fan_out), jnp.float32, -bound, bound)
        b = jax.random.uniform(kb, (1, fan_out), jnp.float32, -bound, bound)
        if li == 4:  # pad 784 -> 896 for lane-aligned output
            w = jnp.pad(w, ((0, 0), (0, OUT_PADDED - OUT_FEATURES)))
            b = jnp.pad(b, ((0, 0), (0, OUT_PADDED - OUT_FEATURES)))
        params[f"w{li + 1}"] = w.astype(jnp.bfloat16)
        if li in (0, 4):
            params[f"b{li + 1}"] = b
    for li, width in zip((2, 3, 4), (256, 512, 1024)):
        params[f"g{li}"] = jnp.ones((1, width), jnp.float32)
        params[f"be{li}"] = jnp.zeros((1, width), jnp.float32)
    return params


def generator_forward(z, params):
    vmem = pl.BlockSpec(memory_space=pltpu.MemorySpace.VMEM)
    hbm = pl.BlockSpec(memory_space=pl.ANY)   # raw ref, manual prefetch
    args = (
        z,
        params["w1"], params["b1"],
        params["w2"], params["g2"], params["be2"],
        params["w3"], params["g3"], params["be3"],
        params["w4"], params["g4"], params["be4"],
        params["w5"], params["b5"],
    )
    in_specs = [
        vmem,
        vmem, vmem,
        vmem, vmem, vmem,
        vmem, vmem, vmem,
        hbm, vmem, vmem,
        hbm, vmem,
    ]
    out = pl.pallas_call(
        generator_kernel,
        out_shape=jax.ShapeDtypeStruct((z.shape[0], OUT_PADDED), jnp.float32),
        in_specs=in_specs,
        out_specs=vmem,
        scratch_shapes=[
            pltpu.VMEM((WIDTHS[3], WIDTHS[4]), jnp.bfloat16),   # w4 buffer
            pltpu.VMEM((WIDTHS[4], OUT_PADDED), jnp.bfloat16),  # w5 buffer
            pltpu.SemaphoreType.DMA((2,)),
        ],
        compiler_params=pltpu.CompilerParams(vmem_limit_bytes=16 << 20),
    )(*args)
    return out[:, :OUT_FEATURES]


def generator_reference(z, params):
    """Pure-JAX reference with identical numerics (bf16 matmul operands,
    f32 accumulation, training-mode BN)."""
    def dot_bf16(h, w):
        return jnp.dot(h.astype(jnp.bfloat16), w,
                       preferred_element_type=jnp.float32)

    h = _leaky_relu(dot_bf16(z, params["w1"]) + params["b1"])
    for li in (2, 3, 4):
        h = dot_bf16(h, params[f"w{li}"])
        h = _leaky_relu(_batch_norm(h, params[f"g{li}"], params[f"be{li}"]))
    h = jnp.tanh(dot_bf16(h, params["w5"]) + params["b5"])
    return h[:, :OUT_FEATURES]


if __name__ == "__main__":
    key = jax.random.PRNGKey(0)
    key, kz = jax.random.split(key)
    z = jax.random.normal(kz, (BATCH, LATENT_DIM), jnp.float32)
    params = init_params(key)

    out = jax.block_until_ready(generator_forward(z, params))
    ref = generator_reference(z, params)

    assert out.shape == (BATCH, OUT_FEATURES)
    err = float(jnp.max(jnp.abs(out - ref)))
    assert jnp.allclose(out, ref, atol=5e-3, rtol=5e-3), f"max abs err {err}"
    print("KERNEL_OK")
</pallas_src>

<mosaic_0001>
module attributes {stable_mosaic.version = 11 : i64} {
  func.func @generator_kernel(%arg0: memref<8x64xf32, #tpu.memory_space<vmem>>, %arg1: memref<64x128xbf16, #tpu.memory_space<vmem>>, %arg2: memref<1x128xf32, #tpu.memory_space<vmem>>, %arg3: memref<128x256xbf16, #tpu.memory_space<vmem>>, %arg4: memref<1x256xf32, #tpu.memory_space<vmem>>, %arg5: memref<1x256xf32, #tpu.memory_space<vmem>>, %arg6: memref<256x512xbf16, #tpu.memory_space<vmem>>, %arg7: memref<1x512xf32, #tpu.memory_space<vmem>>, %arg8: memref<1x512xf32, #tpu.memory_space<vmem>>, %arg9: memref<512x1024xbf16, #tpu.memory_space<any>>, %arg10: memref<1x1024xf32, #tpu.memory_space<vmem>>, %arg11: memref<1x1024xf32, #tpu.memory_space<vmem>>, %arg12: memref<1024x896xbf16, #tpu.memory_space<any>>, %arg13: memref<1x896xf32, #tpu.memory_space<vmem>>, %arg14: memref<8x896xf32, #tpu.memory_space<vmem>>, %arg15: memref<512x1024xbf16, #tpu.memory_space<vmem>>, %arg16: memref<1024x896xbf16, #tpu.memory_space<vmem>>, %arg17: memref<2x!tpu.dma_semaphore, #tpu.memory_space<semaphore_mem>>) attributes {dimension_semantics = [], scalar_prefetch = 0 : i64, scratch_operands = 3 : i64, tpu.core_type = #tpu.core_type<tc>} {
    %c0_i32 = arith.constant 0 : i32
    %0 = tpu.memref_slice %arg17[%c0_i32] : memref<2x!tpu.dma_semaphore, #tpu.memory_space<semaphore_mem>> -> memref<1x!tpu.dma_semaphore, #tpu.memory_space<semaphore_mem>>
    %1 = tpu.memref_squeeze %0 : memref<1x!tpu.dma_semaphore, #tpu.memory_space<semaphore_mem>> -> memref<!tpu.dma_semaphore, #tpu.memory_space<semaphore_mem>>
    tpu.enqueue_dma source(%arg9 : memref<512x1024xbf16, #tpu.memory_space<any>>) target(%arg15 : memref<512x1024xbf16, #tpu.memory_space<vmem>>) target_semaphore(%1 : memref<!tpu.dma_semaphore, #tpu.memory_space<semaphore_mem>>)
    %c1_i32 = arith.constant 1 : i32
    %2 = tpu.memref_slice %arg17[%c1_i32] : memref<2x!tpu.dma_semaphore, #tpu.memory_space<semaphore_mem>> -> memref<1x!tpu.dma_semaphore, #tpu.memory_space<semaphore_mem>>
    %3 = tpu.memref_squeeze %2 : memref<1x!tpu.dma_semaphore, #tpu.memory_space<semaphore_mem>> -> memref<!tpu.dma_semaphore, #tpu.memory_space<semaphore_mem>>
    tpu.enqueue_dma source(%arg12 : memref<1024x896xbf16, #tpu.memory_space<any>>) target(%arg16 : memref<1024x896xbf16, #tpu.memory_space<vmem>>) target_semaphore(%3 : memref<!tpu.dma_semaphore, #tpu.memory_space<semaphore_mem>>)
    %c0 = arith.constant 0 : index
    %c0_0 = arith.constant 0 : index
    %4 = vector.load %arg0[%c0, %c0_0] : memref<8x64xf32, #tpu.memory_space<vmem>>, vector<8x64xf32>
    %5 = arith.truncf %4 : vector<8x64xf32> to vector<8x64xbf16>
    %c0_1 = arith.constant 0 : index
    %c0_2 = arith.constant 0 : index
    %6 = vector.load %arg1[%c0_1, %c0_2] : memref<64x128xbf16, #tpu.memory_space<vmem>>, vector<64x128xbf16>
    %cst = arith.constant dense<0.000000e+00> : vector<8x128xf32>
    %7 = tpu.matmul %5, %6, %cst {dimension_numbers = #tpu.dot_dimension_numbers<[1], [0], [0], [1], [0, 0, 1, 1], [], []>} : vector<8x64xbf16>, vector<64x128xbf16>, vector<8x128xf32> -> vector<8x128xf32>
    %c0_3 = arith.constant 0 : index
    %c0_4 = arith.constant 0 : index
    %8 = vector.load %arg2[%c0_3, %c0_4] : memref<1x128xf32, #tpu.memory_space<vmem>>, vector<1x128xf32>
    %9 = vector.broadcast %8 : vector<1x128xf32> to vector<8x128xf32>
    %10 = arith.addf %7, %9 : vector<8x128xf32>
    %cst_5 = arith.constant 0.000000e+00 : f32
    %11 = vector.broadcast %cst_5 : f32 to vector<8x128xf32>
    %12 = arith.cmpf ogt, %10, %11 : vector<8x128xf32>
    %cst_6 = arith.constant 2.000000e-01 : f32
    %13 = vector.broadcast %cst_6 : f32 to vector<8x128xf32>
    %14 = arith.mulf %13, %10 : vector<8x128xf32>
    %15 = arith.select %12, %10, %14 : vector<8x128xi1>, vector<8x128xf32>
    %16 = arith.truncf %15 : vector<8x128xf32> to vector<8x128xbf16>
    %c0_7 = arith.constant 0 : index
    %c0_8 = arith.constant 0 : index
    %17 = vector.load %arg3[%c0_7, %c0_8] : memref<128x256xbf16, #tpu.memory_space<vmem>>, vector<128x256xbf16>
    %cst_9 = arith.constant dense<0.000000e+00> : vector<8x256xf32>
    %18 = tpu.matmul %16, %17, %cst_9 {dimension_numbers = #tpu.dot_dimension_numbers<[1], [0], [0], [1], [0, 0, 1, 1], [], []>} : vector<8x128xbf16>, vector<128x256xbf16>, vector<8x256xf32> -> vector<8x256xf32>
    %c0_10 = arith.constant 0 : index
    %c0_11 = arith.constant 0 : index
    %19 = vector.load %arg4[%c0_10, %c0_11] : memref<1x256xf32, #tpu.memory_space<vmem>>, vector<1x256xf32>
    %c0_12 = arith.constant 0 : index
    %c0_13 = arith.constant 0 : index
    %20 = vector.load %arg5[%c0_12, %c0_13] : memref<1x256xf32, #tpu.memory_space<vmem>>, vector<1x256xf32>
    %cst_14 = arith.constant dense<0.000000e+00> : vector<256xf32>
    %21 = vector.multi_reduction <add>, %18, %cst_14 [0] : vector<8x256xf32> to vector<256xf32>
    %22 = vector.shape_cast %21 : vector<256xf32> to vector<1x256xf32>
    %cst_15 = arith.constant 8.000000e+00 : f32
    %23 = vector.broadcast %cst_15 : f32 to vector<1x256xf32>
    %24 = arith.divf %22, %23 : vector<1x256xf32>
    %25 = vector.broadcast %24 : vector<1x256xf32> to vector<8x256xf32>
    %26 = arith.subf %18, %25 : vector<8x256xf32>
    %27 = arith.mulf %26, %26 : vector<8x256xf32>
    %cst_16 = arith.constant dense<0.000000e+00> : vector<256xf32>
    %28 = vector.multi_reduction <add>, %27, %cst_16 [0] : vector<8x256xf32> to vector<256xf32>
    %29 = vector.shape_cast %28 : vector<256xf32> to vector<1x256xf32>
    %cst_17 = arith.constant 8.000000e+00 : f32
    %30 = vector.broadcast %cst_17 : f32 to vector<1x256xf32>
    %31 = arith.divf %29, %30 : vector<1x256xf32>
    %cst_18 = arith.constant 9.99999974E-6 : f32
    %32 = vector.broadcast %cst_18 : f32 to vector<1x256xf32>
    %33 = arith.addf %31, %32 : vector<1x256xf32>
    %34 = math.rsqrt %33 : vector<1x256xf32>
    %35 = arith.mulf %19, %34 : vector<1x256xf32>
    %36 = arith.mulf %24, %35 : vector<1x256xf32>
    %37 = arith.subf %20, %36 : vector<1x256xf32>
    %38 = vector.broadcast %35 : vector<1x256xf32> to vector<8x256xf32>
    %39 = arith.mulf %18, %38 : vector<8x256xf32>
    %40 = vector.broadcast %37 : vector<1x256xf32> to vector<8x256xf32>
    %41 = arith.addf %39, %40 : vector<8x256xf32>
    %cst_19 = arith.constant 0.000000e+00 : f32
    %42 = vector.broadcast %cst_19 : f32 to vector<8x256xf32>
    %43 = arith.cmpf ogt, %41, %42 : vector<8x256xf32>
    %cst_20 = arith.constant 2.000000e-01 : f32
    %44 = vector.broadcast %cst_20 : f32 to vector<8x256xf32>
    %45 = arith.mulf %44, %41 : vector<8x256xf32>
    %46 = arith.select %43, %41, %45 : vector<8x256xi1>, vector<8x256xf32>
    %47 = arith.truncf %46 : vector<8x256xf32> to vector<8x256xbf16>
    %c0_21 = arith.constant 0 : index
    %c0_22 = arith.constant 0 : index
    %48 = vector.load %arg6[%c0_21, %c0_22] : memref<256x512xbf16, #tpu.memory_space<vmem>>, vector<256x512xbf16>
    %cst_23 = arith.constant dense<0.000000e+00> : vector<8x512xf32>
    %49 = tpu.matmul %47, %48, %cst_23 {dimension_numbers = #tpu.dot_dimension_numbers<[1], [0], [0], [1], [0, 0, 1, 1], [], []>} : vector<8x256xbf16>, vector<256x512xbf16>, vector<8x512xf32> -> vector<8x512xf32>
    %c0_24 = arith.constant 0 : index
    %c0_25 = arith.constant 0 : index
    %50 = vector.load %arg7[%c0_24, %c0_25] : memref<1x512xf32, #tpu.memory_space<vmem>>, vector<1x512xf32>
    %c0_26 = arith.constant 0 : index
    %c0_27 = arith.constant 0 : index
    %51 = vector.load %arg8[%c0_26, %c0_27] : memref<1x512xf32, #tpu.memory_space<vmem>>, vector<1x512xf32>
    %cst_28 = arith.constant dense<0.000000e+00> : vector<512xf32>
    %52 = vector.multi_reduction <add>, %49, %cst_28 [0] : vector<8x512xf32> to vector<512xf32>
    %53 = vector.shape_cast %52 : vector<512xf32> to vector<1x512xf32>
    %cst_29 = arith.constant 8.000000e+00 : f32
    %54 = vector.broadcast %cst_29 : f32 to vector<1x512xf32>
    %55 = arith.divf %53, %54 : vector<1x512xf32>
    %56 = vector.broadcast %55 : vector<1x512xf32> to vector<8x512xf32>
    %57 = arith.subf %49, %56 : vector<8x512xf32>
    %58 = arith.mulf %57, %57 : vector<8x512xf32>
    %cst_30 = arith.constant dense<0.000000e+00> : vector<512xf32>
    %59 = vector.multi_reduction <add>, %58, %cst_30 [0] : vector<8x512xf32> to vector<512xf32>
    %60 = vector.shape_cast %59 : vector<512xf32> to vector<1x512xf32>
    %cst_31 = arith.constant 8.000000e+00 : f32
    %61 = vector.broadcast %cst_31 : f32 to vector<1x512xf32>
    %62 = arith.divf %60, %61 : vector<1x512xf32>
    %cst_32 = arith.constant 9.99999974E-6 : f32
    %63 = vector.broadcast %cst_32 : f32 to vector<1x512xf32>
    %64 = arith.addf %62, %63 : vector<1x512xf32>
    %65 = math.rsqrt %64 : vector<1x512xf32>
    %66 = arith.mulf %50, %65 : vector<1x512xf32>
    %67 = arith.mulf %55, %66 : vector<1x512xf32>
    %68 = arith.subf %51, %67 : vector<1x512xf32>
    %69 = vector.broadcast %66 : vector<1x512xf32> to vector<8x512xf32>
    %70 = arith.mulf %49, %69 : vector<8x512xf32>
    %71 = vector.broadcast %68 : vector<1x512xf32> to vector<8x512xf32>
    %72 = arith.addf %70, %71 : vector<8x512xf32>
    %cst_33 = arith.constant 0.000000e+00 : f32
    %73 = vector.broadcast %cst_33 : f32 to vector<8x512xf32>
    %74 = arith.cmpf ogt, %72, %73 : vector<8x512xf32>
    %cst_34 = arith.constant 2.000000e-01 : f32
    %75 = vector.broadcast %cst_34 : f32 to vector<8x512xf32>
    %76 = arith.mulf %75, %72 : vector<8x512xf32>
    %77 = arith.select %74, %72, %76 : vector<8x512xi1>, vector<8x512xf32>
    %c0_i32_35 = arith.constant 0 : i32
    %78 = tpu.memref_slice %arg17[%c0_i32_35] : memref<2x!tpu.dma_semaphore, #tpu.memory_space<semaphore_mem>> -> memref<1x!tpu.dma_semaphore, #tpu.memory_space<semaphore_mem>>
    %79 = tpu.memref_squeeze %78 : memref<1x!tpu.dma_semaphore, #tpu.memory_space<semaphore_mem>> -> memref<!tpu.dma_semaphore, #tpu.memory_space<semaphore_mem>>
    tpu.wait_dma2 semaphore(%79 : memref<!tpu.dma_semaphore, #tpu.memory_space<semaphore_mem>>) src(%arg9 : memref<512x1024xbf16, #tpu.memory_space<any>>) dst(%arg15 : memref<512x1024xbf16, #tpu.memory_space<vmem>>)
    %80 = arith.truncf %77 : vector<8x512xf32> to vector<8x512xbf16>
    %c0_36 = arith.constant 0 : index
    %c0_37 = arith.constant 0 : index
    %81 = vector.load %arg15[%c0_36, %c0_37] : memref<512x1024xbf16, #tpu.memory_space<vmem>>, vector<512x1024xbf16>
    %cst_38 = arith.constant dense<0.000000e+00> : vector<8x1024xf32>
    %82 = tpu.matmul %80, %81, %cst_38 {dimension_numbers = #tpu.dot_dimension_numbers<[1], [0], [0], [1], [0, 0, 1, 1], [], []>} : vector<8x512xbf16>, vector<512x1024xbf16>, vector<8x1024xf32> -> vector<8x1024xf32>
    %c0_39 = arith.constant 0 : index
    %c0_40 = arith.constant 0 : index
    %83 = vector.load %arg10[%c0_39, %c0_40] : memref<1x1024xf32, #tpu.memory_space<vmem>>, vector<1x1024xf32>
    %c0_41 = arith.constant 0 : index
    %c0_42 = arith.constant 0 : index
    %84 = vector.load %arg11[%c0_41, %c0_42] : memref<1x1024xf32, #tpu.memory_space<vmem>>, vector<1x1024xf32>
    %cst_43 = arith.constant dense<0.000000e+00> : vector<1024xf32>
    %85 = vector.multi_reduction <add>, %82, %cst_43 [0] : vector<8x1024xf32> to vector<1024xf32>
    %86 = vector.shape_cast %85 : vector<1024xf32> to vector<1x1024xf32>
    %cst_44 = arith.constant 8.000000e+00 : f32
    %87 = vector.broadcast %cst_44 : f32 to vector<1x1024xf32>
    %88 = arith.divf %86, %87 : vector<1x1024xf32>
    %89 = vector.broadcast %88 : vector<1x1024xf32> to vector<8x1024xf32>
    %90 = arith.subf %82, %89 : vector<8x1024xf32>
    %91 = arith.mulf %90, %90 : vector<8x1024xf32>
    %cst_45 = arith.constant dense<0.000000e+00> : vector<1024xf32>
    %92 = vector.multi_reduction <add>, %91, %cst_45 [0] : vector<8x1024xf32> to vector<1024xf32>
    %93 = vector.shape_cast %92 : vector<1024xf32> to vector<1x1024xf32>
    %cst_46 = arith.constant 8.000000e+00 : f32
    %94 = vector.broadcast %cst_46 : f32 to vector<1x1024xf32>
    %95 = arith.divf %93, %94 : vector<1x1024xf32>
    %cst_47 = arith.constant 9.99999974E-6 : f32
    %96 = vector.broadcast %cst_47 : f32 to vector<1x1024xf32>
    %97 = arith.addf %95, %96 : vector<1x1024xf32>
    %98 = math.rsqrt %97 : vector<1x1024xf32>
    %99 = arith.mulf %83, %98 : vector<1x1024xf32>
    %100 = arith.mulf %88, %99 : vector<1x1024xf32>
    %101 = arith.subf %84, %100 : vector<1x1024xf32>
    %102 = vector.broadcast %99 : vector<1x1024xf32> to vector<8x1024xf32>
    %103 = arith.mulf %82, %102 : vector<8x1024xf32>
    %104 = vector.broadcast %101 : vector<1x1024xf32> to vector<8x1024xf32>
    %105 = arith.addf %103, %104 : vector<8x1024xf32>
    %cst_48 = arith.constant 0.000000e+00 : f32
    %106 = vector.broadcast %cst_48 : f32 to vector<8x1024xf32>
    %107 = arith.cmpf ogt, %105, %106 : vector<8x1024xf32>
    %cst_49 = arith.constant 2.000000e-01 : f32
    %108 = vector.broadcast %cst_49 : f32 to vector<8x1024xf32>
    %109 = arith.mulf %108, %105 : vector<8x1024xf32>
    %110 = arith.select %107, %105, %109 : vector<8x1024xi1>, vector<8x1024xf32>
    %c1_i32_50 = arith.constant 1 : i32
    %111 = tpu.memref_slice %arg17[%c1_i32_50] : memref<2x!tpu.dma_semaphore, #tpu.memory_space<semaphore_mem>> -> memref<1x!tpu.dma_semaphore, #tpu.memory_space<semaphore_mem>>
    %112 = tpu.memref_squeeze %111 : memref<1x!tpu.dma_semaphore, #tpu.memory_space<semaphore_mem>> -> memref<!tpu.dma_semaphore, #tpu.memory_space<semaphore_mem>>
    tpu.wait_dma2 semaphore(%112 : memref<!tpu.dma_semaphore, #tpu.memory_space<semaphore_mem>>) src(%arg12 : memref<1024x896xbf16, #tpu.memory_space<any>>) dst(%arg16 : memref<1024x896xbf16, #tpu.memory_space<vmem>>)
    %113 = arith.truncf %110 : vector<8x1024xf32> to vector<8x1024xbf16>
    %c0_51 = arith.constant 0 : index
    %c0_52 = arith.constant 0 : index
    %114 = vector.load %arg16[%c0_51, %c0_52] : memref<1024x896xbf16, #tpu.memory_space<vmem>>, vector<1024x896xbf16>
    %cst_53 = arith.constant dense<0.000000e+00> : vector<8x896xf32>
    %115 = tpu.matmul %113, %114, %cst_53 {dimension_numbers = #tpu.dot_dimension_numbers<[1], [0], [0], [1], [0, 0, 1, 1], [], []>} : vector<8x1024xbf16>, vector<1024x896xbf16>, vector<8x896xf32> -> vector<8x896xf32>
    %c0_54 = arith.constant 0 : index
    %c0_55 = arith.constant 0 : index
    %116 = vector.load %arg13[%c0_54, %c0_55] : memref<1x896xf32, #tpu.memory_space<vmem>>, vector<1x896xf32>
    %117 = vector.broadcast %116 : vector<1x896xf32> to vector<8x896xf32>
    %118 = arith.addf %115, %117 : vector<8x896xf32>
    %119 = math.tanh %118 : vector<8x896xf32>
    %c0_56 = arith.constant 0 : index
    %c0_57 = arith.constant 0 : index
    %120 = vector.load %arg14[%c0_56, %c0_57] : memref<8x896xf32, #tpu.memory_space<vmem>>, vector<8x896xf32>
    tpu.vector_store %arg14[%c0_56, %c0_57], %119 {strides = array<i32>} : memref<8x896xf32, #tpu.memory_space<vmem>>, vector<8x896xf32>,
    return
  }
}

</mosaic_0001>

<bundles_post_ra>
// kernel: tpu_custom_call.1
= control target key start
LH: loop header
LB: loop body
LE: loop exit
PB: predicated region body
PF: predicated region fallthrough
CT: control target
= control target key end

     0   :  { %19 = vsyncpa [#allocation6], 0  ;;  %s4821_s0 = inlined_call_operand.hbm [shape: f32[8,64], index: 0, kind: input, shape index: {}]   ;;  %s4822_s1 = inlined_call_operand.hbm [shape: bf16[64,128], index: 1, kind: input, shape index: {}]   ;;  %s4823_s2 = inlined_call_operand.hbm [shape: f32[1,128], index: 2, kind: input, shape index: {}]   ;;  %s4824_s3 = inlined_call_operand.hbm [shape: bf16[128,256], index: 3, kind: input, shape index: {}]   ;;  %s4825_s4 = inlined_call_operand.hbm [shape: f32[1,256], index: 4, kind: input, shape index: {}]   ;;  %s4826_s5 = inlined_call_operand.hbm [shape: f32[1,256], index: 5, kind: input, shape index: {}]   ;;  %s4827_s6 = inlined_call_operand.hbm [shape: bf16[256,512], index: 6, kind: input, shape index: {}]   ;;  %s4828_s7 = inlined_call_operand.hbm [shape: f32[1,512], index: 7, kind: input, shape index: {}]   ;;  %s4829_s8 = inlined_call_operand.hbm [shape: f32[1,512], index: 8, kind: input, shape index: {}]   ;;  %s4830_s9 = inlined_call_operand.hbm [shape: bf16[512,1024], index: 9, kind: input, shape index: {}]   ;;  %s4831_s10 = inlined_call_operand.hbm [shape: f32[1,1024], index: 10, kind: input, shape index: {}]   ;;  %s4832_s11 = inlined_call_operand.hbm [shape: f32[1,1024], index: 11, kind: input, shape index: {}]   ;;  %s4833_s12 = inlined_call_operand.hbm [shape: bf16[1024,896], index: 12, kind: input, shape index: {}]   ;;  %s4834_s13 = inlined_call_operand.hbm [shape: f32[1,896], index: 13, kind: input, shape index: {}]   ;;  %s4835_s14 = inlined_call_operand.hbm [shape: f32[8,896], index: 14, kind: output, shape index: {}]  }
   0x1   :  { %20 = vsyncpa [#allocation9], 0 }
   0x2   :  { %21 = vsyncpa [#allocation12], 0 }
   0x3   :  { %22 = vsyncpa [#allocation15], 0 }
   0x4   :  { %23 = vsyncpa [#allocation18], 0 }
   0x5   :  { %24 = vsyncpa [#allocation21], 0 }
   0x6   :  { %25 = vsyncpa [#allocation24], 0 }
   0x7   :  { %26 = vsyncpa [#allocation7], 0  ;;  %s4210_s29 = smov [#allocation8]   ;;  %s3904_s17 = scalar_lea.hbm %s4822_s1, 512 }
   0x8   :  { %s42_s30 = sshll.u32 %s4210_s29, 4  ;;  %p3905_p0 = scmp.ne.s32.totalorder %s4822_s1, %s3904_s17  ;;  %s43_s30 = int_to_ptr.vmem [resolvable:$true] %s42_s30 }
   0x9   :  { %p3908_p1 = scmp.lt.u32.totalorder %s3904_s17, %s4822_s1 }
   0xb   :  { %p3910_p2 = pnand %p3908_p1, %p3905_p0 }
   0xd   :  { %3913 = shalt.err (!%p3910_p2)
}
   0xe   :  { %s3914_s22 = scalar_lea.vmem %s43_s30, 512  ;;  %p3919_p4 = scmp.lt.s32.totalorder %s43_s30, %s43_s30 }
   0xf   :  { %p3915_p3 = scmp.ne.s32.totalorder %s43_s30, %s3914_s22  ;;  %p3920_p5 = scmp.lt.s32.totalorder %s3914_s22, %s3914_s22 }
  0x11   :  { %p3921_p6 = por %p3920_p5, %p3919_p4 }
  0x13   :  { %p3922_p7 = pnand %p3921_p6, %p3915_p3 }
  0x15   :  { %3925 = shalt.err (!%p3922_p7)
}
  0x16   :  { %s4211_s23 = smov 64   ;;  %s4836_s24 = smov 4  }
  0x17   :  { %48 = dma.hbm_to_vmem [thread:$0]  %s4822_s1, 512, %s43_s30, [#allocation9], %s4211_s23, %s4211_s23, %s4836_s24  }
  0x18   :  { %s4213_s27 = smov [#allocation11]   ;;  %s3926_s16 = scalar_lea.hbm %s4824_s3, 2048 }
  0x19   :  { %s64_s28 = sshll.u32 %s4213_s27, 4  ;;  %p3927_p8 = scmp.ne.s32.totalorder %s4824_s3, %s3926_s16  ;;  %s65_s28 = int_to_ptr.vmem [resolvable:$true] %s64_s28 }
  0x1a   :  { %p3930_p9 = scmp.lt.u32.totalorder %s3926_s16, %s4824_s3 }
  0x1c   :  { %p3932_p10 = pnand %p3930_p9, %p3927_p8 }
  0x1e   :  { %3935 = shalt.err (!%p3932_p10)
}
  0x1f   :  { %s3936_s21 = scalar_lea.vmem %s65_s28, 2048  ;;  %p3941_p12 = scmp.lt.s32.totalorder %s65_s28, %s65_s28 }
  0x20   :  { %p3937_p11 = scmp.ne.s32.totalorder %s65_s28, %s3936_s21  ;;  %p3942_p13 = scmp.lt.s32.totalorder %s3936_s21, %s3936_s21 }
  0x22   :  { %p3943_p0 = por %p3942_p13, %p3941_p12 }
  0x24   :  { %p3944_p1 = pnand %p3943_p0, %p3937_p11 }
  0x26   :  { %3947 = shalt.err (!%p3944_p1)
}
  0x27   :  { %s4214_s1 = smov 128   ;;  %s4215_s30 = smov 8  }
  0x28   :  { %70 = dma.hbm_to_vmem [thread:$0]  %s4824_s3, 2048, %s65_s28, [#allocation12], %s4214_s1, %s4214_s1, %s4215_s30  }
  0x29   :  { %s4216_s26 = smov [#allocation14]   ;;  %s4217_s29 = smov [#allocation17]  }
  0x2a   :  { %s87_s27 = sshll.u32 %s4216_s26, 4  ;;  %s109_s15 = sshll.u32 %s4217_s29, 4  ;;  %s88_s27 = int_to_ptr.vmem [resolvable:$true] %s87_s27  ;;  %s110_s15 = int_to_ptr.vmem [resolvable:$true] %s109_s15 }
  0x2b   :  { %s3948_s18 = scalar_lea.hbm %s4826_s5, 32 }
  0x2c   :  { %p3949_p2 = scmp.ne.s32.totalorder %s4826_s5, %s3948_s18  ;;  %p3952_p3 = scmp.lt.u32.totalorder %s3948_s18, %s4826_s5 }
  0x2e   :  { %p3954_p4 = pnand %p3952_p3, %p3949_p2 }
  0x30   :  { %3957 = shalt.err (!%p3954_p4)
}
  0x31   :  { %s3958_s3 = scalar_lea.vmem %s88_s27, 32  ;;  %p3963_p6 = scmp.lt.s32.totalorder %s88_s27, %s88_s27 }
  0x32   :  { %p3959_p5 = scmp.ne.s32.totalorder %s88_s27, %s3958_s3  ;;  %p3964_p7 = scmp.lt.s32.totalorder %s3958_s3, %s3958_s3 }
  0x34   :  { %p3965_p8 = por %p3964_p7, %p3963_p6 }
  0x36   :  { %p3966_p9 = pnand %p3965_p8, %p3959_p5 }
  0x38   :  { %3969 = shalt.err (!%p3966_p9)
}
  0x39   :  { %90 = dma.hbm_to_vmem [thread:$0]  %s4826_s5, 32, %s88_s27, [#allocation15]  }
  0x3a   :  { %s3970_s29 = scalar_lea.hbm %s4828_s7, 64 }
  0x3b   :  { %p3971_p10 = scmp.ne.s32.totalorder %s4828_s7, %s3970_s29  ;;  %p3974_p11 = scmp.lt.u32.totalorder %s3970_s29, %s4828_s7 }
  0x3d   :  { %p3976_p12 = pnand %p3974_p11, %p3971_p10 }
  0x3f   :  { %3979 = shalt.err (!%p3976_p12)
}
  0x40   :  { %s3980_s19 = scalar_lea.vmem %s110_s15, 64  ;;  %p3985_p0 = scmp.lt.s32.totalorder %s110_s15, %s110_s15 }
  0x41   :  { %p3981_p13 = scmp.ne.s32.totalorder %s110_s15, %s3980_s19  ;;  %p3986_p1 = scmp.lt.s32.totalorder %s3980_s19, %s3980_s19 }
  0x43   :  { %p3987_p2 = por %p3986_p1, %p3985_p0 }
  0x45   :  { %p3988_p3 = pnand %p3987_p2, %p3981_p13 }
  0x47   :  { %3991 = shalt.err (!%p3988_p3)
}
  0x48   :  { %112 = dma.hbm_to_vmem [thread:$0]  %s4828_s7, 64, %s110_s15, [#allocation18]  }
  0x49   :  { %s4218_s20 = smov [#allocation20]   ;;  %s4219_s3 = smov [#allocation5]  }
  0x4a   :  { %s129_s21 = sshll.u32 %s4218_s20, 4  ;;  %s33_s28 = sshll.u32 %s4219_s3, 4  ;;  %s130_s21 = int_to_ptr.vmem [resolvable:$true] %s129_s21  ;;  %s34_s28 = int_to_ptr.vmem [resolvable:$true] %s33_s28 }
  0x4b   :  { %s3992_s26 = scalar_lea.hbm %s4831_s10, 128 }
  0x4c   :  { %p3993_p4 = scmp.ne.s32.totalorder %s4831_s10, %s3992_s26  ;;  %p3996_p5 = scmp.lt.u32.totalorder %s3992_s26, %s4831_s10 }
  0x4e   :  { %p3998_p6 = pnand %p3996_p5, %p3993_p4 }
  0x50   :  { %4001 = shalt.err (!%p3998_p6)
}
  0x51   :  { %s4002_s7 = scalar_lea.vmem %s130_s21, 128  ;;  %p4007_p8 = scmp.lt.s32.totalorder %s130_s21, %s130_s21 }
  0x52   :  { %p4003_p7 = scmp.ne.s32.totalorder %s130_s21, %s4002_s7  ;;  %p4008_p9 = scmp.lt.s32.totalorder %s4002_s7, %s4002_s7 }
  0x54   :  { %p4009_p10 = por %p4008_p9, %p4007_p8 }
  0x56   :  { %p4010_p11 = pnand %p4009_p10, %p4003_p7 }
  0x58   :  { %4013 = shalt.err (!%p4010_p11)
}
  0x59   :  { %132 = dma.hbm_to_vmem [thread:$0]  %s4831_s10, 128, %s130_s21, [#allocation21]  }
  0x5a   :  { %s4014_s27 = scalar_lea.hbm %s4821_s0, 128 }
  0x5b   :  { %p4015_p12 = scmp.ne.s32.totalorder %s4821_s0, %s4014_s27  ;;  %p4018_p13 = scmp.lt.u32.totalorder %s4014_s27, %s4821_s0 }
  0x5d   :  { %p4020_p0 = pnand %p4018_p13, %p4015_p12 }
  0x5f   :  { %4023 = shalt.err (!%p4020_p0)
}
  0x60   :  { %s4024_s26 = scalar_lea.vmem %s34_s28, 128  ;;  %p4029_p2 = scmp.lt.s32.totalorder %s34_s28, %s34_s28 }
  0x61   :  { %p4025_p1 = scmp.ne.s32.totalorder %s34_s28, %s4024_s26  ;;  %p4030_p3 = scmp.lt.s32.totalorder %s4024_s26, %s4024_s26 }
  0x63   :  { %p4031_p4 = por %p4030_p3, %p4029_p2 }
  0x65   :  { %p4032_p5 = pnand %p4031_p4, %p4025_p1 }
  0x67   :  { %4035 = shalt.err (!%p4032_p5)
}
  0x68   :  { %36 = dma.hbm_to_vmem [thread:$0]  %s4821_s0, 128, %s34_s28, [#allocation6]  }
  0x69   :  { %s4220_s29 = smov [#allocation10]   ;;  %s4221_s24 = smov [#allocation13]  }
  0x6a   :  { %s55_s16 = sshll.u32 %s4220_s29, 4  ;;  %s77_s17 = sshll.u32 %s4221_s24, 4  ;;  %s56_s16 = int_to_ptr.vmem [resolvable:$true] %s55_s16  ;;  %s78_s17 = int_to_ptr.vmem [resolvable:$true] %s77_s17 }
  0x6b   :  { %s4036_s18 = scalar_lea.hbm %s4823_s2, 16 }
  0x6c   :  { %p4037_p6 = scmp.ne.s32.totalorder %s4823_s2, %s4036_s18  ;;  %p4040_p7 = scmp.lt.u32.totalorder %s4036_s18, %s4823_s2 }
  0x6e   :  { %p4042_p8 = pnand %p4040_p7, %p4037_p6 }
  0x70   :  { %4045 = shalt.err (!%p4042_p8)
}
  0x71   :  { %s4046_s0 = scalar_lea.vmem %s56_s16, 16  ;;  %s4050_s28 = scalar_lea.vmem %s56_s16, 32 }
  0x72   :  { %p4047_p9 = scmp.ne.s32.totalorder %s56_s16, %s4046_s0  ;;  %p4051_p10 = scmp.lt.s32.totalorder %s56_s16, %s56_s16 }
  0x73   :  { %p4052_p11 = scmp.lt.s32.totalorder %s4050_s28, %s4046_s0 }
  0x75   :  { %p4053_p12 = por %p4052_p11, %p4051_p10 }
  0x77   :  { %p4054_p13 = pnand %p4053_p12, %p4047_p9 }
  0x79   :  { %4057 = shalt.err (!%p4054_p13)
}
  0x7a   :  { %58 = dma.hbm_to_vmem [thread:$0]  %s4823_s2, 16, %s56_s16, [#allocation9]  }
  0x7b   :  { %s4058_s10 = scalar_lea.hbm %s4825_s4, 32 }
  0x7c   :  { %p4059_p0 = scmp.ne.s32.totalorder %s4825_s4, %s4058_s10  ;;  %p4062_p1 = scmp.lt.u32.totalorder %s4058_s10, %s4825_s4 }
  0x7e   :  { %p4064_p2 = pnand %p4062_p1, %p4059_p0 }
  0x80   :  { %4067 = shalt.err (!%p4064_p2)
}
  0x81   :  { %s4068_s15 = scalar_lea.vmem %s78_s17, 32  ;;  %p4073_p4 = scmp.lt.s32.totalorder %s78_s17, %s78_s17 }
  0x82   :  { %p4069_p3 = scmp.ne.s32.totalorder %s78_s17, %s4068_s15  ;;  %p4074_p5 = scmp.lt.s32.totalorder %s4068_s15, %s4068_s15 }
  0x84   :  { %p4075_p6 = por %p4074_p5, %p4073_p4 }
  0x86   :  { %p4076_p7 = pnand %p4075_p6, %p4069_p3 }
  0x88   :  { %4079 = shalt.err (!%p4076_p7)
}
  0x89   :  { %80 = dma.hbm_to_vmem [thread:$0]  %s4825_s4, 32, %s78_s17, [#allocation12]  }
  0x8a   :  { %s4222_s18 = smov [#allocation16]   ;;  %s4080_s20 = scalar_lea.hbm %s4827_s6, 8192 }
  0x8b   :  { %s96_s19 = sshll.u32 %s4222_s18, 4  ;;  %p4081_p8 = scmp.ne.s32.totalorder %s4827_s6, %s4080_s20  ;;  %s97_s19 = int_to_ptr.vmem [resolvable:$true] %s96_s19 }
  0x8c   :  { %p4084_p9 = scmp.lt.u32.totalorder %s4080_s20, %s4827_s6 }
  0x8e   :  { %p4086_p10 = pnand %p4084_p9, %p4081_p8 }
  0x90   :  { %4089 = shalt.err (!%p4086_p10)
}
  0x91   :  { %s4090_s25 = scalar_lea.vmem %s97_s19, 8192  ;;  %p4095_p12 = scmp.lt.s32.totalorder %s97_s19, %s97_s19 }
  0x92   :  { %p4091_p11 = scmp.ne.s32.totalorder %s97_s19, %s4090_s25  ;;  %p4096_p13 = scmp.lt.s32.totalorder %s4090_s25, %s4090_s25 }
  0x94   :  { %p4097_p0 = por %p4096_p13, %p4095_p12 }
  0x96   :  { %p4098_p1 = pnand %p4097_p0, %p4091_p11 }
  0x98   :  { %4101 = shalt.err (!%p4098_p1)
}
  0x99   :  { %s4223_s4 = smov 256   ;;  %s4224_s17 = smov 16  }
  0x9a   :  { %102 = dma.hbm_to_vmem [thread:$0]  %s4827_s6, 8192, %s97_s19, [#allocation15], %s4223_s4, %s4223_s4, %s4224_s17  }
  0x9b   :  { %s4225_s21 = smov [#allocation19]   ;;  %s4226_s24 = smov [#allocation22]  }
  0x9c   :  { %s119_s29 = sshll.u32 %s4225_s21, 4  ;;  %s139_s7 = sshll.u32 %s4226_s24, 4  ;;  %s120_s29 = int_to_ptr.vmem [resolvable:$true] %s119_s29  ;;  %s140_s7 = int_to_ptr.vmem [resolvable:$true] %s139_s7 }
  0x9d   :  { %s4102_s16 = scalar_lea.hbm %s4829_s8, 64 }
  0x9e   :  { %p4103_p2 = scmp.ne.s32.totalorder %s4829_s8, %s4102_s16  ;;  %p4106_p3 = scmp.lt.u32.totalorder %s4102_s16, %s4829_s8 }
  0xa0   :  { %p4108_p4 = pnand %p4106_p3, %p4103_p2 }
  0xa2   :  { %4111 = shalt.err (!%p4108_p4)
}
  0xa3   :  { %s4112_s6 = scalar_lea.vmem %s120_s29, 64  ;;  %p4117_p6 = scmp.lt.s32.totalorder %s120_s29, %s120_s29 }
  0xa4   :  { %p4113_p5 = scmp.ne.s32.totalorder %s120_s29, %s4112_s6  ;;  %p4118_p7 = scmp.lt.s32.totalorder %s4112_s6, %s4112_s6 }
  0xa6   :  { %p4119_p8 = por %p4118_p7, %p4117_p6 }
  0xa8   :  { %p4120_p9 = pnand %p4119_p8, %p4113_p5 }
  0xaa   :  { %4123 = shalt.err (!%p4120_p9)
}
  0xab   :  { %122 = dma.hbm_to_vmem [thread:$0]  %s4829_s8, 64, %s120_s29, [#allocation18]  }
  0xac   :  { %s4124_s22 = scalar_lea.hbm %s4832_s11, 128 }
  0xad   :  { %p4125_p10 = scmp.ne.s32.totalorder %s4832_s11, %s4124_s22  ;;  %p4128_p11 = scmp.lt.u32.totalorder %s4124_s22, %s4832_s11 }
  0xaf   :  { %p4130_p12 = pnand %p4128_p11, %p4125_p10 }
  0xb1   :  { %4133 = shalt.err (!%p4130_p12)
}
  0xb2   :  { %s4134_s10 = scalar_lea.vmem %s140_s7, 128  ;;  %p4139_p0 = scmp.lt.s32.totalorder %s140_s7, %s140_s7 }
  0xb3   :  { %p4135_p13 = scmp.ne.s32.totalorder %s140_s7, %s4134_s10  ;;  %p4140_p1 = scmp.lt.s32.totalorder %s4134_s10, %s4134_s10 }
  0xb5   :  { %p4141_p2 = por %p4140_p1, %p4139_p0 }
  0xb7   :  { %p4142_p3 = pnand %p4141_p2, %p4135_p13 }
  0xb9   :  { %4145 = shalt.err (!%p4142_p3)
}
  0xba   :  { %142 = dma.hbm_to_vmem [thread:$0]  %s4832_s11, 128, %s140_s7, [#allocation21]  }
  0xbb   :  { %s4227_s29 = smov [#allocation23]   ;;  %s4146_s16 = scalar_lea.hbm %s4834_s13, 112 }
  0xbc   :  { %s149_s24 = sshll.u32 %s4227_s29, 4  ;;  %p4147_p4 = scmp.ne.s32.totalorder %s4834_s13, %s4146_s16  ;;  %s150_s24 = int_to_ptr.vmem [resolvable:$true] %s149_s24 }
  0xbd   :  { %p4150_p5 = scmp.lt.u32.totalorder %s4146_s16, %s4834_s13 }
  0xbf   :  { %p4152_p6 = pnand %p4150_p5, %p4147_p4 }
  0xc1   :  { %4155 = shalt.err (!%p4152_p6)
}
  0xc2   :  { %s4156_s6 = scalar_lea.vmem %s150_s24, 112  ;;  %s4160_s11 = scalar_lea.vmem %s150_s24, 128 }
  0xc3   :  { %p4157_p7 = scmp.ne.s32.totalorder %s150_s24, %s4156_s6  ;;  %p4161_p8 = scmp.lt.s32.totalorder %s150_s24, %s150_s24 }
  0xc4   :  { %p4162_p9 = scmp.lt.s32.totalorder %s4160_s11, %s4156_s6 }
  0xc6   :  { %p4163_p10 = por %p4162_p9, %p4161_p8 }
  0xc8   :  { %p4164_p11 = pnand %p4163_p10, %p4157_p7 }
  0xca   :  { %4167 = shalt.err (!%p4164_p11)
}
  0xcb   :  { %152 = dma.hbm_to_vmem [thread:$0]  %s4834_s13, 112, %s150_s24, [#allocation24]  }
  0xcc   :  { %4190 = dma.done.wait [#allocation6], 128  }
  0xcd   :  { %4191 = vsyncadd [#allocation6], 4294967168 }
  0xce   :  { %4192 = dma.done.wait [#allocation9], 528  }
  0xcf   :  { %4193 = vsyncadd [#allocation9], 4294966768 }
  0xd0   :  { %4194 = dma.done.wait [#allocation12], 2080  }
  0xd1   :  { %4195 = vsyncadd [#allocation12], 4294965216 }
  0xd2   :  { %4196 = dma.done.wait [#allocation15], 8224  }
  0xd3   :  { %4197 = vsyncadd [#allocation15], 4294959072 }
  0xd4   :  { %4198 = dma.done.wait [#allocation18], 128  }
  0xd5   :  { %4199 = vsyncadd [#allocation18], 4294967168 }
  0xd6   :  { %4200 = dma.done.wait [#allocation21], 256  }
  0xd7   :  { %4201 = vsyncadd [#allocation21], 4294967040 }
  0xd8   :  { %4202 = dma.done.wait [#allocation24], 112  }
  0xd9   :  { %4203 = vsyncadd [#allocation24], 4294967184  ;;  %s194_s0 = sld [smem:[#allocation0]]   ;;  %s4228_s28 = smov 1024   ;;  %v4229_v0 = vmov 0.0   ;;  %vm4230_vm0 = vmmov 0  }
  0xda   :  { %206 = sst [smem:[#allocation27]] %s4228_s28  ;;  %3633 = vmatprep.subr.bf16.mxu0 %v4229_v0  ;;  %3641 = vmatprep.mubr.msk.bf16.mxu0 %vm4230_vm0, %v4229_v0  ;;  %s4231_s13 = smov [#allocation2]   ;;  %vm301_vm1 = vcmask 523264   ;;  %v4242_v23 = vmov 0  }
  0xdb   :  { %208 = sst [smem:[#allocation27 + $0x1]] %s4228_s28  ;;  %s202_s3 = sshll.u32 %s4231_s13, 4  ;;  %477 = vmatprep.mubr.bf16.mxu1 %v4242_v23  ;;  %s203_s3 = int_to_ptr.vmem [resolvable:$true] %s202_s3 }
  0xdc   :  { %210 = sst [smem:[#allocation27 + $0x2]] %s4215_s30  ;;  %s4232_s22 = smov 512  }
  0xdd   :  { %212 = sst [smem:[#allocation27 + $0x3]] %s4211_s23  ;;  %s4838_s17 = smov 4  }
  0xde   :  { %214 = sst [smem:[#allocation27 + $0x4]] %s4214_s1  ;;  %s4233_s26 = smov 2  }
  0xdf   :  { %218 = sst [smem:[#allocation27 + $0x6]] %s4232_s22  ;;  %s3448_s25 = sshll.u32 %s194_s0, 26 }
  0xe0   :  { %220 = sst [smem:[#allocation27 + $0x7]] %s4211_s23  ;;  %s3449_s4 = sadd.s32 134217728, %s3448_s25 }
  0xe1   :  { %222 = sst [smem:[#allocation27 + $0x8]] %s4838_s17  ;;  %s4234_s10 = smov [#allocation4]  }
  0xe2   :  { %216 = sst [smem:[#allocation27 + $0x5]] %s4233_s26  ;;  %s4235_s8 = smov [#allocation26]  }
  0xe3   :  { %224 = dma.general %s4830_s9, 32768, %s203_s3, %s4234_s10, %s4235_s8, [#allocation27], %s3449_s4, 0  }
  0xe4   :  { %s4236_s29 = smov 896   ;;  %s4237_s24 = smov 7  }
  0xe5   :  { %241 = sst [smem:[#allocation29]] %s4236_s29  ;;  %s4238_s15 = smov [#allocation3]  }
  0xe6   :  { %243 = sst [smem:[#allocation29 + $0x1]] %s4236_s29  ;;  %s237_s2 = sshll.u32 %s4238_s15, 4  ;;  %s238_s2 = int_to_ptr.vmem [resolvable:$true] %s237_s2 }
  0xe7   :  { %245 = sst [smem:[#allocation29 + $0x2]] %s4237_s24  ;;  %s4239_s16 = smov 448  }
  0xe8   :  { %247 = sst [smem:[#allocation29 + $0x3]] %s4211_s23  ;;  %s4240_s9 = smov [#allocation4 + $0x1]  }
  0xe9   :  { %249 = sst [smem:[#allocation29 + $0x4]] %s4214_s1  ;;  %s4241_s18 = smov [#allocation28]  }
  0xea   :  { %251 = sst [smem:[#allocation29 + $0x5]] %s4233_s26 }
  0xeb   :  { %253 = sst [smem:[#allocation29 + $0x6]] %s4239_s16 }
  0xec   :  { %255 = sst [smem:[#allocation29 + $0x7]] %s4211_s23 }
  0xed   :  { %257 = sst [smem:[#allocation29 + $0x8]] %s4838_s17 }
  0xee   :  { %259 = dma.general %s4833_s12, 57344, %s238_s2, %s4240_s9, %s4241_s18, [#allocation29], %s3449_s4, 0  }
  0xef   :  { %v3738_v1 = vld [vmem:[#allocation8] sm:$0xff]   ;;  %v3739_v2 = vld [vmem:[#allocation8 + $0x8] sm:$0xff]   ;;  %v3740_v5 = vld [vmem:[#allocation8 + $0x10] sm:$0xff]  }
  0xf0   :  { %3634 = vmatpush3.bf16.msra.mxu0 %v3738_v1  ;;  %v3742_v3 = vld [vmem:[#allocation11 + $0x4] ss:$8 sps:$4 sm:$0xff]   ;;  %v3744_v4 = vld [vmem:[#allocation11] ss:$8 sps:$4 sm:$0xff]   ;;  %v3745_v6 = vld [vmem:[#allocation11 + $0x14] ss:$8 sps:$4 sm:$0xff]  }
  0xf1   :  { %3635 = vmatprep.subr.bf16.mxu0 %v4229_v0  ;;  %445 = vmatprep.subr.bf16.mxu1 %v3742_v3  ;;  %v3747_v7 = vld [vmem:[#allocation11 + $0x10] ss:$8 sps:$4 sm:$0xff]   ;;  %v3748_v8 = vld [vmem:[#allocation11 + $0x24] ss:$8 sps:$4 sm:$0xff]   ;;  %v3750_v11 = vld [vmem:[#allocation11 + $0x20] ss:$8 sps:$4 sm:$0xff]  }
  0xf2   :  { %446 = vmatpush1.bf16.msra.mxu1 %v3744_v4  ;;  %v3741_v9 = vld [vmem:[#allocation8 + $0x18] sm:$0xff]   ;;  %v3754_v15 = vld [vmem:[#allocation11 + $0x44] ss:$8 sps:$4 sm:$0xff]   ;;  %v3756_v16 = vld [vmem:[#allocation11 + $0x40] ss:$8 sps:$4 sm:$0xff]  }
  0xf3   :  { %447 = vmatprep.subr.bf16.mxu1 %v3745_v6  ;;  %v260_v10 = vld [vmem:[#allocation5] sm:$0xff]  ;;  %v3760_v19 = vld [vmem:[#allocation11 + $0x64] ss:$8 sps:$4 sm:$0xff]   ;;  %v3762_v20 = vld [vmem:[#allocation11 + $0x60] ss:$8 sps:$4 sm:$0xff]  }
  0xf4   :  { %3636 = vmatpush3.bf16.msra.mxu0 %v3739_v2  ;;  %v3751_v12 = vld [vmem:[#allocation11 + $0x34] ss:$8 sps:$4 sm:$0xff]   ;;  %v261_v13 = vpack.c.bf16 %v260_v10, %v260_v10  ;;  %v3753_v14 = vld [vmem:[#allocation11 + $0x30] ss:$8 sps:$4 sm:$0xff]  }
  0xf5   :  { %3637 = vmatprep.subr.bf16.mxu0 %v4229_v0  ;;  %v3757_v17 = vld [vmem:[#allocation11 + $0x54] ss:$8 sps:$4 sm:$0xff]   ;;  %v3759_v18 = vld [vmem:[#allocation11 + $0x50] ss:$8 sps:$4 sm:$0xff]  }
  0xf6   :  { %448 = vmatpush1.bf16.msra.mxu1 %v3747_v7  ;;  %v3763_v21 = vld [vmem:[#allocation11 + $0x74] ss:$8 sps:$4 sm:$0xff]   ;;  %v3765_v22 = vld [vmem:[#allocation11 + $0x70] ss:$8 sps:$4 sm:$0xff]  }
  0xf7   :  { %449 = vmatprep.subr.bf16.mxu1 %v3748_v8  ;;  %v3452_v24 = vld [vmem:[#allocation10] ss:$0 sm:$0xff]  ;;  %v3768_v33 = vld [vmem:[#allocation16 + $0x4] ss:$16 sps:$4 sm:$0xff]   ;;  %v3766_v34 = vld [vmem:[#allocation16] ss:$16 sps:$4 sm:$0xff]  }
  0xf8   :  { %3638 = vmatpush3.bf16.msra.mxu0 %v3740_v5  ;;  %v3771_v35 = vld [vmem:[#allocation16 + $0x24] ss:$16 sps:$4 sm:$0xff]   ;;  %v3769_v36 = vld [vmem:[#allocation16 + $0x20] ss:$16 sps:$4 sm:$0xff]   ;;  %v3816_v1 = vld [vmem:[#allocation16 + $0xc] ss:$16 sps:$4 sm:$0xff]  }
  0xf9   :  { %3639 = vmatprep.subr.bf16.mxu0 %v4229_v0  ;;  %v3774_v37 = vld [vmem:[#allocation16 + $0x44] ss:$16 sps:$4 sm:$0xff]   ;;  %v3772_v38 = vld [vmem:[#allocation16 + $0x40] ss:$16 sps:$4 sm:$0xff]  }
  0xfa   :  { %450 = vmatpush1.bf16.msra.mxu1 %v3750_v11  ;;  %v3777_v39 = vld [vmem:[#allocation16 + $0x64] ss:$16 sps:$4 sm:$0xff]   ;;  %v3775_v40 = vld [vmem:[#allocation16 + $0x60] ss:$16 sps:$4 sm:$0xff]  }
  0xfb   :  { %451 = vmatprep.subr.bf16.mxu1 %v3751_v12  ;;  %v3780_v41 = vld [vmem:[#allocation16 + $0x84] ss:$16 sps:$4 sm:$0xff]   ;;  %v3778_v42 = vld [vmem:[#allocation16 + $0x80] ss:$16 sps:$4 sm:$0xff]  }
  0xfc   :  { %3640 = vmatpush3.bf16.msra.mxu0 %v3741_v9  ;;  %v3783_v43 = vld [vmem:[#allocation16 + $0xa4] ss:$16 sps:$4 sm:$0xff]   ;;  %v3781_v44 = vld [vmem:[#allocation16 + $0xa0] ss:$16 sps:$4 sm:$0xff]  }
  0xfd   :  { %v3786_v45 = vld [vmem:[#allocation16 + $0xc4] ss:$16 sps:$4 sm:$0xff]   ;;  %v3784_v46 = vld [vmem:[#allocation16 + $0xc0] ss:$16 sps:$4 sm:$0xff]  }
  0xfe   :  { %452 = vmatpush1.bf16.msra.mxu1 %v3753_v14  ;;  %v3789_v47 = vld [vmem:[#allocation16 + $0xe4] ss:$16 sps:$4 sm:$0xff]   ;;  %v3787_v48 = vld [vmem:[#allocation16 + $0xe0] ss:$16 sps:$4 sm:$0xff]  }
  0xff   :  { %3642 = vmatmul.mubr.msk.bf16.vlgmr.msra.gmra.mrb[0].mxu0 %vm301_vm1, %v261_v13  ;;  %453 = vmatprep.subr.bf16.mxu1 %v3754_v15  ;;  %v3792_v49 = vld [vmem:[#allocation16 + $0x104] ss:$16 sps:$4 sm:$0xff]   ;;  %v3790_v50 = vld [vmem:[#allocation16 + $0x100] ss:$16 sps:$4 sm:$0xff]  }
 0x100   :  { %v3795_v51 = vld [vmem:[#allocation16 + $0x124] ss:$16 sps:$4 sm:$0xff]   ;;  %v3793_v52 = vld [vmem:[#allocation16 + $0x120] ss:$16 sps:$4 sm:$0xff]  }
 0x101   :  { %v3798_v53 = vld [vmem:[#allocation16 + $0x144] ss:$16 sps:$4 sm:$0xff]   ;;  %v3796_v54 = vld [vmem:[#allocation16 + $0x140] ss:$16 sps:$4 sm:$0xff]  }
 0x102   :  { %454 = vmatpush1.bf16.msra.mxu1 %v3756_v16  ;;  %v3801_v55 = vld [vmem:[#allocation16 + $0x164] ss:$16 sps:$4 sm:$0xff]   ;;  %v3799_v56 = vld [vmem:[#allocation16 + $0x160] ss:$16 sps:$4 sm:$0xff]  }
 0x103   :  { %455 = vmatprep.subr.bf16.mxu1 %v3757_v17  ;;  %v3804_v57 = vld [vmem:[#allocation16 + $0x184] ss:$16 sps:$4 sm:$0xff]   ;;  %v3802_v58 = vld [vmem:[#allocation16 + $0x180] ss:$16 sps:$4 sm:$0xff]  }
 0x104   :  { %v3807_v59 = vld [vmem:[#allocation16 + $0x1a4] ss:$16 sps:$4 sm:$0xff]   ;;  %v3805_v60 = vld [vmem:[#allocation16 + $0x1a0] ss:$16 sps:$4 sm:$0xff]  }
 0x105   :  { %v3810_v61 = vld [vmem:[#allocation16 + $0x1c4] ss:$16 sps:$4 sm:$0xff]   ;;  %v3808_v62 = vld [vmem:[#allocation16 + $0x1c0] ss:$16 sps:$4 sm:$0xff]  }
 0x106   :  { %456 = vmatpush1.bf16.msra.mxu1 %v3759_v18  ;;  %v3811_v63 = vld [vmem:[#allocation16 + $0x1e0] ss:$16 sps:$4 sm:$0xff]   ;;  %v3813_v0 = vld [vmem:[#allocation16 + $0x1e4] ss:$16 sps:$4 sm:$0xff]  }
 0x107   :  { %457 = vmatprep.subr.bf16.mxu1 %v3760_v19 }
 0x10a   :  { %458 = vmatpush1.bf16.msra.mxu1 %v3762_v20 }
 0x10b   :  { %459 = vmatprep.subr.bf16.mxu1 %v3763_v21 }
 0x10e   :  { %460 = vmatpush1.bf16.msra.mxu1 %v3765_v22 }
 0x10f   :  { %983 = vmatprep.subr.bf16.mxu1 %v3768_v33 }
 0x1d2   :  { %v339_v25 = vpop.f32.mrb[0].mxu0 }
 0x1d3   :  { %v340_v26 = vadd.f32 %v3452_v24, %v339_v25  ;;  %v3643_v27 = vpop.f32.mrb[1].mxu0 }
 0x1d4   :  { %v342_v28 = vpop.f32.mrb[2].mxu0 }
 0x1d5   :  { %vm345_vm2 = vcmp.gt.f32.partialorder %v340_v26, 0.0  ;;  %v346_v29 = vmul.f32 0.2, %v340_v26  ;;  %v3644_v30 = vpop.f32.mrb[3].mxu0 }
 0x1d7   :  { %v347_v31 = vsel %vm345_vm2, %v340_v26, %v346_v29 }
 0x1d8   :  { %v348_v32 = vpack.c.bf16 %v347_v31, %v347_v31 }
 0x1da   :  { %478 = vmatmul.mubr.bf16.vlgmr.msra.gmra.mrb[0].mxu1 %v348_v32 }
 0x1db   :  { %984 = vmatpush1.bf16.msra.mxu1 %v3766_v34 }
 0x1dc   :  { %985 = vmatprep.subr.bf16.mxu1 %v3771_v35 }
 0x1df   :  { %986 = vmatpush1.bf16.msra.mxu1 %v3769_v36 }
 0x1e0   :  { %987 = vmatprep.subr.bf16.mxu1 %v3774_v37 }
 0x1e3   :  { %988 = vmatpush1.bf16.msra.mxu1 %v3772_v38 }
 0x1e4   :  { %989 = vmatprep.subr.bf16.mxu1 %v3777_v39 }
 0x1e7   :  { %990 = vmatpush1.bf16.msra.mxu1 %v3775_v40  ;;  %v4243_v40 = vmov 1966171168  }
 0x1e8   :  { %991 = vmatprep.subr.bf16.mxu1 %v3780_v41  ;;  %v529_v41 = vunpack.c.l.s4 %v4243_v40  ;;  %v3856_v40 = vld [vmem:[#allocation16 + $0x1c8] ss:$16 sps:$4 sm:$0xff]  }
 0x1eb   :  { %992 = vmatpush1.bf16.msra.mxu1 %v3778_v42  ;;  %v531_v42 = vlaneseq }
 0x1ec   :  { %993 = vmatprep.subr.bf16.mxu1 %v3783_v43  ;;  %v530_v43 = vunpack.c.0.s8 %v529_v41  ;;  %v3861_v41 = vld [vmem:[#allocation16 + $0x1ec] ss:$16 sps:$4 sm:$0xff]  }
 0x1ef   :  { %994 = vmatpush1.bf16.msra.mxu1 %v3781_v44  ;;  %v4485_v44 = vshrl.u32 %v531_v42, 7  ;;  %v3859_v42 = vld [vmem:[#allocation16 + $0x1e8] ss:$16 sps:$4 sm:$0xff]  }
 0x1f0   :  { %995 = vmatprep.subr.bf16.mxu1 %v3786_v45 }
 0x1f3   :  { %996 = vmatpush1.bf16.msra.mxu1 %v3784_v46  ;;  %v4488_v46 = vsub.s32 %v530_v43, %v4485_v44 }
 0x1f4   :  { %997 = vmatprep.subr.bf16.mxu1 %v3789_v47 }
 0x1f7   :  { %998 = vmatpush1.bf16.msra.mxu1 %v3787_v48 }
 0x1f8   :  { %999 = vmatprep.subr.bf16.mxu1 %v3792_v49 }
 0x1fb   :  { %1000 = vmatpush1.bf16.msra.mxu1 %v3790_v50  ;;  %v486_v50 = vld [vmem:[#allocation13] sm:$0x3] }
 0x1fc   :  { %1001 = vmatprep.subr.bf16.mxu1 %v3795_v51 }
 0x1ff   :  { %1002 = vmatpush1.bf16.msra.mxu1 %v3793_v52  ;;  %v4493_v52 = vsub.s32 0, %v4485_v44 }
 0x200   :  { %1003 = vmatprep.subr.bf16.mxu1 %v3798_v53  ;;  %v4496_v53 = vsub.s32 1, %v4485_v44 }
 0x203   :  { %1004 = vmatpush1.bf16.msra.mxu1 %v3796_v54 }
 0x204   :  { %1005 = vmatprep.subr.bf16.mxu1 %v3801_v55 }
 0x207   :  { %1006 = vmatpush1.bf16.msra.mxu1 %v3799_v56 }
 0x208   :  { %1007 = vmatprep.subr.bf16.mxu1 %v3804_v57 }
 0x20b   :  { %1008 = vmatpush1.bf16.msra.mxu1 %v3802_v58 }
 0x20c   :  { %1009 = vmatprep.subr.bf16.mxu1 %v3807_v59 }
 0x20f   :  { %1010 = vmatpush1.bf16.msra.mxu1 %v3805_v60 }
 0x210   :  { %1011 = vmatprep.subr.bf16.mxu1 %v3810_v61 }
 0x213   :  { %1012 = vmatpush1.bf16.msra.mxu1 %v3808_v62 }
 0x214   :  { %1013 = vmatprep.subr.bf16.mxu1 %v3813_v0 }
 0x217   :  { %1014 = vmatpush1.bf16.msra.mxu1 %v3811_v63  ;;  %v487_v63 = vld [vmem:[#allocation14] sm:$0x3] }
 0x218   :  { %1024 = vmatprep.subr.bf16.mxu1 %v3816_v1 }
 0x2ad   :  { %v479_v2 = vpop.f32.mrb[0].mxu1 }
 0x2ae   :  { %v488_v3 = vrot.slane %v479_v2, 4  ;;  %v481_v4 = vpop.f32.mrb[1].mxu1 }
 0x2af   :  { %v494_v5 = vrot.slane %v481_v4, 4  ;;  %v483_v6 = vpop.f32.mrb[2].mxu1 }
 0x2b0   :  { %v489_v7 = vadd.f32 %v488_v3, %v479_v2  ;;  %v484_v8 = vpop.f32.mrb[3].mxu1 }
 0x2b1   :  { %v495_v9 = vadd.f32 %v494_v5, %v481_v4 }
 0x2b2   :  { %v490_v10 = vrot.slane %v489_v7, 2 }
 0x2b3   :  { %v496_v11 = vrot.slane %v495_v9, 2 }
 0x2b4   :  { %v491_v12 = vadd.f32 %v490_v10, %v489_v7 }
 0x2b5   :  { %v497_v13 = vadd.f32 %v496_v11, %v495_v9  ;;  %v3814_v11 = vld [vmem:[#allocation16 + $0x8] ss:$16 sps:$4 sm:$0xff]  }
 0x2b6   :  { %v492_v14 = vrot.slane %v491_v12, 1 }
 0x2b7   :  { %v498_v15 = vrot.slane %v497_v13, 1 }
 0x2b8   :  { %v493_v16 = vadd.f32 %v492_v14, %v491_v12  ;;  %v3817_v14 = vld [vmem:[#allocation16 + $0x28] ss:$16 sps:$4 sm:$0xff]  }
 0x2b9   :  { %v499_v17 = vadd.f32 %v498_v15, %v497_v13  ;;  %v3819_v13 = vld [vmem:[#allocation16 + $0x2c] ss:$16 sps:$4 sm:$0xff]  }
 0x2ba   :  { %v501_v18 = vmul.f32 0.125, %v493_v16  ;;  %v3822_v15 = vld [vmem:[#allocation16 + $0x4c] ss:$16 sps:$4 sm:$0xff]   ;;  %v3820_v16 = vld [vmem:[#allocation16 + $0x48] ss:$16 sps:$4 sm:$0xff]  }
 0x2bb   :  { %v502_v19 = vmul.f32 0.125, %v499_v17  ;;  %v3825_v17 = vld [vmem:[#allocation16 + $0x6c] ss:$16 sps:$4 sm:$0xff]  }
 0x2bc   :  { %v503_v20 = vsub.f32 %v479_v2, %v501_v18 }
 0x2bd   :  { %v504_v21 = vsub.f32 %v481_v4, %v502_v19 }
 0x2be   :  { %v505_v22 = vmul.f32 %v503_v20, %v503_v20  ;;  %v3826_v20 = vld [vmem:[#allocation16 + $0x88] ss:$16 sps:$4 sm:$0xff]  }
 0x2bf   :  { %v506_v23 = vmul.f32 %v504_v21, %v504_v21  ;;  %v3831_v21 = vld [vmem:[#allocation16 + $0xac] ss:$16 sps:$4 sm:$0xff]  }
 0x2c0   :  { %v507_v24 = vrot.slane %v505_v22, 4 }
 0x2c1   :  { %v513_v25 = vrot.slane %v506_v23, 4 }
 0x2c2   :  { %v508_v26 = vadd.f32 %v507_v24, %v505_v22  ;;  %v3829_v22 = vld [vmem:[#allocation16 + $0xa8] ss:$16 sps:$4 sm:$0xff]  }
 0x2c3   :  { %v514_v27 = vadd.f32 %v513_v25, %v506_v23  ;;  %v3834_v23 = vld [vmem:[#allocation16 + $0xcc] ss:$16 sps:$4 sm:$0xff]   ;;  %v3832_v24 = vld [vmem:[#allocation16 + $0xc8] ss:$16 sps:$4 sm:$0xff]  }
 0x2c4   :  { %v509_v28 = vrot.slane %v508_v26, 2  ;;  %v3837_v25 = vld [vmem:[#allocation16 + $0xec] ss:$16 sps:$4 sm:$0xff]  }
 0x2c5   :  { %v515_v29 = vrot.slane %v514_v27, 2 }
 0x2c6   :  { %v510_v30 = vadd.f32 %v509_v28, %v508_v26  ;;  %v3835_v26 = vld [vmem:[#allocation16 + $0xe8] ss:$16 sps:$4 sm:$0xff]  }
 0x2c7   :  { %v516_v31 = vadd.f32 %v515_v29, %v514_v27  ;;  %v3840_v27 = vld [vmem:[#allocation16 + $0x10c] ss:$16 sps:$4 sm:$0xff]   ;;  %v3838_v28 = vld [vmem:[#allocation16 + $0x108] ss:$16 sps:$4 sm:$0xff]  }
 0x2c8   :  { %v511_v32 = vrot.slane %v510_v30, 1  ;;  %v3843_v29 = vld [vmem:[#allocation16 + $0x12c] ss:$16 sps:$4 sm:$0xff]  }
 0x2c9   :  { %v517_v33 = vrot.slane %v516_v31, 1 }
 0x2ca   :  { %v512_v34 = vadd.f32 %v511_v32, %v510_v30  ;;  %v3841_v30 = vld [vmem:[#allocation16 + $0x128] ss:$16 sps:$4 sm:$0xff]  }
 0x2cb   :  { %v518_v35 = vadd.f32 %v517_v33, %v516_v31  ;;  %v3846_v31 = vld [vmem:[#allocation16 + $0x14c] ss:$16 sps:$4 sm:$0xff]   ;;  %v3844_v32 = vld [vmem:[#allocation16 + $0x148] ss:$16 sps:$4 sm:$0xff]  }
 0x2cc   :  { %v519_v36 = vmul.f32 0.125, %v512_v34  ;;  %v3849_v33 = vld [vmem:[#allocation16 + $0x16c] ss:$16 sps:$4 sm:$0xff]   ;;  %v3847_v34 = vld [vmem:[#allocation16 + $0x168] ss:$16 sps:$4 sm:$0xff]  }
 0x2cd   :  { %v520_v37 = vmul.f32 0.125, %v518_v35  ;;  %v3852_v35 = vld [vmem:[#allocation16 + $0x18c] ss:$16 sps:$4 sm:$0xff]  }
 0x2ce   :  { %v521_v38 = vadd.f32 1e-05, %v519_v36  ;;  %v3850_v36 = vld [vmem:[#allocation16 + $0x188] ss:$16 sps:$4 sm:$0xff]  }
 0x2cf   :  { %v522_v39 = vadd.f32 1e-05, %v520_v37  ;;  %v3855_v37 = vld [vmem:[#allocation16 + $0x1ac] ss:$16 sps:$4 sm:$0xff]  }
 0x2d0   :  { %3862 = vrsqrt.f32 %v521_v38  ;;  %v3853_v38 = vld [vmem:[#allocation16 + $0x1a8] ss:$16 sps:$4 sm:$0xff]  }
 0x2d1   :  { %3864 = vrsqrt.f32 %v522_v39  ;;  %v3858_v39 = vld [vmem:[#allocation16 + $0x1cc] ss:$16 sps:$4 sm:$0xff]  }
 0x2da   :  { %v3863_v45 = vpop.eup %3862 }
 0x2db   :  { %v3865_v47 = vpop.eup %3864 }
 0x2dc   :  { %v527_v48 = vcombine.low %v3863_v45, %v3865_v47 }
 0x2de   :  { %v534_v49 = vrot.slane %v527_v48, %v4488_v46 }
 0x2e0   :  { %v541_v51 = vrot.slane %v534_v49, %v4488_v46 }
 0x2e2   :  { %v543_v54 = vmul.f32 %v541_v51, %v486_v50 }
 0x2e4   :  { %v548_v55 = vrot.slane %v543_v54, %v4493_v52  ;;  %v552_v56 = vrot.slane %v543_v54, %v4496_v53 }
 0x2e6   :  { %v555_v57 = vmul.f32 %v548_v55, %v501_v18  ;;  %v556_v58 = vmul.f32 %v552_v56, %v502_v19  ;;  %v576_v59 = vmul.f32 %v548_v55, %v479_v2  ;;  %v577_v60 = vmul.f32 %v552_v56, %v481_v4  ;;  %v3823_v18 = vld [vmem:[#allocation16 + $0x68] ss:$16 sps:$4 sm:$0xff]   ;;  %v3828_v19 = vld [vmem:[#allocation16 + $0x8c] ss:$16 sps:$4 sm:$0xff]  }
 0x2e8   :  { %v559_v61 = vcombine.low %v555_v57, %v556_v58 }
 0x2ea   :  { %v566_v62 = vrot.slane %v559_v61, %v4488_v46 }
 0x2ec   :  { %v573_v0 = vrot.slane %v566_v62, %v4488_v46 }
 0x2ee   :  { %v575_v1 = vsub.f32 %v487_v63, %v573_v0 }
 0x2f0   :  { %v582_v3 = vrot.slane %v575_v1, %v4493_v52  ;;  %v586_v5 = vrot.slane %v575_v1, %v4496_v53 }
 0x2f2   :  { %v590_v6 = vadd.f32 %v586_v5, %v577_v60  ;;  %v589_v7 = vadd.f32 %v582_v3, %v576_v59 }
 0x2f4   :  { %vm592_vm3 = vcmp.gt.f32.partialorder %v590_v6, 0.0  ;;  %v594_v8 = vmul.f32 0.2, %v590_v6  ;;  %vm591_vm4 = vcmp.gt.f32.partialorder %v589_v7, 0.0  ;;  %v593_v9 = vmul.f32 0.2, %v589_v7 }
 0x2f6   :  { %v596_v10 = vsel %vm592_vm3, %v590_v6, %v594_v8  ;;  %v595_v2 = vsel %vm591_vm4, %v589_v7, %v593_v9 }
 0x2f7   :  { %v598_v4 = vpack.c.bf16 %v596_v10, %v596_v10  ;;  %v4504_v12 = vpack.c.bf16 %v595_v2, %v595_v2 }
 0x2f9   :  { %1015 = vmatprep.mubr.bf16.mxu1 %v598_v4 }
 0x2fa   :  { %1016 = vmatmul.mubr.bf16.vlgmr.msra.gmra.mrb[4].mxu1 %v4504_v12 }
 0x2fb   :  { %1025 = vmatpush1.bf16.msra.mxu1 %v3814_v11  ;;  %1056 = vmatprep.mubr.bf16.mxu1 %v598_v4 }
 0x2fc   :  { %1026 = vmatprep.subr.bf16.mxu1 %v3819_v13 }
 0x2ff   :  { %1027 = vmatpush1.bf16.msra.mxu1 %v3817_v14 }
 0x300   :  { %1028 = vmatprep.subr.bf16.mxu1 %v3822_v15 }
 0x303   :  { %1029 = vmatpush1.bf16.msra.mxu1 %v3820_v16 }
 0x304   :  { %1030 = vmatprep.subr.bf16.mxu1 %v3825_v17 }
 0x307   :  { %1031 = vmatpush1.bf16.msra.mxu1 %v3823_v18 }
 0x308   :  { %1032 = vmatprep.subr.bf16.mxu1 %v3828_v19 }
 0x30b   :  { %1033 = vmatpush1.bf16.msra.mxu1 %v3826_v20 }
 0x30c   :  { %1034 = vmatprep.subr.bf16.mxu1 %v3831_v21 }
 0x30f   :  { %1035 = vmatpush1.bf16.msra.mxu1 %v3829_v22 }
 0x310   :  { %1036 = vmatprep.subr.bf16.mxu1 %v3834_v23 }
 0x313   :  { %1037 = vmatpush1.bf16.msra.mxu1 %v3832_v24 }
 0x314   :  { %1038 = vmatprep.subr.bf16.mxu1 %v3837_v25 }
 0x317   :  { %1039 = vmatpush1.bf16.msra.mxu1 %v3835_v26 }
 0x318   :  { %1040 = vmatprep.subr.bf16.mxu1 %v3840_v27 }
 0x31b   :  { %1041 = vmatpush1.bf16.msra.mxu1 %v3838_v28 }
 0x31c   :  { %1042 = vmatprep.subr.bf16.mxu1 %v3843_v29 }
 0x31f   :  { %1043 = vmatpush1.bf16.msra.mxu1 %v3841_v30 }
 0x320   :  { %1044 = vmatprep.subr.bf16.mxu1 %v3846_v31 }
 0x323   :  { %1045 = vmatpush1.bf16.msra.mxu1 %v3844_v32 }
 0x324   :  { %1046 = vmatprep.subr.bf16.mxu1 %v3849_v33 }
 0x327   :  { %1047 = vmatpush1.bf16.msra.mxu1 %v3847_v34 }
 0x328   :  { %1048 = vmatprep.subr.bf16.mxu1 %v3852_v35 }
 0x32b   :  { %1049 = vmatpush1.bf16.msra.mxu1 %v3850_v36 }
 0x32c   :  { %1050 = vmatprep.subr.bf16.mxu1 %v3855_v37 }
 0x32f   :  { %1051 = vmatpush1.bf16.msra.mxu1 %v3853_v38 }
 0x330   :  { %1052 = vmatprep.subr.bf16.mxu1 %v3858_v39 }
 0x333   :  { %1053 = vmatpush1.bf16.msra.mxu1 %v3856_v40 }
 0x334   :  { %1054 = vmatprep.subr.bf16.mxu1 %v3861_v41 }
 0x337   :  { %1055 = vmatpush1.bf16.msra.mxu1 %v3859_v42 }
 0x33a   :  { %1057 = vmatmul.mubr.bf16.vlgmr.msra.gmra.mrb[8].mxu1 %v4504_v12 }
 0x3cd   :  { %v4508_v43 = vpop.f32.mrb[4].mxu1 }
 0x3ce   :  { %v1067_v45 = vrot.slane %v4508_v43, 4  ;;  %v4511_v47 = vpop.f32.mrb[5].mxu1 }
 0x3cf   :  { %v1073_v48 = vrot.slane %v4511_v47, 4  ;;  %v1021_v49 = vpop.f32.mrb[6].mxu1 }
 0x3d0   :  { %v1068_v50 = vadd.f32 %v1067_v45, %v4508_v43  ;;  %v1022_v51 = vpop.f32.mrb[7].mxu1 }
 0x3d1   :  { %v1074_v54 = vadd.f32 %v1073_v48, %v4511_v47 }
 0x3d2   :  { %v1069_v55 = vrot.slane %v1068_v50, 2 }
 0x3d3   :  { %v1075_v56 = vrot.slane %v1074_v54, 2 }
 0x3d4   :  { %v1070_v57 = vadd.f32 %v1069_v55, %v1068_v50 }
 0x3d5   :  { %v1076_v58 = vadd.f32 %v1075_v56, %v1074_v54 }
 0x3d6   :  { %v1071_v59 = vrot.slane %v1070_v57, 1 }
 0x3d7   :  { %v1077_v60 = vrot.slane %v1076_v58, 1 }
 0x3d8   :  { %v1072_v61 = vadd.f32 %v1071_v59, %v1070_v57 }
 0x3d9   :  { %v1078_v62 = vadd.f32 %v1077_v60, %v1076_v58 }
 0x3da   :  { %v4516_v63 = vmul.f32 0.125, %v1072_v61 }
 0x3db   :  { %v4518_v0 = vmul.f32 0.125, %v1078_v62 }
 0x3dc   :  { %v1095_v1 = vsub.f32 %v4508_v43, %v4516_v63 }
 0x3dd   :  { %v1096_v3 = vsub.f32 %v4511_v47, %v4518_v0 }
 0x3de   :  { %v1099_v5 = vmul.f32 %v1095_v1, %v1095_v1 }
 0x3df   :  { %v1100_v6 = vmul.f32 %v1096_v3, %v1096_v3 }
 0x3e0   :  { %v1103_v7 = vrot.slane %v1099_v5, 4 }
 0x3e1   :  { %v1109_v8 = vrot.slane %v1100_v6, 4 }
 0x3e2   :  { %v1104_v9 = vadd.f32 %v1103_v7, %v1099_v5 }
 0x3e3   :  { %v1110_v10 = vadd.f32 %v1109_v8, %v1100_v6 }
 0x3e4   :  { %v1105_v2 = vrot.slane %v1104_v9, 2 }
 0x3e5   :  { %v1111_v4 = vrot.slane %v1110_v10, 2 }
 0x3e6   :  { %v1106_v11 = vadd.f32 %v1105_v2, %v1104_v9 }
 0x3e7   :  { %v1112_v12 = vadd.f32 %v1111_v4, %v1110_v10 }
 0x3e8   :  { %v1107_v13 = vrot.slane %v1106_v11, 1 }
 0x3e9   :  { %v1113_v14 = vrot.slane %v1112_v12, 1 }
 0x3ea   :  { %v1108_v15 = vadd.f32 %v1107_v13, %v1106_v11 }
 0x3eb   :  { %v1114_v16 = vadd.f32 %v1113_v14, %v1112_v12  ;;  %v1065_v12 = vld [vmem:[#allocation17] sm:$0xf]  ;;  %v4528_v14 = vsub.s32 2, %v4485_v44 }
 0x3ec   :  { %v1127_v17 = vmul.f32 0.125, %v1108_v15  ;;  %v4531_v15 = vsub.s32 3, %v4485_v44 }
 0x3ed   :  { %v1128_v18 = vmul.f32 0.125, %v1114_v16 }
 0x3ee   :  { %v1131_v19 = vadd.f32 1e-05, %v1127_v17 }
 0x3ef   :  { %v1132_v20 = vadd.f32 1e-05, %v1128_v18 }
 0x3f0   :  { %3866 = vrsqrt.f32 %v1131_v19 }
 0x3f1   :  { %3868 = vrsqrt.f32 %v1132_v20 }
 0x3fa   :  { %v3867_v21 = vpop.eup %3866 }
 0x3fb   :  { %v3869_v22 = vpop.eup %3868 }
 0x3fc   :  { %v1143_v23 = vcombine.low %v3867_v21, %v3869_v22 }
 0x3fe   :  { %v1151_v2 = vrot.slane %v1143_v23, %v4488_v46 }
 0x40d   :  { %v1058_v24 = vpop.f32.mrb[8].mxu1 }
 0x40e   :  { %v1079_v25 = vrot.slane %v1058_v24, 4  ;;  %v1060_v26 = vpop.f32.mrb[9].mxu1 }
 0x40f   :  { %v1085_v27 = vrot.slane %v1060_v26, 4  ;;  %v1062_v28 = vpop.f32.mrb[10].mxu1 }
 0x410   :  { %v1080_v29 = vadd.f32 %v1079_v25, %v1058_v24  ;;  %v1063_v30 = vpop.f32.mrb[11].mxu1 }
 0x411   :  { %v1086_v31 = vadd.f32 %v1085_v27, %v1060_v26 }
 0x412   :  { %v1081_v32 = vrot.slane %v1080_v29, 2 }
 0x413   :  { %v1087_v33 = vrot.slane %v1086_v31, 2 }
 0x414   :  { %v1082_v34 = vadd.f32 %v1081_v32, %v1080_v29 }
 0x415   :  { %v1088_v35 = vadd.f32 %v1087_v33, %v1086_v31 }
 0x416   :  { %v1083_v36 = vrot.slane %v1082_v34, 1 }
 0x417   :  { %v1089_v37 = vrot.slane %v1088_v35, 1 }
 0x418   :  { %v1084_v38 = vadd.f32 %v1083_v36, %v1082_v34  ;;  %v1066_v36 = vld [vmem:[#allocation19] sm:$0xf] }
 0x419   :  { %v1090_v39 = vadd.f32 %v1089_v37, %v1088_v35 }
 0x41a   :  { %v1093_v40 = vmul.f32 0.125, %v1084_v38 }
 0x41b   :  { %v1094_v41 = vmul.f32 0.125, %v1090_v39 }
 0x41c   :  { %v1097_v42 = vsub.f32 %v1058_v24, %v1093_v40 }
 0x41d   :  { %v1098_v45 = vsub.f32 %v1060_v26, %v1094_v41 }
 0x41e   :  { %v1101_v48 = vmul.f32 %v1097_v42, %v1097_v42 }
 0x41f   :  { %v1102_v49 = vmul.f32 %v1098_v45, %v1098_v45 }
 0x420   :  { %v1115_v50 = vrot.slane %v1101_v48, 4 }
 0x421   :  { %v1121_v51 = vrot.slane %v1102_v49, 4 }
 0x422   :  { %v1116_v54 = vadd.f32 %v1115_v50, %v1101_v48 }
 0x423   :  { %v1122_v55 = vadd.f32 %v1121_v51, %v1102_v49 }
 0x424   :  { %v1117_v56 = vrot.slane %v1116_v54, 2 }
 0x425   :  { %v1123_v57 = vrot.slane %v1122_v55, 2 }
 0x426   :  { %v1118_v58 = vadd.f32 %v1117_v56, %v1116_v54 }
 0x427   :  { %v1124_v59 = vadd.f32 %v1123_v57, %v1122_v55 }
 0x428   :  { %v1119_v60 = vrot.slane %v1118_v58, 1 }
 0x429   :  { %v1125_v61 = vrot.slane %v1124_v59, 1 }
 0x42a   :  { %v1120_v62 = vadd.f32 %v1119_v60, %v1118_v58 }
 0x42b   :  { %v1126_v1 = vadd.f32 %v1125_v61, %v1124_v59 }
 0x42c   :  { %v1129_v3 = vmul.f32 0.125, %v1120_v62 }
 0x42d   :  { %v1130_v5 = vmul.f32 0.125, %v1126_v1 }
 0x42e   :  { %v1133_v6 = vadd.f32 1e-05, %v1129_v3 }
 0x42f   :  { %v1134_v7 = vadd.f32 1e-05, %v1130_v5 }
 0x430   :  { %3870 = vrsqrt.f32 %v1133_v6 }
 0x431   :  { %3872 = vrsqrt.f32 %v1134_v7 }
 0x43a   :  { %v3871_v8 = vpop.eup %3870 }
 0x43b   :  { %v3873_v9 = vpop.eup %3872 }
 0x43c   :  { %v1144_v10 = vcombine.low %v3871_v8, %v3873_v9 }
 0x43e   :  { %v1158_v4 = vrot.slane %v1144_v10, %v4488_v46 }
 0x440   :  { %v1159_v11 = vcombine.low %v1151_v2, %v1158_v4 }
 0x442   :  { %v1166_v13 = vrot.slane %v1159_v11, %v4488_v46 }
 0x444   :  { %v1168_v16 = vmul.f32 %v1166_v13, %v1065_v12 }
 0x446   :  { %v1173_v17 = vrot.slane %v1168_v16, %v4493_v52  ;;  %v1177_v18 = vrot.slane %v1168_v16, %v4496_v53  ;;  %v1181_v19 = vrot.slane %v1168_v16, %v4528_v14  ;;  %v1185_v20 = vrot.slane %v1168_v16, %v4531_v15 }
 0x448   :  { %v1190_v21 = vmul.f32 %v1173_v17, %v4516_v63  ;;  %v1191_v22 = vmul.f32 %v1177_v18, %v4518_v0  ;;  %v1192_v23 = vmul.f32 %v1181_v19, %v1093_v40  ;;  %v1193_v25 = vmul.f32 %v1185_v20, %v1094_v41 }
 0x449   :  { %v1224_v27 = vmul.f32 %v1173_v17, %v4508_v43  ;;  %v1225_v28 = vmul.f32 %v1177_v18, %v4511_v47  ;;  %v1226_v29 = vmul.f32 %v1181_v19, %v1058_v24  ;;  %v1227_v30 = vmul.f32 %v1185_v20, %v1060_v26 }
 0x44a   :  { %v1198_v31 = vcombine.low %v1190_v21, %v1191_v22  ;;  %v1199_v32 = vcombine.low %v1192_v23, %v1193_v25 }
 0x44c   :  { %v1206_v33 = vrot.slane %v1198_v31, %v4488_v46  ;;  %v1213_v34 = vrot.slane %v1199_v32, %v4488_v46 }
 0x44e   :  { %v1214_v35 = vcombine.low %v1206_v33, %v1213_v34 }
 0x450   :  { %v1221_v63 = vrot.slane %v1214_v35, %v4488_v46 }
 0x452   :  { %v1223_v37 = vsub.f32 %v1066_v36, %v1221_v63 }
 0x454   :  { %v1232_v0 = vrot.slane %v1223_v37, %v4493_v52  ;;  %v1236_v38 = vrot.slane %v1223_v37, %v4496_v53  ;;  %v1240_v43 = vrot.slane %v1223_v37, %v4528_v14  ;;  %v1244_v47 = vrot.slane %v1223_v37, %v4531_v15 }
 0x456   :  { %v1249_v24 = vadd.f32 %v1232_v0, %v1224_v27  ;;  %v1250_v26 = vadd.f32 %v1236_v38, %v1225_v28  ;;  %v1251_v39 = vadd.f32 %v1240_v43, %v1226_v29  ;;  %v1252_v40 = vadd.f32 %v1244_v47, %v1227_v30 }
 0x458   :  { %vm1253_vm5 = vcmp.gt.f32.partialorder %v1249_v24, 0.0  ;;  %vm1254_vm6 = vcmp.gt.f32.partialorder %v1250_v26, 0.0  ;;  %vm1255_vm7 = vcmp.gt.f32.partialorder %v1251_v39, 0.0  ;;  %vm1256_vm8 = vcmp.gt.f32.partialorder %v1252_v40, 0.0 }
 0x459   :  { %v1257_v41 = vmul.f32 0.2, %v1249_v24  ;;  %v1258_v42 = vmul.f32 0.2, %v1250_v26  ;;  %v1259_v45 = vmul.f32 0.2, %v1251_v39 }
 0x45a   :  { %v1260_v48 = vmul.f32 0.2, %v1252_v40 }
 0x45b   :  { %v4548_v49 = vsel %vm1253_vm5, %v1249_v24, %v1257_v41  ;;  %v1262_v50 = vsel %vm1254_vm6, %v1250_v26, %v1258_v42  ;;  %v4550_v51 = vsel %vm1255_vm7, %v1251_v39, %v1259_v45 }
 0x45c   :  { %v4552_v54 = vsel %vm1256_vm8, %v1252_v40, %v1260_v48 }
 0x45d   :  { %4204 = dma.done.wait [#allocation4], 32768 }
 0x45e   :  { %4205 = vsyncadd [#allocation4], 4294934528  ;;  %v4554_v55 = vpack.c.bf16 %v1262_v50, %v1262_v50  ;;  %v1274_v56 = vld [vmem:[#allocation2 + $0x8] sm:$0xff]  ;;  %v1276_v57 = vld [vmem:[#allocation2 + $0x18] sm:$0xff] }
 0x45f   :  { %v1273_v58 = vld [vmem:[#allocation2] sm:$0xff]  ;;  %1529 = vmatprep.subr.bf16.mxu0 %v1274_v56  ;;  %1611 = vmatprep.subr.bf16.mxu1 %v1276_v57  ;;  %v1275_v59 = vld [vmem:[#allocation2 + $0x10] sm:$0xff]  ;;  %v1282_v60 = vld [vmem:[#allocation2 + $0x48] sm:$0xff] }
 0x460   :  { %1561 = vmatprep.mubr.bf16.mxu0 %v4554_v55  ;;  %1643 = vmatprep.mubr.bf16.mxu1 %v4554_v55  ;;  %v1284_v61 = vld [vmem:[#allocation2 + $0x58] sm:$0xff]  ;;  %v1281_v62 = vld [vmem:[#allocation2 + $0x40] sm:$0xff]  ;;  %v1283_v1 = vld [vmem:[#allocation2 + $0x50] sm:$0xff] }
 0x461   :  { %1530 = vmatpush1.bf16.msra.mxu0 %v1273_v58  ;;  %1612 = vmatpush1.bf16.msra.mxu1 %v1275_v59  ;;  %v1290_v3 = vld [vmem:[#allocation2 + $0x88] sm:$0xff]  ;;  %v1292_v5 = vld [vmem:[#allocation2 + $0x98] sm:$0xff]  ;;  %v1289_v6 = vld [vmem:[#allocation2 + $0x80] sm:$0xff] }
 0x462   :  { %1531 = vmatprep.subr.bf16.mxu0 %v1282_v60  ;;  %1613 = vmatprep.subr.bf16.mxu1 %v1284_v61  ;;  %v1291_v7 = vld [vmem:[#allocation2 + $0x90] sm:$0xff]  ;;  %v1298_v8 = vld [vmem:[#allocation2 + $0xc8] sm:$0xff]  ;;  %v1300_v9 = vld [vmem:[#allocation2 + $0xd8] sm:$0xff] }
 0x463   :  { %v1297_v10 = vld [vmem:[#allocation2 + $0xc0] sm:$0xff]  ;;  %v1299_v2 = vld [vmem:[#allocation2 + $0xd0] sm:$0xff]  ;;  %v1306_v4 = vld [vmem:[#allocation2 + $0x108] sm:$0xff] }
 0x464   :  { %v1308_v11 = vld [vmem:[#allocation2 + $0x118] sm:$0xff]  ;;  %v1305_v12 = vld [vmem:[#allocation2 + $0x100] sm:$0xff]  ;;  %v1307_v13 = vld [vmem:[#allocation2 + $0x110] sm:$0xff] }
 0x465   :  { %1532 = vmatpush1.bf16.msra.mxu0 %v1281_v62  ;;  %1614 = vmatpush1.bf16.msra.mxu1 %v1283_v1  ;;  %v1314_v16 = vld [vmem:[#allocation2 + $0x148] sm:$0xff]  ;;  %v1316_v17 = vld [vmem:[#allocation2 + $0x158] sm:$0xff]  ;;  %v1313_v18 = vld [vmem:[#allocation2 + $0x140] sm:$0xff] }
 0x466   :  { %1533 = vmatprep.subr.bf16.mxu0 %v1290_v3  ;;  %1615 = vmatprep.subr.bf16.mxu1 %v1292_v5  ;;  %v1315_v19 = vld [vmem:[#allocation2 + $0x150] sm:$0xff]  ;;  %v1322_v20 = vld [vmem:[#allocation2 + $0x188] sm:$0xff]  ;;  %v1324_v21 = vld [vmem:[#allocation2 + $0x198] sm:$0xff] }
 0x467   :  { %v1321_v22 = vld [vmem:[#allocation2 + $0x180] sm:$0xff]  ;;  %v1323_v23 = vld [vmem:[#allocation2 + $0x190] sm:$0xff]  ;;  %v1330_v25 = vld [vmem:[#allocation2 + $0x1c8] sm:$0xff] }
 0x468   :  { %v1332_v27 = vld [vmem:[#allocation2 + $0x1d8] sm:$0xff]  ;;  %v1329_v28 = vld [vmem:[#allocation2 + $0x1c0] sm:$0xff]  ;;  %v1331_v29 = vld [vmem:[#allocation2 + $0x1d0] sm:$0xff] }
 0x469   :  { %1534 = vmatpush1.bf16.msra.mxu0 %v1289_v6  ;;  %1616 = vmatpush1.bf16.msra.mxu1 %v1291_v7  ;;  %v1338_v30 = vld [vmem:[#allocation2 + $0x208] sm:$0xff]  ;;  %v1340_v31 = vld [vmem:[#allocation2 + $0x218] sm:$0xff]  ;;  %v1337_v32 = vld [vmem:[#allocation2 + $0x200] sm:$0xff] }
 0x46a   :  { %1535 = vmatprep.subr.bf16.mxu0 %v1298_v8  ;;  %1617 = vmatprep.subr.bf16.mxu1 %v1300_v9  ;;  %v1339_v33 = vld [vmem:[#allocation2 + $0x210] sm:$0xff]  ;;  %v1346_v34 = vld [vmem:[#allocation2 + $0x248] sm:$0xff]  ;;  %v1348_v35 = vld [vmem:[#allocation2 + $0x258] sm:$0xff]  ;;  %v4560_v8 = vpack.c.bf16 %v4548_v49, %v4548_v49 }
 0x46b   :  { %v1345_v36 = vld [vmem:[#allocation2 + $0x240] sm:$0xff]  ;;  %v1347_v63 = vld [vmem:[#allocation2 + $0x250] sm:$0xff]  ;;  %v1354_v37 = vld [vmem:[#allocation2 + $0x288] sm:$0xff] }
 0x46c   :  { %v1356_v0 = vld [vmem:[#allocation2 + $0x298] sm:$0xff]  ;;  %v1353_v38 = vld [vmem:[#allocation2 + $0x280] sm:$0xff]  ;;  %v1355_v43 = vld [vmem:[#allocation2 + $0x290] sm:$0xff] }
 0x46d   :  { %1536 = vmatpush1.bf16.msra.mxu0 %v1297_v10  ;;  %1618 = vmatpush1.bf16.msra.mxu1 %v1299_v2  ;;  %v1362_v47 = vld [vmem:[#allocation2 + $0x2c8] sm:$0xff]  ;;  %v1364_v24 = vld [vmem:[#allocation2 + $0x2d8] sm:$0xff]  ;;  %v1361_v26 = vld [vmem:[#allocation2 + $0x2c0] sm:$0xff] }
 0x46e   :  { %1537 = vmatprep.subr.bf16.mxu0 %v1306_v4  ;;  %1619 = vmatprep.subr.bf16.mxu1 %v1308_v11  ;;  %v1363_v39 = vld [vmem:[#allocation2 + $0x2d0] sm:$0xff]  ;;  %v1370_v40 = vld [vmem:[#allocation2 + $0x308] sm:$0xff]  ;;  %v1372_v41 = vld [vmem:[#allocation2 + $0x318] sm:$0xff]  ;;  %v4564_v11 = vpack.c.bf16 %v4552_v54, %v4552_v54 }
 0x46f   :  { %v1369_v42 = vld [vmem:[#allocation2 + $0x300] sm:$0xff]  ;;  %v1371_v45 = vld [vmem:[#allocation2 + $0x310] sm:$0xff]  ;;  %v1378_v48 = vld [vmem:[#allocation2 + $0x348] sm:$0xff] }
 0x470   :  { %v1380_v50 = vld [vmem:[#allocation2 + $0x358] sm:$0xff]  ;;  %v1377_v56 = vld [vmem:[#allocation2 + $0x340] sm:$0xff]  ;;  %v1379_v57 = vld [vmem:[#allocation2 + $0x350] sm:$0xff] }
 0x471   :  { %1538 = vmatpush1.bf16.msra.mxu0 %v1305_v12  ;;  %1620 = vmatpush1.bf16.msra.mxu1 %v1307_v13  ;;  %v1386_v58 = vld [vmem:[#allocation2 + $0x388] sm:$0xff]  ;;  %v1388_v59 = vld [vmem:[#allocation2 + $0x398] sm:$0xff]  ;;  %v1385_v60 = vld [vmem:[#allocation2 + $0x380] sm:$0xff] }
 0x472   :  { %1539 = vmatprep.subr.bf16.mxu0 %v1314_v16  ;;  %1621 = vmatprep.subr.bf16.mxu1 %v1316_v17  ;;  %v1387_v61 = vld [vmem:[#allocation2 + $0x390] sm:$0xff]  ;;  %v1394_v62 = vld [vmem:[#allocation2 + $0x3c8] sm:$0xff]  ;;  %v1396_v1 = vld [vmem:[#allocation2 + $0x3d8] sm:$0xff] }
 0x473   :  { %v1393_v3 = vld [vmem:[#allocation2 + $0x3c0] sm:$0xff]  ;;  %v1395_v5 = vld [vmem:[#allocation2 + $0x3d0] sm:$0xff]  ;;  %v1402_v6 = vld [vmem:[#allocation2 + $0x408] sm:$0xff] }
 0x474   :  { %v1404_v7 = vld [vmem:[#allocation2 + $0x418] sm:$0xff]  ;;  %v1401_v9 = vld [vmem:[#allocation2 + $0x400] sm:$0xff]  ;;  %v1403_v10 = vld [vmem:[#allocation2 + $0x410] sm:$0xff] }
 0x475   :  { %1540 = vmatpush1.bf16.msra.mxu0 %v1313_v18  ;;  %1622 = vmatpush1.bf16.msra.mxu1 %v1315_v19  ;;  %v1410_v2 = vld [vmem:[#allocation2 + $0x448] sm:$0xff]  ;;  %v1412_v4 = vld [vmem:[#allocation2 + $0x458] sm:$0xff]  ;;  %v1409_v49 = vld [vmem:[#allocation2 + $0x440] sm:$0xff] }
 0x476   :  { %1541 = vmatprep.subr.bf16.mxu0 %v1322_v20  ;;  %1623 = vmatprep.subr.bf16.mxu1 %v1324_v21  ;;  %v1411_v12 = vld [vmem:[#allocation2 + $0x450] sm:$0xff]  ;;  %v1418_v13 = vld [vmem:[#allocation2 + $0x488] sm:$0xff]  ;;  %v1420_v16 = vld [vmem:[#allocation2 + $0x498] sm:$0xff] }
 0x477   :  { %v1417_v54 = vld [vmem:[#allocation2 + $0x480] sm:$0xff]  ;;  %v1419_v17 = vld [vmem:[#allocation2 + $0x490] sm:$0xff]  ;;  %v1426_v18 = vld [vmem:[#allocation2 + $0x4c8] sm:$0xff] }
 0x478   :  { %v1428_v19 = vld [vmem:[#allocation2 + $0x4d8] sm:$0xff]  ;;  %v1425_v20 = vld [vmem:[#allocation2 + $0x4c0] sm:$0xff]  ;;  %v1427_v21 = vld [vmem:[#allocation2 + $0x4d0] sm:$0xff] }
 0x479   :  { %1542 = vmatpush1.bf16.msra.mxu0 %v1321_v22  ;;  %1624 = vmatpush1.bf16.msra.mxu1 %v1323_v23  ;;  %v1434_v22 = vld [vmem:[#allocation2 + $0x508] sm:$0xff]  ;;  %v1436_v23 = vld [vmem:[#allocation2 + $0x518] sm:$0xff] }
 0x47a   :  { %1543 = vmatprep.subr.bf16.mxu0 %v1330_v25  ;;  %1625 = vmatprep.subr.bf16.mxu1 %v1332_v27  ;;  %v1433_v25 = vld [vmem:[#allocation2 + $0x500] sm:$0xff]  ;;  %v1435_v27 = vld [vmem:[#allocation2 + $0x510] sm:$0xff] }
 0x47d   :  { %1544 = vmatpush1.bf16.msra.mxu0 %v1329_v28  ;;  %1626 = vmatpush1.bf16.msra.mxu1 %v1331_v29  ;;  %v1442_v28 = vld [vmem:[#allocation2 + $0x548] sm:$0xff]  ;;  %v1444_v29 = vld [vmem:[#allocation2 + $0x558] sm:$0xff] }
 0x47e   :  { %1545 = vmatprep.subr.bf16.mxu0 %v1338_v30  ;;  %1627 = vmatprep.subr.bf16.mxu1 %v1340_v31  ;;  %v1441_v30 = vld [vmem:[#allocation2 + $0x540] sm:$0xff]  ;;  %v1443_v31 = vld [vmem:[#allocation2 + $0x550] sm:$0xff] }
 0x481   :  { %1546 = vmatpush1.bf16.msra.mxu0 %v1337_v32  ;;  %1628 = vmatpush1.bf16.msra.mxu1 %v1339_v33  ;;  %v1450_v32 = vld [vmem:[#allocation2 + $0x588] sm:$0xff]  ;;  %v1452_v33 = vld [vmem:[#allocation2 + $0x598] sm:$0xff] }
 0x482   :  { %1547 = vmatprep.subr.bf16.mxu0 %v1346_v34  ;;  %1629 = vmatprep.subr.bf16.mxu1 %v1348_v35  ;;  %v1449_v34 = vld [vmem:[#allocation2 + $0x580] sm:$0xff]  ;;  %v1451_v35 = vld [vmem:[#allocation2 + $0x590] sm:$0xff] }
 0x485   :  { %1548 = vmatpush1.bf16.msra.mxu0 %v1345_v36  ;;  %1630 = vmatpush1.bf16.msra.mxu1 %v1347_v63  ;;  %v1458_v36 = vld [vmem:[#allocation2 + $0x5c8] sm:$0xff]  ;;  %v1460_v63 = vld [vmem:[#allocation2 + $0x5d8] sm:$0xff] }
 0x486   :  { %1549 = vmatprep.subr.bf16.mxu0 %v1354_v37  ;;  %1631 = vmatprep.subr.bf16.mxu1 %v1356_v0  ;;  %v1457_v37 = vld [vmem:[#allocation2 + $0x5c0] sm:$0xff]  ;;  %v1459_v0 = vld [vmem:[#allocation2 + $0x5d0] sm:$0xff] }
 0x489   :  { %1550 = vmatpush1.bf16.msra.mxu0 %v1353_v38  ;;  %1632 = vmatpush1.bf16.msra.mxu1 %v1355_v43  ;;  %v1466_v38 = vld [vmem:[#allocation2 + $0x608] sm:$0xff]  ;;  %v1468_v43 = vld [vmem:[#allocation2 + $0x618] sm:$0xff] }
 0x48a   :  { %1551 = vmatprep.subr.bf16.mxu0 %v1362_v47  ;;  %1633 = vmatprep.subr.bf16.mxu1 %v1364_v24  ;;  %v1465_v47 = vld [vmem:[#allocation2 + $0x600] sm:$0xff]  ;;  %v1467_v24 = vld [vmem:[#allocation2 + $0x610] sm:$0xff] }
 0x48d   :  { %1552 = vmatpush1.bf16.msra.mxu0 %v1361_v26  ;;  %1634 = vmatpush1.bf16.msra.mxu1 %v1363_v39  ;;  %v1474_v26 = vld [vmem:[#allocation2 + $0x648] sm:$0xff]  ;;  %v1476_v39 = vld [vmem:[#allocation2 + $0x658] sm:$0xff] }
 0x48e   :  { %1553 = vmatprep.subr.bf16.mxu0 %v1370_v40  ;;  %1635 = vmatprep.subr.bf16.mxu1 %v1372_v41  ;;  %v1473_v40 = vld [vmem:[#allocation2 + $0x640] sm:$0xff]  ;;  %v1475_v41 = vld [vmem:[#allocation2 + $0x650] sm:$0xff] }
 0x491   :  { %1554 = vmatpush1.bf16.msra.mxu0 %v1369_v42  ;;  %1636 = vmatpush1.bf16.msra.mxu1 %v1371_v45  ;;  %v1482_v42 = vld [vmem:[#allocation2 + $0x688] sm:$0xff]  ;;  %v1484_v45 = vld [vmem:[#allocation2 + $0x698] sm:$0xff] }
 0x492   :  { %1555 = vmatprep.subr.bf16.mxu0 %v1378_v48  ;;  %1637 = vmatprep.subr.bf16.mxu1 %v1380_v50  ;;  %v1481_v48 = vld [vmem:[#allocation2 + $0x680] sm:$0xff]  ;;  %v1483_v50 = vld [vmem:[#allocation2 + $0x690] sm:$0xff] }
 0x495   :  { %1556 = vmatpush1.bf16.msra.mxu0 %v1377_v56  ;;  %1638 = vmatpush1.bf16.msra.mxu1 %v1379_v57  ;;  %v1490_v56 = vld [vmem:[#allocation2 + $0x6c8] sm:$0xff]  ;;  %v1492_v57 = vld [vmem:[#allocation2 + $0x6d8] sm:$0xff] }
 0x496   :  { %1557 = vmatprep.subr.bf16.mxu0 %v1386_v58  ;;  %1639 = vmatprep.subr.bf16.mxu1 %v1388_v59  ;;  %v1489_v58 = vld [vmem:[#allocation2 + $0x6c0] sm:$0xff]  ;;  %v1491_v59 = vld [vmem:[#allocation2 + $0x6d0] sm:$0xff] }
 0x499   :  { %1558 = vmatpush1.bf16.msra.mxu0 %v1385_v60  ;;  %1640 = vmatpush1.bf16.msra.mxu1 %v1387_v61  ;;  %v1498_v60 = vld [vmem:[#allocation2 + $0x708] sm:$0xff]  ;;  %v1500_v61 = vld [vmem:[#allocation2 + $0x718] sm:$0xff] }
 0x49a   :  { %1559 = vmatprep.subr.bf16.mxu0 %v1394_v62  ;;  %1641 = vmatprep.subr.bf16.mxu1 %v1396_v1  ;;  %v1497_v62 = vld [vmem:[#allocation2 + $0x700] sm:$0xff]  ;;  %v1499_v1 = vld [vmem:[#allocation2 + $0x710] sm:$0xff] }
 0x49d   :  { %1560 = vmatpush1.bf16.msra.mxu0 %v1393_v3  ;;  %1642 = vmatpush1.bf16.msra.mxu1 %v1395_v5  ;;  %v1506_v3 = vld [vmem:[#allocation2 + $0x748] sm:$0xff]  ;;  %v1508_v5 = vld [vmem:[#allocation2 + $0x758] sm:$0xff] }
 0x49e   :  { %1570 = vmatprep.subr.bf16.mxu0 %v1402_v6  ;;  %1652 = vmatprep.subr.bf16.mxu1 %v1404_v7  ;;  %v1505_v6 = vld [vmem:[#allocation2 + $0x740] sm:$0xff]  ;;  %v1507_v7 = vld [vmem:[#allocation2 + $0x750] sm:$0xff] }
 0x4a0   :  { %1562 = vmatmul.mubr.bf16.vlgmr.msra.gmra.mrb[4].mxu0 %v4560_v8  ;;  %1644 = vmatmul.mubr.bf16.vlgmr.msra.gmra.mrb[12].mxu1 %v4560_v8 }
 0x4a1   :  { %1571 = vmatpush1.bf16.msra.mxu0 %v1401_v9  ;;  %1653 = vmatpush1.bf16.msra.mxu1 %v1403_v10  ;;  %v1514_v9 = vld [vmem:[#allocation2 + $0x788] sm:$0xff]  ;;  %v1516_v10 = vld [vmem:[#allocation2 + $0x798] sm:$0xff] }
 0x4a2   :  { %1572 = vmatprep.subr.bf16.mxu0 %v1410_v2  ;;  %1654 = vmatprep.subr.bf16.mxu1 %v1412_v4  ;;  %v1513_v2 = vld [vmem:[#allocation2 + $0x780] sm:$0xff]  ;;  %v1515_v4 = vld [vmem:[#allocation2 + $0x790] sm:$0xff] }
 0x4a3   :  { %1602 = vmatprep.mubr.bf16.mxu0 %v4564_v11  ;;  %1684 = vmatprep.mubr.bf16.mxu1 %v4564_v11 }
 0x4a5   :  { %1573 = vmatpush1.bf16.msra.mxu0 %v1409_v49  ;;  %1655 = vmatpush1.bf16.msra.mxu1 %v1411_v12  ;;  %v1522_v49 = vld [vmem:[#allocation2 + $0x7c8] sm:$0xff]  ;;  %v1524_v12 = vld [vmem:[#allocation2 + $0x7d8] sm:$0xff] }
 0x4a6   :  { %1574 = vmatprep.subr.bf16.mxu0 %v1418_v13  ;;  %1656 = vmatprep.subr.bf16.mxu1 %v1420_v16  ;;  %v1521_v13 = vld [vmem:[#allocation2 + $0x7c0] sm:$0xff]  ;;  %v1523_v16 = vld [vmem:[#allocation2 + $0x7d0] sm:$0xff] }
 0x4a9   :  { %1575 = vmatpush1.bf16.msra.mxu0 %v1417_v54  ;;  %1657 = vmatpush1.bf16.msra.mxu1 %v1419_v17  ;;  %v1278_v54 = vld [vmem:[#allocation2 + $0x28] sm:$0xff]  ;;  %v1280_v17 = vld [vmem:[#allocation2 + $0x38] sm:$0xff] }
 0x4aa   :  { %1576 = vmatprep.subr.bf16.mxu0 %v1426_v18  ;;  %1658 = vmatprep.subr.bf16.mxu1 %v1428_v19  ;;  %v4572_v18 = vpack.c.bf16 %v4550_v51, %v4550_v51  ;;  %v1277_v19 = vld [vmem:[#allocation2 + $0x20] sm:$0xff]  ;;  %v1294_v51 = vld [vmem:[#allocation2 + $0xa8] sm:$0xff] }
 0x4ad   :  { %1577 = vmatpush1.bf16.msra.mxu0 %v1425_v20  ;;  %1659 = vmatpush1.bf16.msra.mxu1 %v1427_v21  ;;  %v1279_v20 = vld [vmem:[#allocation2 + $0x30] sm:$0xff]  ;;  %v1286_v21 = vld [vmem:[#allocation2 + $0x68] sm:$0xff] }
 0x4ae   :  { %1578 = vmatprep.subr.bf16.mxu0 %v1434_v22  ;;  %1660 = vmatprep.subr.bf16.mxu1 %v1436_v23  ;;  %v1288_v22 = vld [vmem:[#allocation2 + $0x78] sm:$0xff]  ;;  %v1285_v23 = vld [vmem:[#allocation2 + $0x60] sm:$0xff] }
 0x4b1   :  { %1579 = vmatpush1.bf16.msra.mxu0 %v1433_v25  ;;  %1661 = vmatpush1.bf16.msra.mxu1 %v1435_v27  ;;  %v1287_v25 = vld [vmem:[#allocation2 + $0x70] sm:$0xff]  ;;  %v1296_v27 = vld [vmem:[#allocation2 + $0xb8] sm:$0xff] }
 0x4b2   :  { %1580 = vmatprep.subr.bf16.mxu0 %v1442_v28  ;;  %1662 = vmatprep.subr.bf16.mxu1 %v1444_v29  ;;  %v1293_v28 = vld [vmem:[#allocation2 + $0xa0] sm:$0xff]  ;;  %v1295_v29 = vld [vmem:[#allocation2 + $0xb0] sm:$0xff] }
 0x4b5   :  { %1581 = vmatpush1.bf16.msra.mxu0 %v1441_v30  ;;  %1663 = vmatpush1.bf16.msra.mxu1 %v1443_v31  ;;  %v1302_v30 = vld [vmem:[#allocation2 + $0xe8] sm:$0xff]  ;;  %v1304_v31 = vld [vmem:[#allocation2 + $0xf8] sm:$0xff] }
 0x4b6   :  { %1582 = vmatprep.subr.bf16.mxu0 %v1450_v32  ;;  %1664 = vmatprep.subr.bf16.mxu1 %v1452_v33  ;;  %v1301_v32 = vld [vmem:[#allocation2 + $0xe0] sm:$0xff]  ;;  %v1303_v33 = vld [vmem:[#allocation2 + $0xf0] sm:$0xff] }
 0x4b9   :  { %1583 = vmatpush1.bf16.msra.mxu0 %v1449_v34  ;;  %1665 = vmatpush1.bf16.msra.mxu1 %v1451_v35  ;;  %v1310_v34 = vld [vmem:[#allocation2 + $0x128] sm:$0xff]  ;;  %v1312_v35 = vld [vmem:[#allocation2 + $0x138] sm:$0xff] }
 0x4ba   :  { %1584 = vmatprep.subr.bf16.mxu0 %v1458_v36  ;;  %1666 = vmatprep.subr.bf16.mxu1 %v1460_v63  ;;  %v1311_v36 = vld [vmem:[#allocation2 + $0x130] sm:$0xff]  ;;  %v1318_v63 = vld [vmem:[#allocation2 + $0x168] sm:$0xff] }
 0x4bd   :  { %1585 = vmatpush1.bf16.msra.mxu0 %v1457_v37  ;;  %1667 = vmatpush1.bf16.msra.mxu1 %v1459_v0  ;;  %v1320_v37 = vld [vmem:[#allocation2 + $0x178] sm:$0xff]  ;;  %v1317_v0 = vld [vmem:[#allocation2 + $0x160] sm:$0xff] }
 0x4be   :  { %1586 = vmatprep.subr.bf16.mxu0 %v1466_v38  ;;  %1668 = vmatprep.subr.bf16.mxu1 %v1468_v43  ;;  %v1319_v38 = vld [vmem:[#allocation2 + $0x170] sm:$0xff]  ;;  %v1326_v43 = vld [vmem:[#allocation2 + $0x1a8] sm:$0xff] }
 0x4c1   :  { %1587 = vmatpush1.bf16.msra.mxu0 %v1465_v47  ;;  %1669 = vmatpush1.bf16.msra.mxu1 %v1467_v24  ;;  %v1328_v47 = vld [vmem:[#allocation2 + $0x1b8] sm:$0xff]  ;;  %v1325_v24 = vld [vmem:[#allocation2 + $0x1a0] sm:$0xff] }
 0x4c2   :  { %1588 = vmatprep.subr.bf16.mxu0 %v1474_v26  ;;  %1670 = vmatprep.subr.bf16.mxu1 %v1476_v39  ;;  %v1327_v26 = vld [vmem:[#allocation2 + $0x1b0] sm:$0xff]  ;;  %v1334_v39 = vld [vmem:[#allocation2 + $0x1e8] sm:$0xff] }
 0x4c5   :  { %1589 = vmatpush1.bf16.msra.mxu0 %v1473_v40  ;;  %1671 = vmatpush1.bf16.msra.mxu1 %v1475_v41  ;;  %v1336_v40 = vld [vmem:[#allocation2 + $0x1f8] sm:$0xff]  ;;  %v1333_v41 = vld [vmem:[#allocation2 + $0x1e0] sm:$0xff] }
 0x4c6   :  { %1590 = vmatprep.subr.bf16.mxu0 %v1482_v42  ;;  %1672 = vmatprep.subr.bf16.mxu1 %v1484_v45  ;;  %v1335_v42 = vld [vmem:[#allocation2 + $0x1f0] sm:$0xff]  ;;  %v1342_v45 = vld [vmem:[#allocation2 + $0x228] sm:$0xff] }
 0x4c9   :  { %1591 = vmatpush1.bf16.msra.mxu0 %v1481_v48  ;;  %1673 = vmatpush1.bf16.msra.mxu1 %v1483_v50  ;;  %v1344_v48 = vld [vmem:[#allocation2 + $0x238] sm:$0xff]  ;;  %v1341_v50 = vld [vmem:[#allocation2 + $0x220] sm:$0xff] }
 0x4ca   :  { %1592 = vmatprep.subr.bf16.mxu0 %v1490_v56  ;;  %1674 = vmatprep.subr.bf16.mxu1 %v1492_v57  ;;  %v1343_v56 = vld [vmem:[#allocation2 + $0x230] sm:$0xff]  ;;  %v1350_v57 = vld [vmem:[#allocation2 + $0x268] sm:$0xff] }
 0x4cd   :  { %1593 = vmatpush1.bf16.msra.mxu0 %v1489_v58  ;;  %1675 = vmatpush1.bf16.msra.mxu1 %v1491_v59  ;;  %v1352_v58 = vld [vmem:[#allocation2 + $0x278] sm:$0xff]  ;;  %v1349_v59 = vld [vmem:[#allocation2 + $0x260] sm:$0xff] }
 0x4ce   :  { %1594 = vmatprep.subr.bf16.mxu0 %v1498_v60  ;;  %1676 = vmatprep.subr.bf16.mxu1 %v1500_v61  ;;  %v1351_v60 = vld [vmem:[#allocation2 + $0x270] sm:$0xff]  ;;  %v1358_v61 = vld [vmem:[#allocation2 + $0x2a8] sm:$0xff] }
 0x4d1   :  { %1595 = vmatpush1.bf16.msra.mxu0 %v1497_v62  ;;  %1677 = vmatpush1.bf16.msra.mxu1 %v1499_v1  ;;  %v1360_v62 = vld [vmem:[#allocation2 + $0x2b8] sm:$0xff]  ;;  %v1357_v1 = vld [vmem:[#allocation2 + $0x2a0] sm:$0xff] }
 0x4d2   :  { %1596 = vmatprep.subr.bf16.mxu0 %v1506_v3  ;;  %1678 = vmatprep.subr.bf16.mxu1 %v1508_v5  ;;  %v1359_v3 = vld [vmem:[#allocation2 + $0x2b0] sm:$0xff]  ;;  %v1366_v5 = vld [vmem:[#allocation2 + $0x2e8] sm:$0xff] }
 0x4d5   :  { %1597 = vmatpush1.bf16.msra.mxu0 %v1505_v6  ;;  %1679 = vmatpush1.bf16.msra.mxu1 %v1507_v7  ;;  %v1368_v6 = vld [vmem:[#allocation2 + $0x2f8] sm:$0xff]  ;;  %v1365_v7 = vld [vmem:[#allocation2 + $0x2e0] sm:$0xff] }
 0x4d6   :  { %1598 = vmatprep.subr.bf16.mxu0 %v1514_v9  ;;  %1680 = vmatprep.subr.bf16.mxu1 %v1516_v10  ;;  %v1367_v9 = vld [vmem:[#allocation2 + $0x2f0] sm:$0xff]  ;;  %v1374_v10 = vld [vmem:[#allocation2 + $0x328] sm:$0xff] }
 0x4d9   :  { %1599 = vmatpush1.bf16.msra.mxu0 %v1513_v2  ;;  %1681 = vmatpush1.bf16.msra.mxu1 %v1515_v4  ;;  %v1376_v2 = vld [vmem:[#allocation2 + $0x338] sm:$0xff]  ;;  %v1373_v4 = vld [vmem:[#allocation2 + $0x320] sm:$0xff] }
 0x4da   :  { %1600 = vmatprep.subr.bf16.mxu0 %v1522_v49  ;;  %1682 = vmatprep.subr.bf16.mxu1 %v1524_v12  ;;  %v1375_v49 = vld [vmem:[#allocation2 + $0x330] sm:$0xff]  ;;  %v1382_v12 = vld [vmem:[#allocation2 + $0x368] sm:$0xff] }
 0x4dd   :  { %1601 = vmatpush1.bf16.msra.mxu0 %v1521_v13  ;;  %1683 = vmatpush1.bf16.msra.mxu1 %v1523_v16  ;;  %v1384_v13 = vld [vmem:[#allocation2 + $0x378] sm:$0xff]  ;;  %v1381_v16 = vld [vmem:[#allocation2 + $0x360] sm:$0xff] }
 0x4de   :  { %1693 = vmatprep.subr.bf16.mxu0 %v1278_v54  ;;  %1775 = vmatprep.subr.bf16.mxu1 %v1280_v17  ;;  %v1383_v54 = vld [vmem:[#allocation2 + $0x370] sm:$0xff]  ;;  %v1390_v17 = vld [vmem:[#allocation2 + $0x3a8] sm:$0xff] }
 0x4e0   :  { %1603 = vmatmul.mubr.bf16.vlgmr.msra.gmra.mrb[4].mxu0 %v4572_v18  ;;  %1685 = vmatmul.mubr.bf16.vlgmr.msra.gmra.mrb[12].mxu1 %v4572_v18 }
 0x4e1   :  { %1694 = vmatpush1.bf16.msra.mxu0 %v1277_v19  ;;  %1776 = vmatpush1.bf16.msra.mxu1 %v1279_v20  ;;  %v1392_v19 = vld [vmem:[#allocation2 + $0x3b8] sm:$0xff]  ;;  %v1389_v20 = vld [vmem:[#allocation2 + $0x3a0] sm:$0xff] }
 0x4e2   :  { %1695 = vmatprep.subr.bf16.mxu0 %v1286_v21  ;;  %1777 = vmatprep.subr.bf16.mxu1 %v1288_v22  ;;  %v1391_v21 = vld [vmem:[#allocation2 + $0x3b0] sm:$0xff]  ;;  %v1398_v22 = vld [vmem:[#allocation2 + $0x3e8] sm:$0xff] }
 0x4e3   :  { %1725 = vmatprep.mubr.bf16.mxu0 %v4554_v55  ;;  %1807 = vmatprep.mubr.bf16.mxu1 %v4554_v55  ;;  %v1309_v55 = vld [vmem:[#allocation2 + $0x120] sm:$0xff] }
 0x4e5   :  { %1696 = vmatpush1.bf16.msra.mxu0 %v1285_v23  ;;  %1778 = vmatpush1.bf16.msra.mxu1 %v1287_v25  ;;  %v1400_v23 = vld [vmem:[#allocation2 + $0x3f8] sm:$0xff]  ;;  %v1397_v25 = vld [vmem:[#allocation2 + $0x3e0] sm:$0xff] }
 0x4e6   :  { %1697 = vmatprep.subr.bf16.mxu0 %v1294_v51  ;;  %1779 = vmatprep.subr.bf16.mxu1 %v1296_v27  ;;  %v1399_v51 = vld [vmem:[#allocation2 + $0x3f0] sm:$0xff]  ;;  %v1406_v27 = vld [vmem:[#allocation2 + $0x428] sm:$0xff] }
 0x4e9   :  { %1698 = vmatpush1.bf16.msra.mxu0 %v1293_v28  ;;  %1780 = vmatpush1.bf16.msra.mxu1 %v1295_v29  ;;  %v1408_v28 = vld [vmem:[#allocation2 + $0x438] sm:$0xff]  ;;  %v1405_v29 = vld [vmem:[#allocation2 + $0x420] sm:$0xff] }
 0x4ea   :  { %1699 = vmatprep.subr.bf16.mxu0 %v1302_v30  ;;  %1781 = vmatprep.subr.bf16.mxu1 %v1304_v31  ;;  %v1407_v30 = vld [vmem:[#allocation2 + $0x430] sm:$0xff]  ;;  %v1414_v31 = vld [vmem:[#allocation2 + $0x468] sm:$0xff] }
 0x4ed   :  { %1700 = vmatpush1.bf16.msra.mxu0 %v1301_v32  ;;  %1782 = vmatpush1.bf16.msra.mxu1 %v1303_v33  ;;  %v1416_v32 = vld [vmem:[#allocation2 + $0x478] sm:$0xff]  ;;  %v1413_v33 = vld [vmem:[#allocation2 + $0x460] sm:$0xff] }
 0x4ee   :  { %1701 = vmatprep.subr.bf16.mxu0 %v1310_v34  ;;  %1783 = vmatprep.subr.bf16.mxu1 %v1312_v35  ;;  %v1415_v34 = vld [vmem:[#allocation2 + $0x470] sm:$0xff]  ;;  %v1422_v35 = vld [vmem:[#allocation2 + $0x4a8] sm:$0xff] }
 0x4f1   :  { %1702 = vmatpush1.bf16.msra.mxu0 %v1309_v55  ;;  %1784 = vmatpush1.bf16.msra.mxu1 %v1311_v36  ;;  %v1424_v55 = vld [vmem:[#allocation2 + $0x4b8] sm:$0xff]  ;;  %v1421_v36 = vld [vmem:[#allocation2 + $0x4a0] sm:$0xff] }
 0x4f2   :  { %1703 = vmatprep.subr.bf16.mxu0 %v1318_v63  ;;  %1785 = vmatprep.subr.bf16.mxu1 %v1320_v37  ;;  %v1423_v63 = vld [vmem:[#allocation2 + $0x4b0] sm:$0xff]  ;;  %v1430_v37 = vld [vmem:[#allocation2 + $0x4e8] sm:$0xff] }
 0x4f5   :  { %1704 = vmatpush1.bf16.msra.mxu0 %v1317_v0  ;;  %1786 = vmatpush1.bf16.msra.mxu1 %v1319_v38  ;;  %v1429_v0 = vld [vmem:[#allocation2 + $0x4e0] sm:$0xff]  ;;  %v1431_v38 = vld [vmem:[#allocation2 + $0x4f0] sm:$0xff] }
 0x4f6   :  { %1705 = vmatprep.subr.bf16.mxu0 %v1326_v43  ;;  %1787 = vmatprep.subr.bf16.mxu1 %v1328_v47  ;;  %v1438_v43 = vld [vmem:[#allocation2 + $0x528] sm:$0xff]  ;;  %v1440_v47 = vld [vmem:[#allocation2 + $0x538] sm:$0xff] }
 0x4f9   :  { %1706 = vmatpush1.bf16.msra.mxu0 %v1325_v24  ;;  %1788 = vmatpush1.bf16.msra.mxu1 %v1327_v26  ;;  %v1439_v24 = vld [vmem:[#allocation2 + $0x530] sm:$0xff]  ;;  %v1446_v26 = vld [vmem:[#allocation2 + $0x568] sm:$0xff] }
 0x4fa   :  { %1707 = vmatprep.subr.bf16.mxu0 %v1334_v39  ;;  %1789 = vmatprep.subr.bf16.mxu1 %v1336_v40  ;;  %v1448_v39 = vld [vmem:[#allocation2 + $0x578] sm:$0xff]  ;;  %v1445_v40 = vld [vmem:[#allocation2 + $0x560] sm:$0xff] }
 0x4fd   :  { %1708 = vmatpush1.bf16.msra.mxu0 %v1333_v41  ;;  %1790 = vmatpush1.bf16.msra.mxu1 %v1335_v42  ;;  %v1447_v41 = vld [vmem:[#allocation2 + $0x570] sm:$0xff]  ;;  %v1454_v42 = vld [vmem:[#allocation2 + $0x5a8] sm:$0xff] }
 0x4fe   :  { %1709 = vmatprep.subr.bf16.mxu0 %v1342_v45  ;;  %1791 = vmatprep.subr.bf16.mxu1 %v1344_v48  ;;  %v1456_v45 = vld [vmem:[#allocation2 + $0x5b8] sm:$0xff]  ;;  %v1453_v48 = vld [vmem:[#allocation2 + $0x5a0] sm:$0xff] }
 0x501   :  { %1710 = vmatpush1.bf16.msra.mxu0 %v1341_v50  ;;  %1792 = vmatpush1.bf16.msra.mxu1 %v1343_v56  ;;  %v1455_v50 = vld [vmem:[#allocation2 + $0x5b0] sm:$0xff]  ;;  %v1462_v56 = vld [vmem:[#allocation2 + $0x5e8] sm:$0xff] }
 0x502   :  { %1711 = vmatprep.subr.bf16.mxu0 %v1350_v57  ;;  %1793 = vmatprep.subr.bf16.mxu1 %v1352_v58  ;;  %v1464_v57 = vld [vmem:[#allocation2 + $0x5f8] sm:$0xff]  ;;  %v1461_v58 = vld [vmem:[#allocation2 + $0x5e0] sm:$0xff] }
 0x505   :  { %1712 = vmatpush1.bf16.msra.mxu0 %v1349_v59  ;;  %1794 = vmatpush1.bf16.msra.mxu1 %v1351_v60  ;;  %v1463_v59 = vld [vmem:[#allocation2 + $0x5f0] sm:$0xff]  ;;  %v1470_v60 = vld [vmem:[#allocation2 + $0x628] sm:$0xff] }
 0x506   :  { %1713 = vmatprep.subr.bf16.mxu0 %v1358_v61  ;;  %1795 = vmatprep.subr.bf16.mxu1 %v1360_v62  ;;  %v1472_v61 = vld [vmem:[#allocation2 + $0x638] sm:$0xff]  ;;  %v1469_v62 = vld [vmem:[#allocation2 + $0x620] sm:$0xff] }
 0x509   :  { %1714 = vmatpush1.bf16.msra.mxu0 %v1357_v1  ;;  %1796 = vmatpush1.bf16.msra.mxu1 %v1359_v3  ;;  %v1471_v1 = vld [vmem:[#allocation2 + $0x630] sm:$0xff]  ;;  %v1478_v3 = vld [vmem:[#allocation2 + $0x668] sm:$0xff] }
 0x50a   :  { %1715 = vmatprep.subr.bf16.mxu0 %v1366_v5  ;;  %1797 = vmatprep.subr.bf16.mxu1 %v1368_v6  ;;  %v1480_v5 = vld [vmem:[#allocation2 + $0x678] sm:$0xff]  ;;  %v1477_v6 = vld [vmem:[#allocation2 + $0x660] sm:$0xff] }
 0x50d   :  { %1716 = vmatpush1.bf16.msra.mxu0 %v1365_v7  ;;  %1798 = vmatpush1.bf16.msra.mxu1 %v1367_v9  ;;  %v1479_v7 = vld [vmem:[#allocation2 + $0x670] sm:$0xff]  ;;  %v1486_v9 = vld [vmem:[#allocation2 + $0x6a8] sm:$0xff] }
 0x50e   :  { %1717 = vmatprep.subr.bf16.mxu0 %v1374_v10  ;;  %1799 = vmatprep.subr.bf16.mxu1 %v1376_v2  ;;  %v1488_v10 = vld [vmem:[#allocation2 + $0x6b8] sm:$0xff]  ;;  %v1485_v2 = vld [vmem:[#allocation2 + $0x6a0] sm:$0xff] }
 0x511   :  { %1718 = vmatpush1.bf16.msra.mxu0 %v1373_v4  ;;  %1800 = vmatpush1.bf16.msra.mxu1 %v1375_v49  ;;  %v1487_v4 = vld [vmem:[#allocation2 + $0x6b0] sm:$0xff]  ;;  %v1494_v49 = vld [vmem:[#allocation2 + $0x6e8] sm:$0xff] }
 0x512   :  { %1719 = vmatprep.subr.bf16.mxu0 %v1382_v12  ;;  %1801 = vmatprep.subr.bf16.mxu1 %v1384_v13  ;;  %v1496_v12 = vld [vmem:[#allocation2 + $0x6f8] sm:$0xff]  ;;  %v1493_v13 = vld [vmem:[#allocation2 + $0x6e0] sm:$0xff] }
 0x515   :  { %1720 = vmatpush1.bf16.msra.mxu0 %v1381_v16  ;;  %1802 = vmatpush1.bf16.msra.mxu1 %v1383_v54  ;;  %v1495_v16 = vld [vmem:[#allocation2 + $0x6f0] sm:$0xff]  ;;  %v1502_v54 = vld [vmem:[#allocation2 + $0x728] sm:$0xff] }
 0x516   :  { %1721 = vmatprep.subr.bf16.mxu0 %v1390_v17  ;;  %1803 = vmatprep.subr.bf16.mxu1 %v1392_v19  ;;  %v1504_v17 = vld [vmem:[#allocation2 + $0x738] sm:$0xff]  ;;  %v1501_v19 = vld [vmem:[#allocation2 + $0x720] sm:$0xff] }
 0x519   :  { %1722 = vmatpush1.bf16.msra.mxu0 %v1389_v20  ;;  %1804 = vmatpush1.bf16.msra.mxu1 %v1391_v21  ;;  %v1503_v20 = vld [vmem:[#allocation2 + $0x730] sm:$0xff]  ;;  %v1510_v21 = vld [vmem:[#allocation2 + $0x768] sm:$0xff] }
 0x51a   :  { %1723 = vmatprep.subr.bf16.mxu0 %v1398_v22  ;;  %1805 = vmatprep.subr.bf16.mxu1 %v1400_v23  ;;  %v1512_v22 = vld [vmem:[#allocation2 + $0x778] sm:$0xff]  ;;  %v1509_v23 = vld [vmem:[#allocation2 + $0x760] sm:$0xff] }
 0x51d   :  { %1724 = vmatpush1.bf16.msra.mxu0 %v1397_v25  ;;  %1806 = vmatpush1.bf16.msra.mxu1 %v1399_v51  ;;  %v1511_v25 = vld [vmem:[#allocation2 + $0x770] sm:$0xff]  ;;  %v1518_v51 = vld [vmem:[#allocation2 + $0x7a8] sm:$0xff] }
 0x51e   :  { %1734 = vmatprep.subr.bf16.mxu0 %v1406_v27  ;;  %1816 = vmatprep.subr.bf16.mxu1 %v1408_v28  ;;  %v1520_v27 = vld [vmem:[#allocation2 + $0x7b8] sm:$0xff]  ;;  %v1517_v28 = vld [vmem:[#allocation2 + $0x7a0] sm:$0xff] }
 0x520   :  { %1726 = vmatmul.mubr.bf16.vlgmr.msra.gmra.mrb[8].mxu0 %v4560_v8  ;;  %1808 = vmatmul.mubr.bf16.vlgmr.msra.gmra.mrb[16].mxu1 %v4560_v8  ;;  %v1432_v8 = vld [vmem:[#allocation2 + $0x4f8] sm:$0xff] }
 0x521   :  { %1735 = vmatpush1.bf16.msra.mxu0 %v1405_v29  ;;  %1817 = vmatpush1.bf16.msra.mxu1 %v1407_v30  ;;  %v1519_v29 = vld [vmem:[#allocation2 + $0x7b0] sm:$0xff]  ;;  %v1526_v30 = vld [vmem:[#allocation2 + $0x7e8] sm:$0xff] }
 0x522   :  { %1736 = vmatprep.subr.bf16.mxu0 %v1414_v31  ;;  %1818 = vmatprep.subr.bf16.mxu1 %v1416_v32  ;;  %v1528_v31 = vld [vmem:[#allocation2 + $0x7f8] sm:$0xff]  ;;  %v1525_v32 = vld [vmem:[#allocation2 + $0x7e0] sm:$0xff] }
 0x523   :  { %1766 = vmatprep.mubr.bf16.mxu0 %v4564_v11  ;;  %1848 = vmatprep.mubr.bf16.mxu1 %v4564_v11  ;;  %v1437_v11 = vld [vmem:[#allocation2 + $0x520] sm:$0xff] }
 0x525   :  { %1737 = vmatpush1.bf16.msra.mxu0 %v1413_v33  ;;  %1819 = vmatpush1.bf16.msra.mxu1 %v1415_v34  ;;  %v1527_v33 = vld [vmem:[#allocation2 + $0x7f0] sm:$0xff] }
 0x526   :  { %1738 = vmatprep.subr.bf16.mxu0 %v1422_v35  ;;  %1820 = vmatprep.subr.bf16.mxu1 %v1424_v55 }
 0x529   :  { %1739 = vmatpush1.bf16.msra.mxu0 %v1421_v36  ;;  %1821 = vmatpush1.bf16.msra.mxu1 %v1423_v63 }
 0x52a   :  { %1740 = vmatprep.subr.bf16.mxu0 %v1430_v37  ;;  %1822 = vmatprep.subr.bf16.mxu1 %v1432_v8 }
 0x52d   :  { %1741 = vmatpush1.bf16.msra.mxu0 %v1429_v0  ;;  %1823 = vmatpush1.bf16.msra.mxu1 %v1431_v38 }
 0x52e   :  { %1742 = vmatprep.subr.bf16.mxu0 %v1438_v43  ;;  %1824 = vmatprep.subr.bf16.mxu1 %v1440_v47 }
 0x531   :  { %1743 = vmatpush1.bf16.msra.mxu0 %v1437_v11  ;;  %1825 = vmatpush1.bf16.msra.mxu1 %v1439_v24 }
 0x532   :  { %1744 = vmatprep.subr.bf16.mxu0 %v1446_v26  ;;  %1826 = vmatprep.subr.bf16.mxu1 %v1448_v39 }
 0x535   :  { %1745 = vmatpush1.bf16.msra.mxu0 %v1445_v40  ;;  %1827 = vmatpush1.bf16.msra.mxu1 %v1447_v41 }
 0x536   :  { %1746 = vmatprep.subr.bf16.mxu0 %v1454_v42  ;;  %1828 = vmatprep.subr.bf16.mxu1 %v1456_v45 }
 0x539   :  { %1747 = vmatpush1.bf16.msra.mxu0 %v1453_v48  ;;  %1829 = vmatpush1.bf16.msra.mxu1 %v1455_v50 }
 0x53a   :  { %1748 = vmatprep.subr.bf16.mxu0 %v1462_v56  ;;  %1830 = vmatprep.subr.bf16.mxu1 %v1464_v57 }
 0x53d   :  { %1749 = vmatpush1.bf16.msra.mxu0 %v1461_v58  ;;  %1831 = vmatpush1.bf16.msra.mxu1 %v1463_v59 }
 0x53e   :  { %1750 = vmatprep.subr.bf16.mxu0 %v1470_v60  ;;  %1832 = vmatprep.subr.bf16.mxu1 %v1472_v61 }
 0x541   :  { %1751 = vmatpush1.bf16.msra.mxu0 %v1469_v62  ;;  %1833 = vmatpush1.bf16.msra.mxu1 %v1471_v1 }
 0x542   :  { %1752 = vmatprep.subr.bf16.mxu0 %v1478_v3  ;;  %1834 = vmatprep.subr.bf16.mxu1 %v1480_v5 }
 0x545   :  { %1753 = vmatpush1.bf16.msra.mxu0 %v1477_v6  ;;  %1835 = vmatpush1.bf16.msra.mxu1 %v1479_v7 }
 0x546   :  { %1754 = vmatprep.subr.bf16.mxu0 %v1486_v9  ;;  %1836 = vmatprep.subr.bf16.mxu1 %v1488_v10 }
 0x549   :  { %1755 = vmatpush1.bf16.msra.mxu0 %v1485_v2  ;;  %1837 = vmatpush1.bf16.msra.mxu1 %v1487_v4 }
 0x54a   :  { %1756 = vmatprep.subr.bf16.mxu0 %v1494_v49  ;;  %1838 = vmatprep.subr.bf16.mxu1 %v1496_v12 }
 0x54d   :  { %1757 = vmatpush1.bf16.msra.mxu0 %v1493_v13  ;;  %1839 = vmatpush1.bf16.msra.mxu1 %v1495_v16 }
 0x54e   :  { %1758 = vmatprep.subr.bf16.mxu0 %v1502_v54  ;;  %1840 = vmatprep.subr.bf16.mxu1 %v1504_v17 }
 0x551   :  { %1759 = vmatpush1.bf16.msra.mxu0 %v1501_v19  ;;  %1841 = vmatpush1.bf16.msra.mxu1 %v1503_v20 }
 0x552   :  { %1760 = vmatprep.subr.bf16.mxu0 %v1510_v21  ;;  %1842 = vmatprep.subr.bf16.mxu1 %v1512_v22 }
 0x555   :  { %1761 = vmatpush1.bf16.msra.mxu0 %v1509_v23  ;;  %1843 = vmatpush1.bf16.msra.mxu1 %v1511_v25 }
 0x556   :  { %1762 = vmatprep.subr.bf16.mxu0 %v1518_v51  ;;  %1844 = vmatprep.subr.bf16.mxu1 %v1520_v27 }
 0x559   :  { %1763 = vmatpush1.bf16.msra.mxu0 %v1517_v28  ;;  %1845 = vmatpush1.bf16.msra.mxu1 %v1519_v29 }
 0x55a   :  { %1764 = vmatprep.subr.bf16.mxu0 %v1526_v30  ;;  %1846 = vmatprep.subr.bf16.mxu1 %v1528_v31 }
 0x55d   :  { %1765 = vmatpush1.bf16.msra.mxu0 %v1525_v32  ;;  %1847 = vmatpush1.bf16.msra.mxu1 %v1527_v33 }
 0x560   :  { %1767 = vmatmul.mubr.bf16.vlgmr.msra.gmra.mrb[8].mxu0 %v4572_v18  ;;  %1849 = vmatmul.mubr.bf16.vlgmr.msra.gmra.mrb[16].mxu1 %v4572_v18 }
 0x5b3   :  { %v4584_v34 = vpop.f32.mrb[4].mxu0  ;;  %v4586_v35 = vpop.f32.mrb[12].mxu1 }
 0x5b4   :  { %v1859_v55 = vrot.slane %v4584_v34, 4  ;;  %v1871_v36 = vrot.slane %v4586_v35, 4  ;;  %v4590_v63 = vpop.f32.mrb[5].mxu0  ;;  %v4592_v37 = vpop.f32.mrb[13].mxu1 }
 0x5b5   :  { %v1865_v8 = vrot.slane %v4590_v63, 4  ;;  %v1877_v0 = vrot.slane %v4592_v37, 4  ;;  %v1608_v38 = vpop.f32.mrb[6].mxu0  ;;  %v1690_v43 = vpop.f32.mrb[14].mxu1 }
 0x5b6   :  { %v1860_v18 = vadd.f32 %v1859_v55, %v4584_v34  ;;  %v1872_v47 = vadd.f32 %v1871_v36, %v4586_v35  ;;  %v1609_v11 = vpop.f32.mrb[7].mxu0  ;;  %v1691_v24 = vpop.f32.mrb[15].mxu1 }
 0x5b7   :  { %v1866_v26 = vadd.f32 %v1865_v8, %v4590_v63  ;;  %v1878_v39 = vadd.f32 %v1877_v0, %v4592_v37 }
 0x5b8   :  { %v1861_v40 = vrot.slane %v1860_v18, 2  ;;  %v1873_v41 = vrot.slane %v1872_v47, 2 }
 0x5b9   :  { %v1867_v42 = vrot.slane %v1866_v26, 2  ;;  %v1879_v45 = vrot.slane %v1878_v39, 2 }
 0x5ba   :  { %v1862_v48 = vadd.f32 %v1861_v40, %v1860_v18  ;;  %v1874_v50 = vadd.f32 %v1873_v41, %v1872_v47 }
 0x5bb   :  { %v1868_v56 = vadd.f32 %v1867_v42, %v1866_v26  ;;  %v1880_v57 = vadd.f32 %v1879_v45, %v1878_v39 }
 0x5bc   :  { %v1863_v58 = vrot.slane %v1862_v48, 1  ;;  %v1875_v59 = vrot.slane %v1874_v50, 1 }
 0x5bd   :  { %v1869_v60 = vrot.slane %v1868_v56, 1  ;;  %v1881_v61 = vrot.slane %v1880_v57, 1 }
 0x5be   :  { %v1864_v62 = vadd.f32 %v1863_v58, %v1862_v48  ;;  %v1876_v1 = vadd.f32 %v1875_v59, %v1874_v50 }
 0x5bf   :  { %v1870_v3 = vadd.f32 %v1869_v60, %v1868_v56  ;;  %v1882_v5 = vadd.f32 %v1881_v61, %v1880_v57 }
 0x5c0   :  { %v4600_v6 = vmul.f32 0.125, %v1864_v62  ;;  %v4602_v7 = vmul.f32 0.125, %v1876_v1 }
 0x5c1   :  { %v4604_v9 = vmul.f32 0.125, %v1870_v3  ;;  %v4606_v10 = vmul.f32 0.125, %v1882_v5 }
 0x5c2   :  { %v1915_v2 = vsub.f32 %v4584_v34, %v4600_v6  ;;  %v1917_v4 = vsub.f32 %v4586_v35, %v4602_v7 }
 0x5c3   :  { %v1916_v49 = vsub.f32 %v4590_v63, %v4604_v9  ;;  %v1918_v12 = vsub.f32 %v4592_v37, %v4606_v10 }
 0x5c4   :  { %v1923_v13 = vmul.f32 %v1915_v2, %v1915_v2  ;;  %v1925_v16 = vmul.f32 %v1917_v4, %v1917_v4 }
 0x5c5   :  { %v1924_v54 = vmul.f32 %v1916_v49, %v1916_v49  ;;  %v1926_v17 = vmul.f32 %v1918_v12, %v1918_v12 }
 0x5c6   :  { %v1931_v19 = vrot.slane %v1923_v13, 4  ;;  %v1943_v20 = vrot.slane %v1925_v16, 4 }
 0x5c7   :  { %v1937_v21 = vrot.slane %v1924_v54, 4  ;;  %v1949_v22 = vrot.slane %v1926_v17, 4 }
 0x5c8   :  { %v1932_v23 = vadd.f32 %v1931_v19, %v1923_v13  ;;  %v1944_v25 = vadd.f32 %v1943_v20, %v1925_v16 }
 0x5c9   :  { %v1938_v51 = vadd.f32 %v1937_v21, %v1924_v54  ;;  %v1950_v27 = vadd.f32 %v1949_v22, %v1926_v17 }
 0x5ca   :  { %v1933_v28 = vrot.slane %v1932_v23, 2  ;;  %v1945_v29 = vrot.slane %v1944_v25, 2 }
 0x5cb   :  { %v1939_v30 = vrot.slane %v1938_v51, 2  ;;  %v1951_v31 = vrot.slane %v1950_v27, 2 }
 0x5cc   :  { %v1934_v32 = vadd.f32 %v1933_v28, %v1932_v23  ;;  %v1946_v33 = vadd.f32 %v1945_v29, %v1944_v25 }
 0x5cd   :  { %v1940_v55 = vadd.f32 %v1939_v30, %v1938_v51  ;;  %v1952_v36 = vadd.f32 %v1951_v31, %v1950_v27 }
 0x5ce   :  { %v1935_v8 = vrot.slane %v1934_v32, 1  ;;  %v1947_v0 = vrot.slane %v1946_v33, 1 }
 0x5cf   :  { %v1941_v38 = vrot.slane %v1940_v55, 1  ;;  %v1953_v43 = vrot.slane %v1952_v36, 1 }
 0x5d0   :  { %v1936_v18 = vadd.f32 %v1935_v8, %v1934_v32  ;;  %v1948_v47 = vadd.f32 %v1947_v0, %v1946_v33 }
 0x5d1   :  { %v1942_v11 = vadd.f32 %v1941_v38, %v1940_v55  ;;  %v1954_v24 = vadd.f32 %v1953_v43, %v1952_v36 }
 0x5d2   :  { %v1979_v26 = vmul.f32 0.125, %v1936_v18  ;;  %v1981_v39 = vmul.f32 0.125, %v1948_v47 }
 0x5d3   :  { %v1980_v40 = vmul.f32 0.125, %v1942_v11  ;;  %v1982_v41 = vmul.f32 0.125, %v1954_v24 }
 0x5d4   :  { %v1987_v42 = vadd.f32 1e-05, %v1979_v26  ;;  %v1989_v45 = vadd.f32 1e-05, %v1981_v39 }
 0x5d5   :  { %v1988_v48 = vadd.f32 1e-05, %v1980_v40  ;;  %v1990_v50 = vadd.f32 1e-05, %v1982_v41 }
 0x5d6   :  { %3874 = vrsqrt.f32 %v1987_v42 }
 0x5d7   :  { %3876 = vrsqrt.f32 %v1989_v45 }
 0x5d8   :  { %3878 = vrsqrt.f32 %v1988_v48 }
 0x5d9   :  { %3880 = vrsqrt.f32 %v1990_v50 }
 0x5e0   :  { %v3875_v56 = vpop.eup %3874 }
 0x5e1   :  { %v3877_v57 = vpop.eup %3876 }
 0x5e2   :  { %v3879_v58 = vpop.eup %3878 }
 0x5e3   :  { %v3881_v59 = vpop.eup %3880  ;;  %v2011_v60 = vcombine.low %v3875_v56, %v3879_v58 }
 0x5e4   :  { %v2012_v61 = vcombine.low %v3877_v57, %v3881_v59 }
 0x5e5   :  { %v4617_v62 = vrot.slane %v2011_v60, %v4488_v46 }
 0x5e6   :  { %v4620_v1 = vrot.slane %v2012_v61, %v4488_v46 }
 0x5e8   :  { %v2043_v3 = vcombine.low %v4617_v62, %v4620_v1 }
 0x633   :  { %v4624_v5 = vpop.f32.mrb[8].mxu0  ;;  %v4626_v2 = vpop.f32.mrb[16].mxu1 }
 0x634   :  { %v1883_v4 = vrot.slane %v4624_v5, 4  ;;  %v1895_v49 = vrot.slane %v4626_v2, 4  ;;  %v4630_v12 = vpop.f32.mrb[9].mxu0  ;;  %v4632_v13 = vpop.f32.mrb[17].mxu1 }
 0x635   :  { %v1889_v16 = vrot.slane %v4630_v12, 4  ;;  %v1901_v54 = vrot.slane %v4632_v13, 4  ;;  %v1772_v17 = vpop.f32.mrb[10].mxu0  ;;  %v1854_v19 = vpop.f32.mrb[18].mxu1 }
 0x636   :  { %v1884_v20 = vadd.f32 %v1883_v4, %v4624_v5  ;;  %v1896_v21 = vadd.f32 %v1895_v49, %v4626_v2  ;;  %v1773_v22 = vpop.f32.mrb[11].mxu0  ;;  %v1855_v23 = vpop.f32.mrb[19].mxu1 }
 0x637   :  { %v1890_v25 = vadd.f32 %v1889_v16, %v4630_v12  ;;  %v1902_v51 = vadd.f32 %v1901_v54, %v4632_v13 }
 0x638   :  { %v1885_v27 = vrot.slane %v1884_v20, 2  ;;  %v1897_v28 = vrot.slane %v1896_v21, 2 }
 0x639   :  { %v1891_v29 = vrot.slane %v1890_v25, 2  ;;  %v1903_v30 = vrot.slane %v1902_v51, 2 }
 0x63a   :  { %v1886_v31 = vadd.f32 %v1885_v27, %v1884_v20  ;;  %v1898_v32 = vadd.f32 %v1897_v28, %v1896_v21 }
 0x63b   :  { %v1892_v33 = vadd.f32 %v1891_v29, %v1890_v25  ;;  %v1904_v55 = vadd.f32 %v1903_v30, %v1902_v51 }
 0x63c   :  { %v1887_v36 = vrot.slane %v1886_v31, 1  ;;  %v1899_v8 = vrot.slane %v1898_v32, 1 }
 0x63d   :  { %v1893_v0 = vrot.slane %v1892_v33, 1  ;;  %v1905_v38 = vrot.slane %v1904_v55, 1 }
 0x63e   :  { %v1888_v43 = vadd.f32 %v1887_v36, %v1886_v31  ;;  %v1900_v18 = vadd.f32 %v1899_v8, %v1898_v32 }
 0x63f   :  { %v1894_v47 = vadd.f32 %v1893_v0, %v1892_v33  ;;  %v1906_v11 = vadd.f32 %v1905_v38, %v1904_v55 }
 0x640   :  { %v4640_v24 = vmul.f32 0.125, %v1888_v43  ;;  %v4642_v26 = vmul.f32 0.125, %v1900_v18 }
 0x641   :  { %v4644_v39 = vmul.f32 0.125, %v1894_v47  ;;  %v4646_v40 = vmul.f32 0.125, %v1906_v11 }
 0x642   :  { %v1919_v41 = vsub.f32 %v4624_v5, %v4640_v24  ;;  %v1921_v42 = vsub.f32 %v4626_v2, %v4642_v26 }
 0x643   :  { %v1920_v45 = vsub.f32 %v4630_v12, %v4644_v39  ;;  %v1922_v48 = vsub.f32 %v4632_v13, %v4646_v40 }
 0x644   :  { %v1927_v50 = vmul.f32 %v1919_v41, %v1919_v41  ;;  %v1929_v56 = vmul.f32 %v1921_v42, %v1921_v42 }
 0x645   :  { %v1928_v57 = vmul.f32 %v1920_v45, %v1920_v45  ;;  %v1930_v58 = vmul.f32 %v1922_v48, %v1922_v48 }
 0x646   :  { %v1955_v59 = vrot.slane %v1927_v50, 4  ;;  %v1967_v60 = vrot.slane %v1929_v56, 4 }
 0x647   :  { %v1961_v61 = vrot.slane %v1928_v57, 4  ;;  %v1973_v4 = vrot.slane %v1930_v58, 4 }
 0x648   :  { %v1956_v49 = vadd.f32 %v1955_v59, %v1927_v50  ;;  %v1968_v16 = vadd.f32 %v1967_v60, %v1929_v56 }
 0x649   :  { %v1962_v54 = vadd.f32 %v1961_v61, %v1928_v57  ;;  %v1974_v17 = vadd.f32 %v1973_v4, %v1930_v58  ;;  %v2051_v61 = vrot.slane %v2043_v3, %v4488_v46 }
 0x64a   :  { %v1957_v19 = vrot.slane %v1956_v49, 2  ;;  %v1969_v20 = vrot.slane %v1968_v16, 2 }
 0x64b   :  { %v1963_v21 = vrot.slane %v1962_v54, 2  ;;  %v1975_v22 = vrot.slane %v1974_v17, 2 }
 0x64c   :  { %v1958_v23 = vadd.f32 %v1957_v19, %v1956_v49  ;;  %v1970_v25 = vadd.f32 %v1969_v20, %v1968_v16  ;;  %v1857_v49 = vld [vmem:[#allocation20] sm:$0xff]  ;;  %v4670_v19 = vsub.s32 6, %v4485_v44  ;;  %v2093_v20 = vsub.s32 7, %v4485_v44 }
 0x64d   :  { %v1964_v51 = vadd.f32 %v1963_v21, %v1962_v54  ;;  %v1976_v27 = vadd.f32 %v1975_v22, %v1974_v17  ;;  %v4664_v54 = vsub.s32 4, %v4485_v44  ;;  %v4667_v17 = vsub.s32 5, %v4485_v44 }
 0x64e   :  { %v1959_v28 = vrot.slane %v1958_v23, 1  ;;  %v1971_v29 = vrot.slane %v1970_v25, 1 }
 0x64f   :  { %v1965_v30 = vrot.slane %v1964_v51, 1  ;;  %v1977_v31 = vrot.slane %v1976_v27, 1 }
 0x650   :  { %v1960_v32 = vadd.f32 %v1959_v28, %v1958_v23  ;;  %v1972_v33 = vadd.f32 %v1971_v29, %v1970_v25 }
 0x651   :  { %v1966_v55 = vadd.f32 %v1965_v30, %v1964_v51  ;;  %v1978_v36 = vadd.f32 %v1977_v31, %v1976_v27 }
 0x652   :  { %v1983_v8 = vmul.f32 0.125, %v1960_v32  ;;  %v1985_v0 = vmul.f32 0.125, %v1972_v33 }
 0x653   :  { %v1984_v38 = vmul.f32 0.125, %v1966_v55  ;;  %v1986_v43 = vmul.f32 0.125, %v1978_v36 }
 0x654   :  { %v1991_v18 = vadd.f32 1e-05, %v1983_v8  ;;  %v1993_v47 = vadd.f32 1e-05, %v1985_v0 }
 0x655   :  { %v1992_v11 = vadd.f32 1e-05, %v1984_v38  ;;  %v1994_v41 = vadd.f32 1e-05, %v1986_v43 }
 0x656   :  { %3882 = vrsqrt.f32 %v1991_v18 }
 0x657   :  { %3884 = vrsqrt.f32 %v1993_v47 }
 0x658   :  { %3886 = vrsqrt.f32 %v1992_v11 }
 0x659   :  { %3888 = vrsqrt.f32 %v1994_v41  ;;  %v1858_v41 = vld [vmem:[#allocation22] sm:$0xff] }
 0x660   :  { %v3883_v42 = vpop.eup %3882 }
 0x661   :  { %v3885_v45 = vpop.eup %3884 }
 0x662   :  { %v3887_v48 = vpop.eup %3886 }
 0x663   :  { %v3889_v50 = vpop.eup %3888  ;;  %v2013_v56 = vcombine.low %v3883_v42, %v3887_v48 }
 0x664   :  { %v2014_v57 = vcombine.low %v3885_v45, %v3889_v50 }
 0x665   :  { %v2035_v58 = vrot.slane %v2013_v56, %v4488_v46 }
 0x666   :  { %v2042_v59 = vrot.slane %v2014_v57, %v4488_v46 }
 0x668   :  { %v2044_v60 = vcombine.low %v2035_v58, %v2042_v59 }
 0x66a   :  { %v2058_v4 = vrot.slane %v2044_v60, %v4488_v46 }
 0x66c   :  { %v2059_v16 = vcombine.low %v2051_v61, %v2058_v4 }
 0x66e   :  { %v2061_v21 = vmul.f32 %v2059_v16, %v1857_v49 }
 0x670   :  { %v2066_v22 = vrot.slane %v2061_v21, %v4493_v52  ;;  %v2070_v62 = vrot.slane %v2061_v21, %v4496_v53  ;;  %v2074_v1 = vrot.slane %v2061_v21, %v4528_v14  ;;  %v2078_v3 = vrot.slane %v2061_v21, %v4531_v15 }
 0x671   :  { %v2082_v23 = vrot.slane %v2061_v21, %v4664_v54  ;;  %v2086_v25 = vrot.slane %v2061_v21, %v4667_v17  ;;  %v2090_v51 = vrot.slane %v2061_v21, %v4670_v19  ;;  %v2094_v27 = vrot.slane %v2061_v21, %v2093_v20 }
 0x672   :  { %v2103_v28 = vmul.f32 %v2066_v22, %v4600_v6  ;;  %v2104_v44 = vmul.f32 %v2070_v62, %v4604_v9  ;;  %v2105_v29 = vmul.f32 %v2074_v1, %v4602_v7  ;;  %v2106_v30 = vmul.f32 %v2078_v3, %v4606_v10 }
 0x673   :  { %v2107_v31 = vmul.f32 %v2082_v23, %v4640_v24  ;;  %v2108_v32 = vmul.f32 %v2086_v25, %v4644_v39  ;;  %v2109_v33 = vmul.f32 %v2090_v51, %v4642_v26  ;;  %v2110_v55 = vmul.f32 %v2094_v27, %v4646_v40 }
 0x674   :  { %v2119_v36 = vcombine.low %v2103_v28, %v2104_v44  ;;  %v2120_v8 = vcombine.low %v2105_v29, %v2106_v30  ;;  %v2170_v0 = vmul.f32 %v2066_v22, %v4584_v34  ;;  %v2171_v6 = vmul.f32 %v2070_v62, %v4590_v63 }
 0x675   :  { %v2121_v38 = vcombine.low %v2107_v31, %v2108_v32  ;;  %v2122_v9 = vcombine.low %v2109_v33, %v2110_v55  ;;  %v2172_v7 = vmul.f32 %v2074_v1, %v4586_v35  ;;  %v2173_v10 = vmul.f32 %v2078_v3, %v4592_v37 }
 0x676   :  { %v2129_v24 = vrot.slane %v2119_v36, %v4488_v46  ;;  %v2136_v39 = vrot.slane %v2120_v8, %v4488_v46  ;;  %v2174_v26 = vmul.f32 %v2082_v23, %v4624_v5  ;;  %v2175_v40 = vmul.f32 %v2086_v25, %v4630_v12 }
 0x677   :  { %v2143_v43 = vrot.slane %v2121_v38, %v4488_v46  ;;  %v2150_v34 = vrot.slane %v2122_v9, %v4488_v46  ;;  %v2176_v63 = vmul.f32 %v2090_v51, %v4626_v2  ;;  %v2177_v18 = vmul.f32 %v2094_v27, %v4632_v13 }
 0x678   :  { %v2151_v47 = vcombine.low %v2129_v24, %v2136_v39 }
 0x679   :  { %v2152_v35 = vcombine.low %v2143_v43, %v2150_v34 }
 0x67a   :  { %v2159_v37 = vrot.slane %v2151_v47, %v4488_v46 }
 0x67b   :  { %v2166_v11 = vrot.slane %v2152_v35, %v4488_v46 }
 0x67d   :  { %v2167_v42 = vcombine.low %v2159_v37, %v2166_v11 }
 0x67f   :  { %v2169_v45 = vsub.f32 %v1858_v41, %v2167_v42 }
 0x681   :  { %v2182_v5 = vrot.slane %v2169_v45, %v4493_v52  ;;  %v2186_v12 = vrot.slane %v2169_v45, %v4496_v53  ;;  %v2190_v48 = vrot.slane %v2169_v45, %v4528_v14  ;;  %v2194_v50 = vrot.slane %v2169_v45, %v4531_v15 }
 0x682   :  { %v2198_v2 = vrot.slane %v2169_v45, %v4664_v54  ;;  %v2202_v13 = vrot.slane %v2169_v45, %v4667_v17  ;;  %v2206_v56 = vrot.slane %v2169_v45, %v4670_v19  ;;  %v2210_v57 = vrot.slane %v2169_v45, %v2093_v20 }
 0x683   :  { %v2219_v58 = vadd.f32 %v2182_v5, %v2170_v0  ;;  %v2220_v46 = vadd.f32 %v2186_v12, %v2171_v6  ;;  %v2221_v59 = vadd.f32 %v2190_v48, %v2172_v7  ;;  %v2222_v60 = vadd.f32 %v2194_v50, %v2173_v10 }
 0x684   :  { %v2223_v61 = vadd.f32 %v2198_v2, %v2174_v26  ;;  %v2224_v4 = vadd.f32 %v2202_v13, %v2175_v40  ;;  %v2225_v49 = vadd.f32 %v2206_v56, %v2176_v63  ;;  %v2226_v16 = vadd.f32 %v2210_v57, %v2177_v18 }
 0x685   :  { %vm2227_vm9 = vcmp.gt.f32.partialorder %v2219_v58, 0.0  ;;  %vm2228_vm10 = vcmp.gt.f32.partialorder %v2220_v46, 0.0  ;;  %vm2229_vm11 = vcmp.gt.f32.partialorder %v2221_v59, 0.0  ;;  %vm2230_vm12 = vcmp.gt.f32.partialorder %v2222_v60, 0.0 }
 0x686   :  { %vm2231_vm13 = vcmp.gt.f32.partialorder %v2223_v61, 0.0  ;;  %vm2232_vm14 = vcmp.gt.f32.partialorder %v2224_v4, 0.0  ;;  %vm2233_vm15 = vcmp.gt.f32.partialorder %v2225_v49, 0.0  ;;  %vm2234_vm0 = vcmp.gt.f32.partialorder %v2226_v16, 0.0 }
 0x687   :  { %v2235_v21 = vmul.f32 0.2, %v2219_v58  ;;  %v2236_v22 = vmul.f32 0.2, %v2220_v46  ;;  %v2237_v62 = vmul.f32 0.2, %v2221_v59 }
 0x688   :  { %v2238_v20 = vmul.f32 0.2, %v2222_v60  ;;  %v2239_v1 = vmul.f32 0.2, %v2223_v61  ;;  %v2240_v3 = vmul.f32 0.2, %v2224_v4 }
 0x689   :  { %v2241_v23 = vmul.f32 0.2, %v2225_v49  ;;  %v2242_v25 = vmul.f32 0.2, %v2226_v16  ;;  %v4710_v51 = vsel %vm2227_vm9, %v2219_v58, %v2235_v21  ;;  %v2244_v27 = vsel %vm2228_vm10, %v2220_v46, %v2236_v22 }
 0x68a   :  { %v4714_v28 = vsel %vm2229_vm11, %v2221_v59, %v2237_v62  ;;  %v4717_v44 = vsel %vm2230_vm12, %v2222_v60, %v2238_v20  ;;  %v4720_v29 = vsel %vm2231_vm13, %v2223_v61, %v2239_v1  ;;  %v4723_v30 = vsel %vm2232_vm14, %v2224_v4, %v2240_v3 }
 0x68b   :  { %v4726_v31 = vsel %vm2233_vm15, %v2225_v49, %v2241_v23  ;;  %v4729_v32 = vsel %vm2234_vm0, %v2226_v16, %v2242_v25 }
 0x68c   :  { %4206 = dma.done.wait [#allocation4 + $0x1], 57344 }
 0x68d   :  { %4207 = vsyncadd [#allocation4 + $0x1], 4294909952  ;;  %v4731_v33 = vpack.c.bf16 %v2244_v27, %v2244_v27  ;;  %v2264_v55 = vld [vmem:[#allocation3 + $0x8] sm:$0xff]  ;;  %v2266_v36 = vld [vmem:[#allocation3 + $0x18] sm:$0xff]  ;;  %s4244_s12 = smov [#allocation25]  }
 0x68e   :  { %v2263_v8 = vld [vmem:[#allocation3] sm:$0xff]  ;;  %2748 = vmatprep.subr.bf16.mxu0 %v2264_v55  ;;  %2912 = vmatprep.subr.bf16.mxu1 %v2266_v36  ;;  %v2265_v0 = vld [vmem:[#allocation3 + $0x10] sm:$0xff]  ;;  %v2270_v9 = vld [vmem:[#allocation3 + $0x38] sm:$0xff]  ;;  %s3420_s23 = sshll.u32 %s4244_s12, 4  ;;  %s3421_s23 = int_to_ptr.vmem [resolvable:$true] %s3420_s23 }
 0x68f   :  { %2780 = vmatprep.mubr.bf16.mxu0 %v4731_v33  ;;  %2944 = vmatprep.mubr.bf16.mxu1 %v4731_v33  ;;  %v2271_v6 = vld [vmem:[#allocation3 + $0x40] sm:$0xff]  ;;  %v2273_v38 = vld [vmem:[#allocation3 + $0x50] sm:$0xff]  ;;  %v2272_v7 = vld [vmem:[#allocation3 + $0x48] sm:$0xff]  ;;  %s4168_s1 = scalar_lea.vmem %s3421_s23, 896  ;;  %p4173_p13 = scmp.lt.s32.totalorder %s3421_s23, %s3421_s23 }
 0x690   :  { %2749 = vmatpush1.bf16.msra.mxu0 %v2263_v8  ;;  %2913 = vmatpush1.bf16.msra.mxu1 %v2265_v0  ;;  %v2278_v10 = vld [vmem:[#allocation3 + $0x78] sm:$0xff]  ;;  %v2280_v24 = vld [vmem:[#allocation3 + $0x88] sm:$0xff]  ;;  %v2277_v39 = vld [vmem:[#allocation3 + $0x70] sm:$0xff]  ;;  %p4169_p12 = scmp.ne.s32.totalorder %s3421_s23, %s4168_s1  ;;  %p4174_p0 = scmp.lt.s32.totalorder %s4168_s1, %s4168_s1 }
 0x691   :  { %2750 = vmatprep.subr.bf16.mxu0 %v2271_v6  ;;  %2914 = vmatprep.subr.bf16.mxu1 %v2273_v38  ;;  %v2279_v26 = vld [vmem:[#allocation3 + $0x80] sm:$0xff]  ;;  %v2285_v40 = vld [vmem:[#allocation3 + $0xb0] sm:$0xff]  ;;  %v2284_v34 = vld [vmem:[#allocation3 + $0xa8] sm:$0xff] }
 0x692   :  { %v2287_v43 = vld [vmem:[#allocation3 + $0xc0] sm:$0xff]  ;;  %v2286_v63 = vld [vmem:[#allocation3 + $0xb8] sm:$0xff]  ;;  %v2292_v18 = vld [vmem:[#allocation3 + $0xe8] sm:$0xff]  ;;  %p4175_p1 = por %p4174_p0, %p4173_p13 }
 0x693   :  { %v2294_v47 = vld [vmem:[#allocation3 + $0xf8] sm:$0xff]  ;;  %v2291_v35 = vld [vmem:[#allocation3 + $0xe0] sm:$0xff]  ;;  %v2293_v37 = vld [vmem:[#allocation3 + $0xf0] sm:$0xff] }
 0x694   :  { %2751 = vmatpush1.bf16.msra.mxu0 %v2270_v9  ;;  %2915 = vmatpush1.bf16.msra.mxu1 %v2272_v7  ;;  %v2299_v11 = vld [vmem:[#allocation3 + $0x120] sm:$0xff]  ;;  %v2301_v41 = vld [vmem:[#allocation3 + $0x130] sm:$0xff]  ;;  %v2298_v42 = vld [vmem:[#allocation3 + $0x118] sm:$0xff]  ;;  %p4176_p2 = pnand %p4175_p1, %p4169_p12 }
 0x695   :  { %2752 = vmatprep.subr.bf16.mxu0 %v2278_v10  ;;  %2916 = vmatprep.subr.bf16.mxu1 %v2280_v24  ;;  %v2300_v45 = vld [vmem:[#allocation3 + $0x128] sm:$0xff]  ;;  %v2306_v5 = vld [vmem:[#allocation3 + $0x158] sm:$0xff]  ;;  %v2305_v48 = vld [vmem:[#allocation3 + $0x150] sm:$0xff] }
 0x696   :  { %v2308_v12 = vld [vmem:[#allocation3 + $0x168] sm:$0xff]  ;;  %v2307_v50 = vld [vmem:[#allocation3 + $0x160] sm:$0xff]  ;;  %v2313_v2 = vld [vmem:[#allocation3 + $0x190] sm:$0xff] }
 0x697   :  { %v2315_v13 = vld [vmem:[#allocation3 + $0x1a0] sm:$0xff]  ;;  %v2312_v56 = vld [vmem:[#allocation3 + $0x188] sm:$0xff]  ;;  %v2314_v57 = vld [vmem:[#allocation3 + $0x198] sm:$0xff] }
 0x698   :  { %2753 = vmatpush1.bf16.msra.mxu0 %v2277_v39  ;;  %2917 = vmatpush1.bf16.msra.mxu1 %v2279_v26  ;;  %v2320_v58 = vld [vmem:[#allocation3 + $0x1c8] sm:$0xff]  ;;  %v2322_v46 = vld [vmem:[#allocation3 + $0x1d8] sm:$0xff]  ;;  %v2319_v59 = vld [vmem:[#allocation3 + $0x1c0] sm:$0xff] }
 0x699   :  { %2754 = vmatprep.subr.bf16.mxu0 %v2285_v40  ;;  %2918 = vmatprep.subr.bf16.mxu1 %v2287_v43  ;;  %v2321_v60 = vld [vmem:[#allocation3 + $0x1d0] sm:$0xff]  ;;  %v2327_v61 = vld [vmem:[#allocation3 + $0x200] sm:$0xff]  ;;  %v2326_v49 = vld [vmem:[#allocation3 + $0x1f8] sm:$0xff] }
 0x69a   :  { %v2329_v4 = vld [vmem:[#allocation3 + $0x210] sm:$0xff]  ;;  %v2328_v16 = vld [vmem:[#allocation3 + $0x208] sm:$0xff]  ;;  %v2334_v21 = vld [vmem:[#allocation3 + $0x238] sm:$0xff] }
 0x69b   :  { %v2336_v22 = vld [vmem:[#allocation3 + $0x248] sm:$0xff]  ;;  %v2333_v62 = vld [vmem:[#allocation3 + $0x230] sm:$0xff]  ;;  %v2335_v20 = vld [vmem:[#allocation3 + $0x240] sm:$0xff] }
 0x69c   :  { %2755 = vmatpush1.bf16.msra.mxu0 %v2284_v34  ;;  %2919 = vmatpush1.bf16.msra.mxu1 %v2286_v63  ;;  %v2341_v1 = vld [vmem:[#allocation3 + $0x270] sm:$0xff]  ;;  %v2343_v3 = vld [vmem:[#allocation3 + $0x280] sm:$0xff]  ;;  %v2340_v23 = vld [vmem:[#allocation3 + $0x268] sm:$0xff] }
 0x69d   :  { %2756 = vmatprep.subr.bf16.mxu0 %v2292_v18  ;;  %2920 = vmatprep.subr.bf16.mxu1 %v2294_v47  ;;  %v2342_v25 = vld [vmem:[#allocation3 + $0x278] sm:$0xff]  ;;  %v2348_v27 = vld [vmem:[#allocation3 + $0x2a8] sm:$0xff]  ;;  %v2347_v36 = vld [vmem:[#allocation3 + $0x2a0] sm:$0xff]  ;;  %v4737_v47 = vpack.c.bf16 %v4710_v51, %v4710_v51 }
 0x69e   :  { %v2350_v55 = vld [vmem:[#allocation3 + $0x2b8] sm:$0xff]  ;;  %v2349_v8 = vld [vmem:[#allocation3 + $0x2b0] sm:$0xff]  ;;  %v2355_v0 = vld [vmem:[#allocation3 + $0x2e0] sm:$0xff] }
 0x69f   :  { %v2357_v6 = vld [vmem:[#allocation3 + $0x2f0] sm:$0xff]  ;;  %v2354_v38 = vld [vmem:[#allocation3 + $0x2d8] sm:$0xff]  ;;  %v2356_v9 = vld [vmem:[#allocation3 + $0x2e8] sm:$0xff] }
 0x6a0   :  { %2757 = vmatpush1.bf16.msra.mxu0 %v2291_v35  ;;  %2921 = vmatpush1.bf16.msra.mxu1 %v2293_v37  ;;  %v2362_v7 = vld [vmem:[#allocation3 + $0x318] sm:$0xff]  ;;  %v2364_v10 = vld [vmem:[#allocation3 + $0x328] sm:$0xff]  ;;  %v2361_v24 = vld [vmem:[#allocation3 + $0x310] sm:$0xff] }
 0x6a1   :  { %2758 = vmatprep.subr.bf16.mxu0 %v2299_v11  ;;  %2922 = vmatprep.subr.bf16.mxu1 %v2301_v41  ;;  %v2363_v39 = vld [vmem:[#allocation3 + $0x320] sm:$0xff]  ;;  %v2369_v26 = vld [vmem:[#allocation3 + $0x350] sm:$0xff]  ;;  %v2368_v43 = vld [vmem:[#allocation3 + $0x348] sm:$0xff] }
 0x6a2   :  { %v2371_v40 = vld [vmem:[#allocation3 + $0x360] sm:$0xff]  ;;  %v2370_v34 = vld [vmem:[#allocation3 + $0x358] sm:$0xff]  ;;  %v2376_v63 = vld [vmem:[#allocation3 + $0x388] sm:$0xff] }
 0x6a3   :  { %v2378_v18 = vld [vmem:[#allocation3 + $0x398] sm:$0xff]  ;;  %v2375_v35 = vld [vmem:[#allocation3 + $0x380] sm:$0xff]  ;;  %v2377_v37 = vld [vmem:[#allocation3 + $0x390] sm:$0xff] }
 0x6a4   :  { %2759 = vmatpush1.bf16.msra.mxu0 %v2298_v42  ;;  %2923 = vmatpush1.bf16.msra.mxu1 %v2300_v45  ;;  %v2383_v11 = vld [vmem:[#allocation3 + $0x3c0] sm:$0xff]  ;;  %v2385_v41 = vld [vmem:[#allocation3 + $0x3d0] sm:$0xff]  ;;  %v4741_v42 = vpack.c.bf16 %v4717_v44, %v4717_v44  ;;  %v2382_v51 = vld [vmem:[#allocation3 + $0x3b8] sm:$0xff] }
 0x6a5   :  { %2760 = vmatprep.subr.bf16.mxu0 %v2306_v5  ;;  %2924 = vmatprep.subr.bf16.mxu1 %v2308_v12  ;;  %v2384_v45 = vld [vmem:[#allocation3 + $0x3c8] sm:$0xff]  ;;  %v2390_v5 = vld [vmem:[#allocation3 + $0x3f8] sm:$0xff]  ;;  %v2389_v44 = vld [vmem:[#allocation3 + $0x3f0] sm:$0xff] }
 0x6a6   :  { %v2392_v12 = vld [vmem:[#allocation3 + $0x408] sm:$0xff] }
 0x6a8   :  { %2761 = vmatpush1.bf16.msra.mxu0 %v2305_v48  ;;  %2925 = vmatpush1.bf16.msra.mxu1 %v2307_v50  ;;  %v2391_v48 = vld [vmem:[#allocation3 + $0x400] sm:$0xff]  ;;  %v2397_v50 = vld [vmem:[#allocation3 + $0x430] sm:$0xff] }
 0x6a9   :  { %2762 = vmatprep.subr.bf16.mxu0 %v2313_v2  ;;  %2926 = vmatprep.subr.bf16.mxu1 %v2315_v13  ;;  %v2399_v2 = vld [vmem:[#allocation3 + $0x440] sm:$0xff]  ;;  %v2396_v13 = vld [vmem:[#allocation3 + $0x428] sm:$0xff] }
 0x6ac   :  { %2763 = vmatpush1.bf16.msra.mxu0 %v2312_v56  ;;  %2927 = vmatpush1.bf16.msra.mxu1 %v2314_v57  ;;  %v2398_v56 = vld [vmem:[#allocation3 + $0x438] sm:$0xff]  ;;  %v2404_v57 = vld [vmem:[#allocation3 + $0x468] sm:$0xff] }
 0x6ad   :  { %2764 = vmatprep.subr.bf16.mxu0 %v2320_v58  ;;  %2928 = vmatprep.subr.bf16.mxu1 %v2322_v46  ;;  %v2406_v58 = vld [vmem:[#allocation3 + $0x478] sm:$0xff]  ;;  %v2403_v46 = vld [vmem:[#allocation3 + $0x460] sm:$0xff] }
 0x6b0   :  { %2765 = vmatpush1.bf16.msra.mxu0 %v2319_v59  ;;  %2929 = vmatpush1.bf16.msra.mxu1 %v2321_v60  ;;  %v2405_v59 = vld [vmem:[#allocation3 + $0x470] sm:$0xff]  ;;  %v2411_v60 = vld [vmem:[#allocation3 + $0x4a0] sm:$0xff] }
 0x6b1   :  { %2766 = vmatprep.subr.bf16.mxu0 %v2327_v61  ;;  %2930 = vmatprep.subr.bf16.mxu1 %v2329_v4  ;;  %v2413_v61 = vld [vmem:[#allocation3 + $0x4b0] sm:$0xff]  ;;  %v2410_v4 = vld [vmem:[#allocation3 + $0x498] sm:$0xff] }
 0x6b4   :  { %2767 = vmatpush1.bf16.msra.mxu0 %v2326_v49  ;;  %2931 = vmatpush1.bf16.msra.mxu1 %v2328_v16  ;;  %v2412_v49 = vld [vmem:[#allocation3 + $0x4a8] sm:$0xff]  ;;  %v2418_v16 = vld [vmem:[#allocation3 + $0x4d8] sm:$0xff] }
 0x6b5   :  { %2768 = vmatprep.subr.bf16.mxu0 %v2334_v21  ;;  %2932 = vmatprep.subr.bf16.mxu1 %v2336_v22  ;;  %v2420_v21 = vld [vmem:[#allocation3 + $0x4e8] sm:$0xff]  ;;  %v2417_v22 = vld [vmem:[#allocation3 + $0x4d0] sm:$0xff] }
 0x6b8   :  { %2769 = vmatpush1.bf16.msra.mxu0 %v2333_v62  ;;  %2933 = vmatpush1.bf16.msra.mxu1 %v2335_v20  ;;  %v2419_v62 = vld [vmem:[#allocation3 + $0x4e0] sm:$0xff]  ;;  %v2425_v20 = vld [vmem:[#allocation3 + $0x510] sm:$0xff] }
 0x6b9   :  { %2770 = vmatprep.subr.bf16.mxu0 %v2341_v1  ;;  %2934 = vmatprep.subr.bf16.mxu1 %v2343_v3  ;;  %v2427_v1 = vld [vmem:[#allocation3 + $0x520] sm:$0xff]  ;;  %v2424_v3 = vld [vmem:[#allocation3 + $0x508] sm:$0xff] }
 0x6bc   :  { %2771 = vmatpush1.bf16.msra.mxu0 %v2340_v23  ;;  %2935 = vmatpush1.bf16.msra.mxu1 %v2342_v25  ;;  %v2426_v23 = vld [vmem:[#allocation3 + $0x518] sm:$0xff]  ;;  %v2432_v25 = vld [vmem:[#allocation3 + $0x548] sm:$0xff] }
 0x6bd   :  { %2772 = vmatprep.subr.bf16.mxu0 %v2348_v27  ;;  %2936 = vmatprep.subr.bf16.mxu1 %v2350_v55  ;;  %v2434_v27 = vld [vmem:[#allocation3 + $0x558] sm:$0xff]  ;;  %v2431_v55 = vld [vmem:[#allocation3 + $0x540] sm:$0xff] }
 0x6c0   :  { %2773 = vmatpush1.bf16.msra.mxu0 %v2347_v36  ;;  %2937 = vmatpush1.bf16.msra.mxu1 %v2349_v8  ;;  %v2433_v36 = vld [vmem:[#allocation3 + $0x550] sm:$0xff]  ;;  %v2439_v8 = vld [vmem:[#allocation3 + $0x580] sm:$0xff] }
 0x6c1   :  { %2774 = vmatprep.subr.bf16.mxu0 %v2355_v0  ;;  %2938 = vmatprep.subr.bf16.mxu1 %v2357_v6  ;;  %v2441_v0 = vld [vmem:[#allocation3 + $0x590] sm:$0xff]  ;;  %v2438_v6 = vld [vmem:[#allocation3 + $0x578] sm:$0xff] }
 0x6c4   :  { %2775 = vmatpush1.bf16.msra.mxu0 %v2354_v38  ;;  %2939 = vmatpush1.bf16.msra.mxu1 %v2356_v9  ;;  %v2440_v38 = vld [vmem:[#allocation3 + $0x588] sm:$0xff]  ;;  %v2446_v9 = vld [vmem:[#allocation3 + $0x5b8] sm:$0xff] }
 0x6c5   :  { %2776 = vmatprep.subr.bf16.mxu0 %v2362_v7  ;;  %2940 = vmatprep.subr.bf16.mxu1 %v2364_v10  ;;  %v2448_v7 = vld [vmem:[#allocation3 + $0x5c8] sm:$0xff]  ;;  %v2445_v10 = vld [vmem:[#allocation3 + $0x5b0] sm:$0xff] }
 0x6c8   :  { %2777 = vmatpush1.bf16.msra.mxu0 %v2361_v24  ;;  %2941 = vmatpush1.bf16.msra.mxu1 %v2363_v39  ;;  %v2447_v24 = vld [vmem:[#allocation3 + $0x5c0] sm:$0xff]  ;;  %v2453_v39 = vld [vmem:[#allocation3 + $0x5f0] sm:$0xff] }
 0x6c9   :  { %2778 = vmatprep.subr.bf16.mxu0 %v2369_v26  ;;  %2942 = vmatprep.subr.bf16.mxu1 %v2371_v40  ;;  %v2455_v26 = vld [vmem:[#allocation3 + $0x600] sm:$0xff]  ;;  %v2452_v40 = vld [vmem:[#allocation3 + $0x5e8] sm:$0xff] }
 0x6cc   :  { %2779 = vmatpush1.bf16.msra.mxu0 %v2368_v43  ;;  %2943 = vmatpush1.bf16.msra.mxu1 %v2370_v34  ;;  %v2454_v43 = vld [vmem:[#allocation3 + $0x5f8] sm:$0xff]  ;;  %v2460_v34 = vld [vmem:[#allocation3 + $0x628] sm:$0xff] }
 0x6cd   :  { %2789 = vmatprep.subr.bf16.mxu0 %v2376_v63  ;;  %2953 = vmatprep.subr.bf16.mxu1 %v2378_v18  ;;  %v2462_v63 = vld [vmem:[#allocation3 + $0x638] sm:$0xff]  ;;  %v2459_v18 = vld [vmem:[#allocation3 + $0x620] sm:$0xff] }
 0x6cf   :  { %2781 = vmatmul.mubr.bf16.vlgmr.msra.gmra.mrb[12].mxu0 %v4737_v47  ;;  %2945 = vmatmul.mubr.bf16.vlgmr.msra.gmra.mrb[20].mxu1 %v4737_v47 }
 0x6d0   :  { %2790 = vmatpush1.bf16.msra.mxu0 %v2375_v35  ;;  %2954 = vmatpush1.bf16.msra.mxu1 %v2377_v37  ;;  %v2461_v35 = vld [vmem:[#allocation3 + $0x630] sm:$0xff]  ;;  %v2467_v37 = vld [vmem:[#allocation3 + $0x660] sm:$0xff] }
 0x6d1   :  { %2791 = vmatprep.subr.bf16.mxu0 %v2383_v11  ;;  %2955 = vmatprep.subr.bf16.mxu1 %v2385_v41  ;;  %v2469_v11 = vld [vmem:[#allocation3 + $0x670] sm:$0xff]  ;;  %v2466_v41 = vld [vmem:[#allocation3 + $0x658] sm:$0xff] }
 0x6d2   :  { %2821 = vmatprep.mubr.bf16.mxu0 %v4741_v42  ;;  %2985 = vmatprep.mubr.bf16.mxu1 %v4741_v42 }
 0x6d4   :  { %2792 = vmatpush1.bf16.msra.mxu0 %v2382_v51  ;;  %2956 = vmatpush1.bf16.msra.mxu1 %v2384_v45  ;;  %v2468_v51 = vld [vmem:[#allocation3 + $0x668] sm:$0xff]  ;;  %v2474_v45 = vld [vmem:[#allocation3 + $0x698] sm:$0xff] }
 0x6d5   :  { %2793 = vmatprep.subr.bf16.mxu0 %v2390_v5  ;;  %2957 = vmatprep.subr.bf16.mxu1 %v2392_v12  ;;  %v2476_v5 = vld [vmem:[#allocation3 + $0x6a8] sm:$0xff]  ;;  %v2473_v12 = vld [vmem:[#allocation3 + $0x690] sm:$0xff] }
 0x6d8   :  { %2794 = vmatpush1.bf16.msra.mxu0 %v2389_v44  ;;  %2958 = vmatpush1.bf16.msra.mxu1 %v2391_v48  ;;  %v2475_v44 = vld [vmem:[#allocation3 + $0x6a0] sm:$0xff]  ;;  %v2481_v48 = vld [vmem:[#allocation3 + $0x6d0] sm:$0xff] }
 0x6d9   :  { %2795 = vmatprep.subr.bf16.mxu0 %v2397_v50  ;;  %2959 = vmatprep.subr.bf16.mxu1 %v2399_v2  ;;  %v2483_v50 = vld [vmem:[#allocation3 + $0x6e0] sm:$0xff]  ;;  %v2480_v2 = vld [vmem:[#allocation3 + $0x6c8] sm:$0xff] }
 0x6dc   :  { %2796 = vmatpush1.bf16.msra.mxu0 %v2396_v13  ;;  %2960 = vmatpush1.bf16.msra.mxu1 %v2398_v56  ;;  %v2482_v13 = vld [vmem:[#allocation3 + $0x6d8] sm:$0xff]  ;;  %v2488_v56 = vld [vmem:[#allocation3 + $0x708] sm:$0xff] }
 0x6dd   :  { %2797 = vmatprep.subr.bf16.mxu0 %v2404_v57  ;;  %2961 = vmatprep.subr.bf16.mxu1 %v2406_v58  ;;  %v2490_v57 = vld [vmem:[#allocation3 + $0x718] sm:$0xff]  ;;  %v4749_v58 = vpack.c.bf16 %v4714_v28, %v4714_v28 }
 0x6de   :  { %v2494_v28 = vld [vmem:[#allocation3 + $0x738] sm:$0xff] }
 0x6e0   :  { %2798 = vmatpush1.bf16.msra.mxu0 %v2403_v46  ;;  %2962 = vmatpush1.bf16.msra.mxu1 %v2405_v59  ;;  %v2487_v46 = vld [vmem:[#allocation3 + $0x700] sm:$0xff]  ;;  %v2489_v59 = vld [vmem:[#allocation3 + $0x710] sm:$0xff] }
 0x6e1   :  { %2799 = vmatprep.subr.bf16.mxu0 %v2411_v60  ;;  %2963 = vmatprep.subr.bf16.mxu1 %v2413_v61  ;;  %v2495_v60 = vld [vmem:[#allocation3 + $0x740] sm:$0xff]  ;;  %v2497_v61 = vld [vmem:[#allocation3 + $0x750] sm:$0xff] }
 0x6e4   :  { %2800 = vmatpush1.bf16.msra.mxu0 %v2410_v4  ;;  %2964 = vmatpush1.bf16.msra.mxu1 %v2412_v49  ;;  %v4753_v4 = vpack.c.bf16 %v4723_v30, %v4723_v30  ;;  %v2496_v49 = vld [vmem:[#allocation3 + $0x748] sm:$0xff]  ;;  %v2501_v30 = vld [vmem:[#allocation3 + $0x770] sm:$0xff] }
 0x6e5   :  { %2801 = vmatprep.subr.bf16.mxu0 %v2418_v16  ;;  %2965 = vmatprep.subr.bf16.mxu1 %v2420_v21  ;;  %v2502_v16 = vld [vmem:[#allocation3 + $0x778] sm:$0xff]  ;;  %v2504_v21 = vld [vmem:[#allocation3 + $0x788] sm:$0xff] }
 0x6e8   :  { %2802 = vmatpush1.bf16.msra.mxu0 %v2417_v22  ;;  %2966 = vmatpush1.bf16.msra.mxu1 %v2419_v62  ;;  %v2503_v22 = vld [vmem:[#allocation3 + $0x780] sm:$0xff]  ;;  %v2509_v62 = vld [vmem:[#allocation3 + $0x7b0] sm:$0xff] }
 0x6e9   :  { %2803 = vmatprep.subr.bf16.mxu0 %v2425_v20  ;;  %2967 = vmatprep.subr.bf16.mxu1 %v2427_v1  ;;  %v2511_v20 = vld [vmem:[#allocation3 + $0x7c0] sm:$0xff]  ;;  %v2508_v1 = vld [vmem:[#allocation3 + $0x7a8] sm:$0xff] }
 0x6ec   :  { %2804 = vmatpush1.bf16.msra.mxu0 %v2424_v3  ;;  %2968 = vmatpush1.bf16.msra.mxu1 %v2426_v23  ;;  %v2510_v3 = vld [vmem:[#allocation3 + $0x7b8] sm:$0xff]  ;;  %v2516_v23 = vld [vmem:[#allocation3 + $0x7e8] sm:$0xff] }
 0x6ed   :  { %2805 = vmatprep.subr.bf16.mxu0 %v2432_v25  ;;  %2969 = vmatprep.subr.bf16.mxu1 %v2434_v27  ;;  %v2518_v25 = vld [vmem:[#allocation3 + $0x7f8] sm:$0xff]  ;;  %v2515_v27 = vld [vmem:[#allocation3 + $0x7e0] sm:$0xff] }
 0x6f0   :  { %2806 = vmatpush1.bf16.msra.mxu0 %v2431_v55  ;;  %2970 = vmatpush1.bf16.msra.mxu1 %v2433_v36  ;;  %v2517_v55 = vld [vmem:[#allocation3 + $0x7f0] sm:$0xff]  ;;  %v2523_v36 = vld [vmem:[#allocation3 + $0x820] sm:$0xff] }
 0x6f1   :  { %2807 = vmatprep.subr.bf16.mxu0 %v2439_v8  ;;  %2971 = vmatprep.subr.bf16.mxu1 %v2441_v0  ;;  %v2525_v8 = vld [vmem:[#allocation3 + $0x830] sm:$0xff]  ;;  %v2522_v0 = vld [vmem:[#allocation3 + $0x818] sm:$0xff] }
 0x6f4   :  { %2808 = vmatpush1.bf16.msra.mxu0 %v2438_v6  ;;  %2972 = vmatpush1.bf16.msra.mxu1 %v2440_v38  ;;  %v2524_v6 = vld [vmem:[#allocation3 + $0x828] sm:$0xff]  ;;  %v2530_v38 = vld [vmem:[#allocation3 + $0x858] sm:$0xff] }
 0x6f5   :  { %2809 = vmatprep.subr.bf16.mxu0 %v2446_v9  ;;  %2973 = vmatprep.subr.bf16.mxu1 %v2448_v7  ;;  %v2532_v9 = vld [vmem:[#allocation3 + $0x868] sm:$0xff]  ;;  %v2529_v7 = vld [vmem:[#allocation3 + $0x850] sm:$0xff] }
 0x6f8   :  { %2810 = vmatpush1.bf16.msra.mxu0 %v2445_v10  ;;  %2974 = vmatpush1.bf16.msra.mxu1 %v2447_v24  ;;  %v2531_v10 = vld [vmem:[#allocation3 + $0x860] sm:$0xff]  ;;  %v2537_v24 = vld [vmem:[#allocation3 + $0x890] sm:$0xff] }
 0x6f9   :  { %2811 = vmatprep.subr.bf16.mxu0 %v2453_v39  ;;  %2975 = vmatprep.subr.bf16.mxu1 %v2455_v26  ;;  %v2539_v39 = vld [vmem:[#allocation3 + $0x8a0] sm:$0xff]  ;;  %v2536_v26 = vld [vmem:[#allocation3 + $0x888] sm:$0xff] }
 0x6fc   :  { %2812 = vmatpush1.bf16.msra.mxu0 %v2452_v40  ;;  %2976 = vmatpush1.bf16.msra.mxu1 %v2454_v43  ;;  %v2538_v40 = vld [vmem:[#allocation3 + $0x898] sm:$0xff]  ;;  %v2544_v43 = vld [vmem:[#allocation3 + $0x8c8] sm:$0xff] }
 0x6fd   :  { %2813 = vmatprep.subr.bf16.mxu0 %v2460_v34  ;;  %2977 = vmatprep.subr.bf16.mxu1 %v2462_v63  ;;  %v2546_v34 = vld [vmem:[#allocation3 + $0x8d8] sm:$0xff]  ;;  %v2543_v63 = vld [vmem:[#allocation3 + $0x8c0] sm:$0xff] }
 0x700   :  { %2814 = vmatpush1.bf16.msra.mxu0 %v2459_v18  ;;  %2978 = vmatpush1.bf16.msra.mxu1 %v2461_v35  ;;  %v2545_v18 = vld [vmem:[#allocation3 + $0x8d0] sm:$0xff]  ;;  %v2551_v35 = vld [vmem:[#allocation3 + $0x900] sm:$0xff] }
 0x701   :  { %2815 = vmatprep.subr.bf16.mxu0 %v2467_v37  ;;  %2979 = vmatprep.subr.bf16.mxu1 %v2469_v11  ;;  %v2553_v37 = vld [vmem:[#allocation3 + $0x910] sm:$0xff]  ;;  %v2550_v11 = vld [vmem:[#allocation3 + $0x8f8] sm:$0xff] }
 0x704   :  { %2816 = vmatpush1.bf16.msra.mxu0 %v2466_v41  ;;  %2980 = vmatpush1.bf16.msra.mxu1 %v2468_v51  ;;  %v2552_v41 = vld [vmem:[#allocation3 + $0x908] sm:$0xff]  ;;  %v2558_v51 = vld [vmem:[#allocation3 + $0x938] sm:$0xff] }
 0x705   :  { %2817 = vmatprep.subr.bf16.mxu0 %v2474_v45  ;;  %2981 = vmatprep.subr.bf16.mxu1 %v2476_v5  ;;  %v2560_v45 = vld [vmem:[#allocation3 + $0x948] sm:$0xff]  ;;  %v2557_v5 = vld [vmem:[#allocation3 + $0x930] sm:$0xff] }
 0x708   :  { %2818 = vmatpush1.bf16.msra.mxu0 %v2473_v12  ;;  %2982 = vmatpush1.bf16.msra.mxu1 %v2475_v44  ;;  %v2559_v12 = vld [vmem:[#allocation3 + $0x940] sm:$0xff]  ;;  %v2565_v44 = vld [vmem:[#allocation3 + $0x970] sm:$0xff] }
 0x709   :  { %2819 = vmatprep.subr.bf16.mxu0 %v2481_v48  ;;  %2983 = vmatprep.subr.bf16.mxu1 %v2483_v50  ;;  %v2567_v48 = vld [vmem:[#allocation3 + $0x980] sm:$0xff]  ;;  %v2564_v50 = vld [vmem:[#allocation3 + $0x968] sm:$0xff] }
 0x70c   :  { %2820 = vmatpush1.bf16.msra.mxu0 %v2480_v2  ;;  %2984 = vmatpush1.bf16.msra.mxu1 %v2482_v13  ;;  %v2566_v2 = vld [vmem:[#allocation3 + $0x978] sm:$0xff]  ;;  %v2572_v13 = vld [vmem:[#allocation3 + $0x9a8] sm:$0xff] }
 0x70d   :  { %2830 = vmatprep.subr.bf16.mxu0 %v2488_v56  ;;  %2994 = vmatprep.subr.bf16.mxu1 %v2490_v57  ;;  %v2574_v56 = vld [vmem:[#allocation3 + $0x9b8] sm:$0xff]  ;;  %v2571_v57 = vld [vmem:[#allocation3 + $0x9a0] sm:$0xff] }
 0x70f   :  { %2822 = vmatmul.mubr.bf16.vlgmr.msra.gmra.mrb[12].mxu0 %v4749_v58  ;;  %2986 = vmatmul.mubr.bf16.vlgmr.msra.gmra.mrb[20].mxu1 %v4749_v58 }
 0x710   :  { %2831 = vmatpush1.bf16.msra.mxu0 %v2487_v46  ;;  %2995 = vmatpush1.bf16.msra.mxu1 %v2489_v59  ;;  %v2573_v46 = vld [vmem:[#allocation3 + $0x9b0] sm:$0xff]  ;;  %v2579_v59 = vld [vmem:[#allocation3 + $0x9e0] sm:$0xff] }
 0x711   :  { %2832 = vmatprep.subr.bf16.mxu0 %v2495_v60  ;;  %2996 = vmatprep.subr.bf16.mxu1 %v2497_v61  ;;  %v2581_v60 = vld [vmem:[#allocation3 + $0x9f0] sm:$0xff]  ;;  %v2578_v61 = vld [vmem:[#allocation3 + $0x9d8] sm:$0xff] }
 0x712   :  { %2862 = vmatprep.mubr.bf16.mxu0 %v4753_v4  ;;  %3026 = vmatprep.mubr.bf16.mxu1 %v4753_v4 }
 0x714   :  { %2833 = vmatpush1.bf16.msra.mxu0 %v2494_v28  ;;  %2997 = vmatpush1.bf16.msra.mxu1 %v2496_v49  ;;  %v2580_v28 = vld [vmem:[#allocation3 + $0x9e8] sm:$0xff]  ;;  %v2586_v49 = vld [vmem:[#allocation3 + $0xa18] sm:$0xff] }
 0x715   :  { %2834 = vmatprep.subr.bf16.mxu0 %v2502_v16  ;;  %2998 = vmatprep.subr.bf16.mxu1 %v2504_v21  ;;  %v2588_v16 = vld [vmem:[#allocation3 + $0xa28] sm:$0xff]  ;;  %v2585_v21 = vld [vmem:[#allocation3 + $0xa10] sm:$0xff] }
 0x718   :  { %2835 = vmatpush1.bf16.msra.mxu0 %v2501_v30  ;;  %2999 = vmatpush1.bf16.msra.mxu1 %v2503_v22  ;;  %v2587_v30 = vld [vmem:[#allocation3 + $0xa20] sm:$0xff]  ;;  %v2593_v22 = vld [vmem:[#allocation3 + $0xa50] sm:$0xff] }
 0x719   :  { %2836 = vmatprep.subr.bf16.mxu0 %v2509_v62  ;;  %3000 = vmatprep.subr.bf16.mxu1 %v2511_v20  ;;  %v2595_v62 = vld [vmem:[#allocation3 + $0xa60] sm:$0xff]  ;;  %v2592_v20 = vld [vmem:[#allocation3 + $0xa48] sm:$0xff] }
 0x71c   :  { %2837 = vmatpush1.bf16.msra.mxu0 %v2508_v1  ;;  %3001 = vmatpush1.bf16.msra.mxu1 %v2510_v3  ;;  %v2594_v1 = vld [vmem:[#allocation3 + $0xa58] sm:$0xff]  ;;  %v2600_v3 = vld [vmem:[#allocation3 + $0xa88] sm:$0xff] }
 0x71d   :  { %2838 = vmatprep.subr.bf16.mxu0 %v2516_v23  ;;  %3002 = vmatprep.subr.bf16.mxu1 %v2518_v25  ;;  %v2602_v23 = vld [vmem:[#allocation3 + $0xa98] sm:$0xff]  ;;  %v4761_v25 = vpack.c.bf16 %v4720_v29, %v4720_v29 }
 0x71e   :  { %v2606_v29 = vld [vmem:[#allocation3 + $0xab8] sm:$0xff] }
 0x720   :  { %2839 = vmatpush1.bf16.msra.mxu0 %v2515_v27  ;;  %3003 = vmatpush1.bf16.msra.mxu1 %v2517_v55  ;;  %v2599_v27 = vld [vmem:[#allocation3 + $0xa80] sm:$0xff]  ;;  %v2601_v55 = vld [vmem:[#allocation3 + $0xa90] sm:$0xff] }
 0x721   :  { %2840 = vmatprep.subr.bf16.mxu0 %v2523_v36  ;;  %3004 = vmatprep.subr.bf16.mxu1 %v2525_v8  ;;  %v2607_v36 = vld [vmem:[#allocation3 + $0xac0] sm:$0xff]  ;;  %v2609_v8 = vld [vmem:[#allocation3 + $0xad0] sm:$0xff] }
 0x724   :  { %2841 = vmatpush1.bf16.msra.mxu0 %v2522_v0  ;;  %3005 = vmatpush1.bf16.msra.mxu1 %v2524_v6  ;;  %v4765_v0 = vpack.c.bf16 %v4729_v32, %v4729_v32  ;;  %v2608_v6 = vld [vmem:[#allocation3 + $0xac8] sm:$0xff]  ;;  %v2613_v32 = vld [vmem:[#allocation3 + $0xaf0] sm:$0xff] }
 0x725   :  { %2842 = vmatprep.subr.bf16.mxu0 %v2530_v38  ;;  %3006 = vmatprep.subr.bf16.mxu1 %v2532_v9  ;;  %v2614_v38 = vld [vmem:[#allocation3 + $0xaf8] sm:$0xff]  ;;  %v2616_v9 = vld [vmem:[#allocation3 + $0xb08] sm:$0xff] }
 0x728   :  { %2843 = vmatpush1.bf16.msra.mxu0 %v2529_v7  ;;  %3007 = vmatpush1.bf16.msra.mxu1 %v2531_v10  ;;  %v2615_v7 = vld [vmem:[#allocation3 + $0xb00] sm:$0xff]  ;;  %v2621_v10 = vld [vmem:[#allocation3 + $0xb30] sm:$0xff] }
 0x729   :  { %2844 = vmatprep.subr.bf16.mxu0 %v2537_v24  ;;  %3008 = vmatprep.subr.bf16.mxu1 %v2539_v39  ;;  %v2623_v24 = vld [vmem:[#allocation3 + $0xb40] sm:$0xff]  ;;  %v2620_v39 = vld [vmem:[#allocation3 + $0xb28] sm:$0xff] }
 0x72c   :  { %2845 = vmatpush1.bf16.msra.mxu0 %v2536_v26  ;;  %3009 = vmatpush1.bf16.msra.mxu1 %v2538_v40  ;;  %v2622_v26 = vld [vmem:[#allocation3 + $0xb38] sm:$0xff]  ;;  %v2628_v40 = vld [vmem:[#allocation3 + $0xb68] sm:$0xff] }
 0x72d   :  { %2846 = vmatprep.subr.bf16.mxu0 %v2544_v43  ;;  %3010 = vmatprep.subr.bf16.mxu1 %v2546_v34  ;;  %v2630_v43 = vld [vmem:[#allocation3 + $0xb78] sm:$0xff]  ;;  %v2627_v34 = vld [vmem:[#allocation3 + $0xb60] sm:$0xff] }
 0x730   :  { %2847 = vmatpush1.bf16.msra.mxu0 %v2543_v63  ;;  %3011 = vmatpush1.bf16.msra.mxu1 %v2545_v18  ;;  %v2629_v63 = vld [vmem:[#allocation3 + $0xb70] sm:$0xff]  ;;  %v2635_v18 = vld [vmem:[#allocation3 + $0xba0] sm:$0xff] }
 0x731   :  { %2848 = vmatprep.subr.bf16.mxu0 %v2551_v35  ;;  %3012 = vmatprep.subr.bf16.mxu1 %v2553_v37  ;;  %v2637_v35 = vld [vmem:[#allocation3 + $0xbb0] sm:$0xff]  ;;  %v2634_v37 = vld [vmem:[#allocation3 + $0xb98] sm:$0xff] }
 0x734   :  { %2849 = vmatpush1.bf16.msra.mxu0 %v2550_v11  ;;  %3013 = vmatpush1.bf16.msra.mxu1 %v2552_v41  ;;  %v2636_v11 = vld [vmem:[#allocation3 + $0xba8] sm:$0xff]  ;;  %v2642_v41 = vld [vmem:[#allocation3 + $0xbd8] sm:$0xff] }
 0x735   :  { %2850 = vmatprep.subr.bf16.mxu0 %v2558_v51  ;;  %3014 = vmatprep.subr.bf16.mxu1 %v2560_v45  ;;  %v2644_v51 = vld [vmem:[#allocation3 + $0xbe8] sm:$0xff]  ;;  %v2641_v45 = vld [vmem:[#allocation3 + $0xbd0] sm:$0xff] }
 0x738   :  { %2851 = vmatpush1.bf16.msra.mxu0 %v2557_v5  ;;  %3015 = vmatpush1.bf16.msra.mxu1 %v2559_v12  ;;  %v2643_v5 = vld [vmem:[#allocation3 + $0xbe0] sm:$0xff]  ;;  %v2649_v12 = vld [vmem:[#allocation3 + $0xc10] sm:$0xff] }
 0x739   :  { %2852 = vmatprep.subr.bf16.mxu0 %v2565_v44  ;;  %3016 = vmatprep.subr.bf16.mxu1 %v2567_v48  ;;  %v2651_v44 = vld [vmem:[#allocation3 + $0xc20] sm:$0xff]  ;;  %v2648_v48 = vld [vmem:[#allocation3 + $0xc08] sm:$0xff] }
 0x73c   :  { %2853 = vmatpush1.bf16.msra.mxu0 %v2564_v50  ;;  %3017 = vmatpush1.bf16.msra.mxu1 %v2566_v2  ;;  %v2650_v50 = vld [vmem:[#allocation3 + $0xc18] sm:$0xff]  ;;  %v2656_v2 = vld [vmem:[#allocation3 + $0xc48] sm:$0xff] }
 0x73d   :  { %2854 = vmatprep.subr.bf16.mxu0 %v2572_v13  ;;  %3018 = vmatprep.subr.bf16.mxu1 %v2574_v56  ;;  %v2658_v13 = vld [vmem:[#allocation3 + $0xc58] sm:$0xff]  ;;  %v2655_v56 = vld [vmem:[#allocation3 + $0xc40] sm:$0xff] }
 0x740   :  { %2855 = vmatpush1.bf16.msra.mxu0 %v2571_v57  ;;  %3019 = vmatpush1.bf16.msra.mxu1 %v2573_v46  ;;  %v2657_v57 = vld [vmem:[#allocation3 + $0xc50] sm:$0xff]  ;;  %v2663_v46 = vld [vmem:[#allocation3 + $0xc80] sm:$0xff] }
 0x741   :  { %2856 = vmatprep.subr.bf16.mxu0 %v2579_v59  ;;  %3020 = vmatprep.subr.bf16.mxu1 %v2581_v60  ;;  %v2665_v59 = vld [vmem:[#allocation3 + $0xc90] sm:$0xff]  ;;  %v2662_v60 = vld [vmem:[#allocation3 + $0xc78] sm:$0xff] }
 0x744   :  { %2857 = vmatpush1.bf16.msra.mxu0 %v2578_v61  ;;  %3021 = vmatpush1.bf16.msra.mxu1 %v2580_v28  ;;  %v2664_v61 = vld [vmem:[#allocation3 + $0xc88] sm:$0xff]  ;;  %v2670_v28 = vld [vmem:[#allocation3 + $0xcb8] sm:$0xff] }
 0x745   :  { %2858 = vmatprep.subr.bf16.mxu0 %v2586_v49  ;;  %3022 = vmatprep.subr.bf16.mxu1 %v2588_v16  ;;  %v2672_v49 = vld [vmem:[#allocation3 + $0xcc8] sm:$0xff]  ;;  %v2669_v16 = vld [vmem:[#allocation3 + $0xcb0] sm:$0xff] }
 0x748   :  { %2859 = vmatpush1.bf16.msra.mxu0 %v2585_v21  ;;  %3023 = vmatpush1.bf16.msra.mxu1 %v2587_v30  ;;  %v2671_v21 = vld [vmem:[#allocation3 + $0xcc0] sm:$0xff]  ;;  %v2677_v30 = vld [vmem:[#allocation3 + $0xcf0] sm:$0xff] }
 0x749   :  { %2860 = vmatprep.subr.bf16.mxu0 %v2593_v22  ;;  %3024 = vmatprep.subr.bf16.mxu1 %v2595_v62  ;;  %v2679_v22 = vld [vmem:[#allocation3 + $0xd00] sm:$0xff]  ;;  %v2676_v62 = vld [vmem:[#allocation3 + $0xce8] sm:$0xff] }
 0x74c   :  { %2861 = vmatpush1.bf16.msra.mxu0 %v2592_v20  ;;  %3025 = vmatpush1.bf16.msra.mxu1 %v2594_v1  ;;  %v2678_v20 = vld [vmem:[#allocation3 + $0xcf8] sm:$0xff]  ;;  %v2684_v1 = vld [vmem:[#allocation3 + $0xd28] sm:$0xff] }
 0x74d   :  { %2871 = vmatprep.subr.bf16.mxu0 %v2600_v3  ;;  %3035 = vmatprep.subr.bf16.mxu1 %v2602_v23  ;;  %v2686_v3 = vld [vmem:[#allocation3 + $0xd38] sm:$0xff]  ;;  %v2683_v23 = vld [vmem:[#allocation3 + $0xd20] sm:$0xff] }
 0x74f   :  { %2863 = vmatmul.mubr.bf16.vlgmr.msra.gmra.mrb[12].mxu0 %v4761_v25  ;;  %3027 = vmatmul.mubr.bf16.vlgmr.msra.gmra.mrb[20].mxu1 %v4761_v25 }
 0x750   :  { %2872 = vmatpush1.bf16.msra.mxu0 %v2599_v27  ;;  %3036 = vmatpush1.bf16.msra.mxu1 %v2601_v55  ;;  %v2685_v27 = vld [vmem:[#allocation3 + $0xd30] sm:$0xff]  ;;  %v2691_v55 = vld [vmem:[#allocation3 + $0xd60] sm:$0xff] }
 0x751   :  { %2873 = vmatprep.subr.bf16.mxu0 %v2607_v36  ;;  %3037 = vmatprep.subr.bf16.mxu1 %v2609_v8  ;;  %v2693_v36 = vld [vmem:[#allocation3 + $0xd70] sm:$0xff]  ;;  %v2690_v8 = vld [vmem:[#allocation3 + $0xd58] sm:$0xff] }
 0x752   :  { %2903 = vmatprep.mubr.bf16.mxu0 %v4765_v0  ;;  %3067 = vmatprep.mubr.bf16.mxu1 %v4765_v0 }
 0x754   :  { %2874 = vmatpush1.bf16.msra.mxu0 %v2606_v29  ;;  %3038 = vmatpush1.bf16.msra.mxu1 %v2608_v6  ;;  %v2692_v29 = vld [vmem:[#allocation3 + $0xd68] sm:$0xff]  ;;  %v2698_v6 = vld [vmem:[#allocation3 + $0xd98] sm:$0xff] }
 0x755   :  { %2875 = vmatprep.subr.bf16.mxu0 %v2614_v38  ;;  %3039 = vmatprep.subr.bf16.mxu1 %v2616_v9  ;;  %v2700_v38 = vld [vmem:[#allocation3 + $0xda8] sm:$0xff]  ;;  %v2697_v9 = vld [vmem:[#allocation3 + $0xd90] sm:$0xff] }
 0x758   :  { %2876 = vmatpush1.bf16.msra.mxu0 %v2613_v32  ;;  %3040 = vmatpush1.bf16.msra.mxu1 %v2615_v7  ;;  %v2699_v32 = vld [vmem:[#allocation3 + $0xda0] sm:$0xff]  ;;  %v2705_v7 = vld [vmem:[#allocation3 + $0xdd0] sm:$0xff] }
 0x759   :  { %2877 = vmatprep.subr.bf16.mxu0 %v2621_v10  ;;  %3041 = vmatprep.subr.bf16.mxu1 %v2623_v24  ;;  %v2707_v10 = vld [vmem:[#allocation3 + $0xde0] sm:$0xff]  ;;  %v2704_v24 = vld [vmem:[#allocation3 + $0xdc8] sm:$0xff] }
 0x75c   :  { %2878 = vmatpush1.bf16.msra.mxu0 %v2620_v39  ;;  %3042 = vmatpush1.bf16.msra.mxu1 %v2622_v26  ;;  %v2706_v39 = vld [vmem:[#allocation3 + $0xdd8] sm:$0xff]  ;;  %v2268_v26 = vld [vmem:[#allocation3 + $0x28] sm:$0xff] }
 0x75d   :  { %2879 = vmatprep.subr.bf16.mxu0 %v2628_v40  ;;  %3043 = vmatprep.subr.bf16.mxu1 %v2630_v43  ;;  %v2325_v40 = vld [vmem:[#allocation3 + $0x1f0] sm:$0xff]  ;;  %v4773_v43 = vpack.c.bf16 %v4726_v31, %v4726_v31  ;;  %v2282_v31 = vld [vmem:[#allocation3 + $0x98] sm:$0xff] }
 0x760   :  { %2880 = vmatpush1.bf16.msra.mxu0 %v2627_v34  ;;  %3044 = vmatpush1.bf16.msra.mxu1 %v2629_v63  ;;  %v2267_v34 = vld [vmem:[#allocation3 + $0x20] sm:$0xff]  ;;  %v2269_v63 = vld [vmem:[#allocation3 + $0x30] sm:$0xff] }
 0x761   :  { %2881 = vmatprep.subr.bf16.mxu0 %v2635_v18  ;;  %3045 = vmatprep.subr.bf16.mxu1 %v2637_v35  ;;  %v2275_v18 = vld [vmem:[#allocation3 + $0x60] sm:$0xff]  ;;  %v2332_v35 = vld [vmem:[#allocation3 + $0x228] sm:$0xff] }
 0x764   :  { %2882 = vmatpush1.bf16.msra.mxu0 %v2634_v37  ;;  %3046 = vmatpush1.bf16.msra.mxu1 %v2636_v11  ;;  %v2274_v37 = vld [vmem:[#allocation3 + $0x58] sm:$0xff]  ;;  %v2276_v11 = vld [vmem:[#allocation3 + $0x68] sm:$0xff] }
 0x765   :  { %2883 = vmatprep.subr.bf16.mxu0 %v2642_v41  ;;  %3047 = vmatprep.subr.bf16.mxu1 %v2644_v51  ;;  %v2339_v41 = vld [vmem:[#allocation3 + $0x260] sm:$0xff]  ;;  %v2281_v51 = vld [vmem:[#allocation3 + $0x90] sm:$0xff] }
 0x768   :  { %2884 = vmatpush1.bf16.msra.mxu0 %v2641_v45  ;;  %3048 = vmatpush1.bf16.msra.mxu1 %v2643_v5  ;;  %v2283_v45 = vld [vmem:[#allocation3 + $0xa0] sm:$0xff]  ;;  %v2289_v5 = vld [vmem:[#allocation3 + $0xd0] sm:$0xff] }
 0x769   :  { %2885 = vmatprep.subr.bf16.mxu0 %v2649_v12  ;;  %3049 = vmatprep.subr.bf16.mxu1 %v2651_v44  ;;  %v2346_v12 = vld [vmem:[#allocation3 + $0x298] sm:$0xff]  ;;  %v2288_v44 = vld [vmem:[#allocation3 + $0xc8] sm:$0xff] }
 0x76c   :  { %2886 = vmatpush1.bf16.msra.mxu0 %v2648_v48  ;;  %3050 = vmatpush1.bf16.msra.mxu1 %v2650_v50  ;;  %v2290_v48 = vld [vmem:[#allocation3 + $0xd8] sm:$0xff]  ;;  %v2296_v50 = vld [vmem:[#allocation3 + $0x108] sm:$0xff] }
 0x76d   :  { %2887 = vmatprep.subr.bf16.mxu0 %v2656_v2  ;;  %3051 = vmatprep.subr.bf16.mxu1 %v2658_v13  ;;  %v2353_v2 = vld [vmem:[#allocation3 + $0x2d0] sm:$0xff] }
 0x76e   :  { %v2297_v13 = vld [vmem:[#allocation3 + $0x110] sm:$0xff] }
 0x770   :  { %2888 = vmatpush1.bf16.msra.mxu0 %v2655_v56  ;;  %3052 = vmatpush1.bf16.msra.mxu1 %v2657_v57  ;;  %v2303_v56 = vld [vmem:[#allocation3 + $0x140] sm:$0xff]  ;;  %v2360_v57 = vld [vmem:[#allocation3 + $0x308] sm:$0xff] }
 0x771   :  { %2889 = vmatprep.subr.bf16.mxu0 %v2663_v46  ;;  %3053 = vmatprep.subr.bf16.mxu1 %v2665_v59  ;;  %v2302_v46 = vld [vmem:[#allocation3 + $0x138] sm:$0xff]  ;;  %v2304_v59 = vld [vmem:[#allocation3 + $0x148] sm:$0xff] }
 0x774   :  { %2890 = vmatpush1.bf16.msra.mxu0 %v2662_v60  ;;  %3054 = vmatpush1.bf16.msra.mxu1 %v2664_v61  ;;  %v2310_v60 = vld [vmem:[#allocation3 + $0x178] sm:$0xff]  ;;  %v2367_v61 = vld [vmem:[#allocation3 + $0x340] sm:$0xff] }
 0x775   :  { %2891 = vmatprep.subr.bf16.mxu0 %v2670_v28  ;;  %3055 = vmatprep.subr.bf16.mxu1 %v2672_v49  ;;  %v2309_v28 = vld [vmem:[#allocation3 + $0x170] sm:$0xff]  ;;  %v2311_v49 = vld [vmem:[#allocation3 + $0x180] sm:$0xff] }
 0x778   :  { %2892 = vmatpush1.bf16.msra.mxu0 %v2669_v16  ;;  %3056 = vmatpush1.bf16.msra.mxu1 %v2671_v21  ;;  %v2317_v16 = vld [vmem:[#allocation3 + $0x1b0] sm:$0xff]  ;;  %v2374_v21 = vld [vmem:[#allocation3 + $0x378] sm:$0xff] }
 0x779   :  { %2893 = vmatprep.subr.bf16.mxu0 %v2677_v30  ;;  %3057 = vmatprep.subr.bf16.mxu1 %v2679_v22  ;;  %v2316_v30 = vld [vmem:[#allocation3 + $0x1a8] sm:$0xff]  ;;  %v2318_v22 = vld [vmem:[#allocation3 + $0x1b8] sm:$0xff] }
 0x77c   :  { %2894 = vmatpush1.bf16.msra.mxu0 %v2676_v62  ;;  %3058 = vmatpush1.bf16.msra.mxu1 %v2678_v20  ;;  %v2324_v62 = vld [vmem:[#allocation3 + $0x1e8] sm:$0xff]  ;;  %v2437_v20 = vld [vmem:[#allocation3 + $0x570] sm:$0xff] }
 0x77d   :  { %2895 = vmatprep.subr.bf16.mxu0 %v2684_v1  ;;  %3059 = vmatprep.subr.bf16.mxu1 %v2686_v3  ;;  %v2323_v1 = vld [vmem:[#allocation3 + $0x1e0] sm:$0xff]  ;;  %v2381_v3 = vld [vmem:[#allocation3 + $0x3b0] sm:$0xff] }
 0x780   :  { %2896 = vmatpush1.bf16.msra.mxu0 %v2683_v23  ;;  %3060 = vmatpush1.bf16.msra.mxu1 %v2685_v27  ;;  %v2331_v23 = vld [vmem:[#allocation3 + $0x220] sm:$0xff]  ;;  %v2444_v27 = vld [vmem:[#allocation3 + $0x5a8] sm:$0xff] }
 0x781   :  { %2897 = vmatprep.subr.bf16.mxu0 %v2691_v55  ;;  %3061 = vmatprep.subr.bf16.mxu1 %v2693_v36  ;;  %v2330_v55 = vld [vmem:[#allocation3 + $0x218] sm:$0xff]  ;;  %v2388_v36 = vld [vmem:[#allocation3 + $0x3e8] sm:$0xff] }
 0x784   :  { %2898 = vmatpush1.bf16.msra.mxu0 %v2690_v8  ;;  %3062 = vmatpush1.bf16.msra.mxu1 %v2692_v29  ;;  %v2338_v8 = vld [vmem:[#allocation3 + $0x258] sm:$0xff]  ;;  %v2451_v29 = vld [vmem:[#allocation3 + $0x5e0] sm:$0xff] }
 0x785   :  { %2899 = vmatprep.subr.bf16.mxu0 %v2698_v6  ;;  %3063 = vmatprep.subr.bf16.mxu1 %v2700_v38  ;;  %v2337_v6 = vld [vmem:[#allocation3 + $0x250] sm:$0xff]  ;;  %v2395_v38 = vld [vmem:[#allocation3 + $0x420] sm:$0xff] }
 0x788   :  { %2900 = vmatpush1.bf16.msra.mxu0 %v2697_v9  ;;  %3064 = vmatpush1.bf16.msra.mxu1 %v2699_v32  ;;  %v2345_v9 = vld [vmem:[#allocation3 + $0x290] sm:$0xff]  ;;  %v2458_v32 = vld [vmem:[#allocation3 + $0x618] sm:$0xff] }
 0x789   :  { %2901 = vmatprep.subr.bf16.mxu0 %v2705_v7  ;;  %3065 = vmatprep.subr.bf16.mxu1 %v2707_v10  ;;  %v2344_v7 = vld [vmem:[#allocation3 + $0x288] sm:$0xff]  ;;  %v2402_v10 = vld [vmem:[#allocation3 + $0x458] sm:$0xff] }
 0x78c   :  { %2902 = vmatpush1.bf16.msra.mxu0 %v2704_v24  ;;  %3066 = vmatpush1.bf16.msra.mxu1 %v2706_v39  ;;  %v2352_v24 = vld [vmem:[#allocation3 + $0x2c8] sm:$0xff]  ;;  %v2465_v39 = vld [vmem:[#allocation3 + $0x650] sm:$0xff] }
 0x78d   :  { %3076 = vmatprep.subr.bf16.mxu0 %v2268_v26  ;;  %3545 = vmatprep.subr.bf16.mxu1 %v2325_v40  ;;  %v2351_v26 = vld [vmem:[#allocation3 + $0x2c0] sm:$0xff]  ;;  %v2409_v40 = vld [vmem:[#allocation3 + $0x490] sm:$0xff] }
 0x78f   :  { %2904 = vmatmul.mubr.bf16.vlgmr.msra.gmra.mrb[12].mxu0 %v4773_v43  ;;  %3068 = vmatmul.mubr.bf16.vlgmr.msra.gmra.mrb[20].mxu1 %v4773_v43 }
 0x790   :  { %3077 = vmatpush1.bf16.msra.mxu0 %v2267_v34  ;;  %3546 = vmatpush3.bf16.msra.mxu1 %v2269_v63  ;;  %v2359_v34 = vld [vmem:[#allocation3 + $0x300] sm:$0xff]  ;;  %v2472_v63 = vld [vmem:[#allocation3 + $0x688] sm:$0xff] }
 0x791   :  { %3078 = vmatprep.subr.bf16.mxu0 %v2275_v18  ;;  %3547 = vmatprep.subr.bf16.mxu1 %v2332_v35  ;;  %v2358_v18 = vld [vmem:[#allocation3 + $0x2f8] sm:$0xff]  ;;  %v2416_v35 = vld [vmem:[#allocation3 + $0x4c8] sm:$0xff] }
 0x792   :  { %3108 = vmatprep.mubr.bf16.mxu0 %v4731_v33  ;;  %3272 = vmatprep.mubr.bf16.mxu1 %v4731_v33  ;;  %v2295_v33 = vld [vmem:[#allocation3 + $0x100] sm:$0xff] }
 0x794   :  { %3079 = vmatpush1.bf16.msra.mxu0 %v2274_v37  ;;  %3548 = vmatpush3.bf16.msra.mxu1 %v2276_v11  ;;  %v2366_v37 = vld [vmem:[#allocation3 + $0x338] sm:$0xff]  ;;  %v2479_v11 = vld [vmem:[#allocation3 + $0x6c0] sm:$0xff] }
 0x795   :  { %3080 = vmatprep.subr.bf16.mxu0 %v2282_v31  ;;  %3549 = vmatprep.subr.bf16.mxu1 %v2339_v41  ;;  %v2365_v31 = vld [vmem:[#allocation3 + $0x330] sm:$0xff]  ;;  %v2423_v41 = vld [vmem:[#allocation3 + $0x500] sm:$0xff] }
 0x798   :  { %3081 = vmatpush1.bf16.msra.mxu0 %v2281_v51  ;;  %3550 = vmatpush3.bf16.msra.mxu1 %v2283_v45  ;;  %v2373_v51 = vld [vmem:[#allocation3 + $0x370] sm:$0xff]  ;;  %v2486_v45 = vld [vmem:[#allocation3 + $0x6f8] sm:$0xff] }
 0x799   :  { %3082 = vmatprep.subr.bf16.mxu0 %v2289_v5  ;;  %3551 = vmatprep.subr.bf16.mxu1 %v2346_v12  ;;  %v2372_v5 = vld [vmem:[#allocation3 + $0x368] sm:$0xff]  ;;  %v2430_v12 = vld [vmem:[#allocation3 + $0x538] sm:$0xff] }
 0x79c   :  { %3083 = vmatpush1.bf16.msra.mxu0 %v2288_v44  ;;  %3552 = vmatpush3.bf16.msra.mxu1 %v2290_v48  ;;  %v2380_v44 = vld [vmem:[#allocation3 + $0x3a8] sm:$0xff]  ;;  %v2549_v48 = vld [vmem:[#allocation3 + $0x8f0] sm:$0xff] }
 0x79d   :  { %3084 = vmatprep.subr.bf16.mxu0 %v2296_v50  ;;  %3553 = vmatprep.subr.bf16.mxu1 %v2353_v2  ;;  %v2379_v50 = vld [vmem:[#allocation3 + $0x3a0] sm:$0xff]  ;;  %v2493_v2 = vld [vmem:[#allocation3 + $0x730] sm:$0xff] }
 0x7a0   :  { %3085 = vmatpush1.bf16.msra.mxu0 %v2295_v33  ;;  %3554 = vmatpush3.bf16.msra.mxu1 %v2297_v13  ;;  %v2387_v33 = vld [vmem:[#allocation3 + $0x3e0] sm:$0xff]  ;;  %v2556_v13 = vld [vmem:[#allocation3 + $0x928] sm:$0xff] }
 0x7a1   :  { %3086 = vmatprep.subr.bf16.mxu0 %v2303_v56  ;;  %3555 = vmatprep.subr.bf16.mxu1 %v2360_v57  ;;  %v2386_v56 = vld [vmem:[#allocation3 + $0x3d8] sm:$0xff]  ;;  %v2500_v57 = vld [vmem:[#allocation3 + $0x768] sm:$0xff] }
 0x7a4   :  { %3087 = vmatpush1.bf16.msra.mxu0 %v2302_v46  ;;  %3556 = vmatpush3.bf16.msra.mxu1 %v2304_v59  ;;  %v2394_v46 = vld [vmem:[#allocation3 + $0x418] sm:$0xff]  ;;  %v2563_v59 = vld [vmem:[#allocation3 + $0x960] sm:$0xff] }
 0x7a5   :  { %3088 = vmatprep.subr.bf16.mxu0 %v2310_v60  ;;  %3557 = vmatprep.subr.bf16.mxu1 %v2367_v61  ;;  %v2393_v60 = vld [vmem:[#allocation3 + $0x410] sm:$0xff] }
 0x7a6   :  { %v2401_v61 = vld [vmem:[#allocation3 + $0x450] sm:$0xff] }
 0x7a8   :  { %3089 = vmatpush1.bf16.msra.mxu0 %v2309_v28  ;;  %3558 = vmatpush3.bf16.msra.mxu1 %v2311_v49  ;;  %v2570_v28 = vld [vmem:[#allocation3 + $0x998] sm:$0xff]  ;;  %v2400_v49 = vld [vmem:[#allocation3 + $0x448] sm:$0xff] }
 0x7a9   :  { %3090 = vmatprep.subr.bf16.mxu0 %v2317_v16  ;;  %3559 = vmatprep.subr.bf16.mxu1 %v2374_v21  ;;  %v2514_v16 = vld [vmem:[#allocation3 + $0x7d8] sm:$0xff]  ;;  %v2408_v21 = vld [vmem:[#allocation3 + $0x488] sm:$0xff] }
 0x7ac   :  { %3091 = vmatpush1.bf16.msra.mxu0 %v2316_v30  ;;  %3560 = vmatpush3.bf16.msra.mxu1 %v2318_v22  ;;  %v2577_v30 = vld [vmem:[#allocation3 + $0x9d0] sm:$0xff] }
 0x7ad   :  { %3092 = vmatprep.subr.bf16.mxu0 %v2324_v62  ;;  %3567 = vmatprep.subr.bf16.mxu1 %v2437_v20  ;;  %v2521_v22 = vld [vmem:[#allocation3 + $0x810] sm:$0xff]  ;;  %v2415_v62 = vld [vmem:[#allocation3 + $0x4c0] sm:$0xff]  ;;  %v2584_v20 = vld [vmem:[#allocation3 + $0xa08] sm:$0xff] }
 0x7af   :  { %3273 = vmatmul.mubr.bf16.vlgmr.msra.gmra.mrb[24].mxu1 %v4737_v47 }
 0x7b0   :  { %3093 = vmatpush1.bf16.msra.mxu0 %v2323_v1  ;;  %3568 = vmatpush3.bf16.msra.mxu1 %v2381_v3  ;;  %v2414_v1 = vld [vmem:[#allocation3 + $0x4b8] sm:$0xff]  ;;  %v2528_v3 = vld [vmem:[#allocation3 + $0x848] sm:$0xff] }
 0x7b1   :  { %3094 = vmatprep.subr.bf16.mxu0 %v2331_v23  ;;  %3569 = vmatprep.subr.bf16.mxu1 %v2444_v27  ;;  %v2422_v23 = vld [vmem:[#allocation3 + $0x4f8] sm:$0xff]  ;;  %v2591_v27 = vld [vmem:[#allocation3 + $0xa40] sm:$0xff] }
 0x7b2   :  { %3312 = vmatprep.mubr.bf16.mxu1 %v4741_v42 }
 0x7b4   :  { %3095 = vmatpush1.bf16.msra.mxu0 %v2330_v55  ;;  %3570 = vmatpush3.bf16.msra.mxu1 %v2388_v36  ;;  %v2421_v55 = vld [vmem:[#allocation3 + $0x4f0] sm:$0xff]  ;;  %v2535_v36 = vld [vmem:[#allocation3 + $0x880] sm:$0xff] }
 0x7b5   :  { %3096 = vmatprep.subr.bf16.mxu0 %v2338_v8  ;;  %3571 = vmatprep.subr.bf16.mxu1 %v2451_v29  ;;  %v2429_v8 = vld [vmem:[#allocation3 + $0x530] sm:$0xff]  ;;  %v2598_v29 = vld [vmem:[#allocation3 + $0xa78] sm:$0xff] }
 0x7b8   :  { %3097 = vmatpush1.bf16.msra.mxu0 %v2337_v6  ;;  %3572 = vmatpush3.bf16.msra.mxu1 %v2395_v38  ;;  %v2428_v6 = vld [vmem:[#allocation3 + $0x528] sm:$0xff]  ;;  %v2542_v38 = vld [vmem:[#allocation3 + $0x8b8] sm:$0xff] }
 0x7b9   :  { %3098 = vmatprep.subr.bf16.mxu0 %v2345_v9  ;;  %3573 = vmatprep.subr.bf16.mxu1 %v2458_v32  ;;  %v2436_v9 = vld [vmem:[#allocation3 + $0x568] sm:$0xff]  ;;  %v2661_v32 = vld [vmem:[#allocation3 + $0xc70] sm:$0xff] }
 0x7bc   :  { %3099 = vmatpush1.bf16.msra.mxu0 %v2344_v7  ;;  %3574 = vmatpush3.bf16.msra.mxu1 %v2402_v10  ;;  %v2435_v7 = vld [vmem:[#allocation3 + $0x560] sm:$0xff]  ;;  %v2605_v10 = vld [vmem:[#allocation3 + $0xab0] sm:$0xff] }
 0x7bd   :  { %3100 = vmatprep.subr.bf16.mxu0 %v2352_v24  ;;  %3575 = vmatprep.subr.bf16.mxu1 %v2465_v39  ;;  %v2443_v24 = vld [vmem:[#allocation3 + $0x5a0] sm:$0xff]  ;;  %v2668_v39 = vld [vmem:[#allocation3 + $0xca8] sm:$0xff] }
 0x7c0   :  { %3101 = vmatpush1.bf16.msra.mxu0 %v2351_v26  ;;  %3576 = vmatpush3.bf16.msra.mxu1 %v2409_v40  ;;  %v2442_v26 = vld [vmem:[#allocation3 + $0x598] sm:$0xff]  ;;  %v2612_v40 = vld [vmem:[#allocation3 + $0xae8] sm:$0xff] }
 0x7c1   :  { %3102 = vmatprep.subr.bf16.mxu0 %v2359_v34  ;;  %3577 = vmatprep.subr.bf16.mxu1 %v2472_v63  ;;  %v2450_v34 = vld [vmem:[#allocation3 + $0x5d8] sm:$0xff]  ;;  %v2675_v63 = vld [vmem:[#allocation3 + $0xce0] sm:$0xff] }
 0x7c4   :  { %3103 = vmatpush1.bf16.msra.mxu0 %v2358_v18  ;;  %3578 = vmatpush3.bf16.msra.mxu1 %v2416_v35  ;;  %v2449_v18 = vld [vmem:[#allocation3 + $0x5d0] sm:$0xff]  ;;  %v2619_v35 = vld [vmem:[#allocation3 + $0xb20] sm:$0xff] }
 0x7c5   :  { %3104 = vmatprep.subr.bf16.mxu0 %v2366_v37  ;;  %3579 = vmatprep.subr.bf16.mxu1 %v2479_v11  ;;  %v2457_v37 = vld [vmem:[#allocation3 + $0x610] sm:$0xff]  ;;  %v2682_v11 = vld [vmem:[#allocation3 + $0xd18] sm:$0xff] }
 0x7c8   :  { %3105 = vmatpush1.bf16.msra.mxu0 %v2365_v31  ;;  %3580 = vmatpush3.bf16.msra.mxu1 %v2423_v41  ;;  %v2456_v31 = vld [vmem:[#allocation3 + $0x608] sm:$0xff]  ;;  %v2626_v41 = vld [vmem:[#allocation3 + $0xb58] sm:$0xff] }
 0x7c9   :  { %3106 = vmatprep.subr.bf16.mxu0 %v2373_v51  ;;  %3581 = vmatprep.subr.bf16.mxu1 %v2486_v45  ;;  %v2464_v51 = vld [vmem:[#allocation3 + $0x648] sm:$0xff]  ;;  %v2689_v45 = vld [vmem:[#allocation3 + $0xd50] sm:$0xff] }
 0x7cc   :  { %3107 = vmatpush1.bf16.msra.mxu0 %v2372_v5  ;;  %3582 = vmatpush3.bf16.msra.mxu1 %v2430_v12  ;;  %v2463_v5 = vld [vmem:[#allocation3 + $0x640] sm:$0xff]  ;;  %v2633_v12 = vld [vmem:[#allocation3 + $0xb90] sm:$0xff] }
 0x7cd   :  { %3117 = vmatprep.subr.bf16.mxu0 %v2380_v44  ;;  %3589 = vmatprep.subr.bf16.mxu1 %v2549_v48  ;;  %v2471_v44 = vld [vmem:[#allocation3 + $0x680] sm:$0xff]  ;;  %v2696_v48 = vld [vmem:[#allocation3 + $0xd88] sm:$0xff] }
 0x7cf   :  { %3109 = vmatmul.mubr.bf16.vlgmr.msra.gmra.mrb[16].mxu0 %v4737_v47  ;;  %3313 = vmatmul.mubr.bf16.vlgmr.msra.gmra.mrb[28].mxu1 %v4749_v58  ;;  %v2507_v47 = vld [vmem:[#allocation3 + $0x7a0] sm:$0xff] }
 0x7d0   :  { %3118 = vmatpush1.bf16.msra.mxu0 %v2379_v50  ;;  %3590 = vmatpush3.bf16.msra.mxu1 %v2493_v2  ;;  %v2470_v50 = vld [vmem:[#allocation3 + $0x678] sm:$0xff]  ;;  %v2640_v2 = vld [vmem:[#allocation3 + $0xbc8] sm:$0xff] }
 0x7d1   :  { %3119 = vmatprep.subr.bf16.mxu0 %v2387_v33  ;;  %3591 = vmatprep.subr.bf16.mxu1 %v2556_v13  ;;  %v2478_v33 = vld [vmem:[#allocation3 + $0x6b8] sm:$0xff]  ;;  %v2703_v13 = vld [vmem:[#allocation3 + $0xdc0] sm:$0xff] }
 0x7d2   :  { %3149 = vmatprep.mubr.bf16.mxu0 %v4741_v42  ;;  %3352 = vmatprep.mubr.bf16.mxu1 %v4753_v4  ;;  %v2407_v42 = vld [vmem:[#allocation3 + $0x480] sm:$0xff] }
 0x7d4   :  { %3120 = vmatpush1.bf16.msra.mxu0 %v2386_v56  ;;  %3592 = vmatpush3.bf16.msra.mxu1 %v2500_v57  ;;  %v2477_v56 = vld [vmem:[#allocation3 + $0x6b0] sm:$0xff]  ;;  %v2647_v57 = vld [vmem:[#allocation3 + $0xc00] sm:$0xff] }
 0x7d5   :  { %3121 = vmatprep.subr.bf16.mxu0 %v2394_v46  ;;  %3593 = vmatprep.subr.bf16.mxu1 %v2563_v59  ;;  %v2485_v46 = vld [vmem:[#allocation3 + $0x6f0] sm:$0xff]  ;;  %v2710_v59 = vld [vmem:[#allocation3 + $0xdf8] sm:$0xff] }
 0x7d8   :  { %3122 = vmatpush1.bf16.msra.mxu0 %v2393_v60  ;;  %3594 = vmatpush3.bf16.msra.mxu1 %v2507_v47  ;;  %v2484_v60 = vld [vmem:[#allocation3 + $0x6e8] sm:$0xff]  ;;  %v2654_v47 = vld [vmem:[#allocation3 + $0xc38] sm:$0xff] }
 0x7d9   :  { %3123 = vmatprep.subr.bf16.mxu0 %v2401_v61  ;;  %3595 = vmatprep.subr.bf16.mxu1 %v2570_v28  ;;  %v2492_v61 = vld [vmem:[#allocation3 + $0x728] sm:$0xff]  ;;  %v2491_v28 = vld [vmem:[#allocation3 + $0x720] sm:$0xff] }
 0x7dc   :  { %3124 = vmatpush1.bf16.msra.mxu0 %v2400_v49  ;;  %3596 = vmatpush3.bf16.msra.mxu1 %v2514_v16  ;;  %v2499_v49 = vld [vmem:[#allocation3 + $0x760] sm:$0xff]  ;;  %v2498_v16 = vld [vmem:[#allocation3 + $0x758] sm:$0xff] }
 0x7dd   :  { %3125 = vmatprep.subr.bf16.mxu0 %v2408_v21  ;;  %3597 = vmatprep.subr.bf16.mxu1 %v2577_v30  ;;  %v2506_v21 = vld [vmem:[#allocation3 + $0x798] sm:$0xff]  ;;  %v2505_v30 = vld [vmem:[#allocation3 + $0x790] sm:$0xff] }
 0x7e0   :  { %3126 = vmatpush1.bf16.msra.mxu0 %v2407_v42  ;;  %3598 = vmatpush3.bf16.msra.mxu1 %v2521_v22  ;;  %v2513_v42 = vld [vmem:[#allocation3 + $0x7d0] sm:$0xff]  ;;  %v2512_v22 = vld [vmem:[#allocation3 + $0x7c8] sm:$0xff] }
 0x7e1   :  { %3127 = vmatprep.subr.bf16.mxu0 %v2415_v62  ;;  %3599 = vmatprep.subr.bf16.mxu1 %v2584_v20  ;;  %v2520_v62 = vld [vmem:[#allocation3 + $0x808] sm:$0xff]  ;;  %v2519_v20 = vld [vmem:[#allocation3 + $0x800] sm:$0xff] }
 0x7e4   :  { %3128 = vmatpush1.bf16.msra.mxu0 %v2414_v1  ;;  %3600 = vmatpush3.bf16.msra.mxu1 %v2528_v3  ;;  %v2526_v1 = vld [vmem:[#allocation3 + $0x838] sm:$0xff] }
 0x7e5   :  { %3129 = vmatprep.subr.bf16.mxu0 %v2422_v23  ;;  %3601 = vmatprep.subr.bf16.mxu1 %v2591_v27  ;;  %v2534_v3 = vld [vmem:[#allocation3 + $0x878] sm:$0xff]  ;;  %v2541_v23 = vld [vmem:[#allocation3 + $0x8b0] sm:$0xff]  ;;  %v2540_v27 = vld [vmem:[#allocation3 + $0x8a8] sm:$0xff] }
 0x7e8   :  { %3130 = vmatpush1.bf16.msra.mxu0 %v2421_v55  ;;  %3602 = vmatpush3.bf16.msra.mxu1 %v2535_v36  ;;  %v2548_v55 = vld [vmem:[#allocation3 + $0x8e8] sm:$0xff]  ;;  %v2547_v36 = vld [vmem:[#allocation3 + $0x8e0] sm:$0xff] }
 0x7e9   :  { %3131 = vmatprep.subr.bf16.mxu0 %v2429_v8  ;;  %3603 = vmatprep.subr.bf16.mxu1 %v2598_v29  ;;  %v2555_v8 = vld [vmem:[#allocation3 + $0x920] sm:$0xff]  ;;  %v2554_v29 = vld [vmem:[#allocation3 + $0x918] sm:$0xff] }
 0x7ec   :  { %3132 = vmatpush1.bf16.msra.mxu0 %v2428_v6  ;;  %3604 = vmatpush3.bf16.msra.mxu1 %v2542_v38  ;;  %v2562_v6 = vld [vmem:[#allocation3 + $0x958] sm:$0xff]  ;;  %v2561_v38 = vld [vmem:[#allocation3 + $0x950] sm:$0xff] }
 0x7ed   :  { %3133 = vmatprep.subr.bf16.mxu0 %v2436_v9  ;;  %3611 = vmatprep.subr.bf16.mxu1 %v2661_v32  ;;  %v2569_v9 = vld [vmem:[#allocation3 + $0x990] sm:$0xff]  ;;  %v2568_v32 = vld [vmem:[#allocation3 + $0x988] sm:$0xff] }
 0x7ef   :  { %3353 = vmatmul.mubr.bf16.vlgmr.msra.gmra.mrb[32].mxu1 %v4761_v25 }
 0x7f0   :  { %3134 = vmatpush1.bf16.msra.mxu0 %v2435_v7  ;;  %3612 = vmatpush3.bf16.msra.mxu1 %v2605_v10  ;;  %v2576_v7 = vld [vmem:[#allocation3 + $0x9c8] sm:$0xff]  ;;  %v2575_v10 = vld [vmem:[#allocation3 + $0x9c0] sm:$0xff] }
 0x7f1   :  { %3135 = vmatprep.subr.bf16.mxu0 %v2443_v24  ;;  %3613 = vmatprep.subr.bf16.mxu1 %v2668_v39  ;;  %v2583_v24 = vld [vmem:[#allocation3 + $0xa00] sm:$0xff]  ;;  %v2582_v39 = vld [vmem:[#allocation3 + $0x9f8] sm:$0xff] }
 0x7f2   :  { %3392 = vmatprep.mubr.bf16.mxu1 %v4765_v0 }
 0x7f4   :  { %3136 = vmatpush1.bf16.msra.mxu0 %v2442_v26  ;;  %3614 = vmatpush3.bf16.msra.mxu1 %v2612_v40  ;;  %v2590_v26 = vld [vmem:[#allocation3 + $0xa38] sm:$0xff]  ;;  %v2589_v40 = vld [vmem:[#allocation3 + $0xa30] sm:$0xff] }
 0x7f5   :  { %3137 = vmatprep.subr.bf16.mxu0 %v2450_v34  ;;  %3615 = vmatprep.subr.bf16.mxu1 %v2675_v63  ;;  %v2597_v34 = vld [vmem:[#allocation3 + $0xa70] sm:$0xff]  ;;  %v2596_v63 = vld [vmem:[#allocation3 + $0xa68] sm:$0xff] }
 0x7f8   :  { %3138 = vmatpush1.bf16.msra.mxu0 %v2449_v18  ;;  %3616 = vmatpush3.bf16.msra.mxu1 %v2619_v35  ;;  %v2604_v18 = vld [vmem:[#allocation3 + $0xaa8] sm:$0xff]  ;;  %v2603_v35 = vld [vmem:[#allocation3 + $0xaa0] sm:$0xff] }
 0x7f9   :  { %3139 = vmatprep.subr.bf16.mxu0 %v2457_v37  ;;  %3617 = vmatprep.subr.bf16.mxu1 %v2682_v11  ;;  %v2611_v37 = vld [vmem:[#allocation3 + $0xae0] sm:$0xff]  ;;  %v2610_v11 = vld [vmem:[#allocation3 + $0xad8] sm:$0xff] }
 0x7fc   :  { %3140 = vmatpush1.bf16.msra.mxu0 %v2456_v31  ;;  %3618 = vmatpush3.bf16.msra.mxu1 %v2626_v41  ;;  %v2618_v31 = vld [vmem:[#allocation3 + $0xb18] sm:$0xff]  ;;  %v2617_v41 = vld [vmem:[#allocation3 + $0xb10] sm:$0xff] }
 0x7fd   :  { %3141 = vmatprep.subr.bf16.mxu0 %v2464_v51  ;;  %3619 = vmatprep.subr.bf16.mxu1 %v2689_v45  ;;  %v2625_v51 = vld [vmem:[#allocation3 + $0xb50] sm:$0xff]  ;;  %v2624_v45 = vld [vmem:[#allocation3 + $0xb48] sm:$0xff] }
 0x800   :  { %3142 = vmatpush1.bf16.msra.mxu0 %v2463_v5  ;;  %3620 = vmatpush3.bf16.msra.mxu1 %v2633_v12  ;;  %v2632_v5 = vld [vmem:[#allocation3 + $0xb88] sm:$0xff] }
 0x801   :  { %3143 = vmatprep.subr.bf16.mxu0 %v2471_v44  ;;  %3621 = vmatprep.subr.bf16.mxu1 %v2696_v48  ;;  %v4792_v12 = vld [vmem:[#allocation23] sm:$0xff] }
 0x802   :  { %v2631_v44 = vld [vmem:[#allocation3 + $0xb80] sm:$0xff]  ;;  %v2724_v48 = vrot.slane %v4792_v12, %v4528_v14 }
 0x804   :  { %3144 = vmatpush1.bf16.msra.mxu0 %v2470_v50  ;;  %3622 = vmatpush3.bf16.msra.mxu1 %v2640_v2  ;;  %v2720_v50 = vrot.slane %v4792_v12, %v4496_v53  ;;  %v2728_v2 = vrot.slane %v4792_v12, %v4531_v15  ;;  %v2653_v15 = vld [vmem:[#allocation3 + $0xc30] sm:$0xff] }
 0x805   :  { %3145 = vmatprep.subr.bf16.mxu0 %v2478_v33  ;;  %3623 = vmatprep.subr.bf16.mxu1 %v2703_v13  ;;  %v2638_v33 = vld [vmem:[#allocation3 + $0xbb8] sm:$0xff] }
 0x808   :  { %3146 = vmatpush1.bf16.msra.mxu0 %v2477_v56  ;;  %3624 = vmatpush3.bf16.msra.mxu1 %v2647_v57  ;;  %v2646_v57 = vld [vmem:[#allocation3 + $0xbf8] sm:$0xff] }
 0x809   :  { %3147 = vmatprep.subr.bf16.mxu0 %v2485_v46  ;;  %3625 = vmatprep.subr.bf16.mxu1 %v2710_v59 }
 0x80c   :  { %3148 = vmatpush1.bf16.msra.mxu0 %v2484_v60  ;;  %3626 = vmatpush3.bf16.msra.mxu1 %v2654_v47 }
 0x80d   :  { %3158 = vmatprep.subr.bf16.mxu0 %v2492_v61 }
 0x80f   :  { %3150 = vmatmul.mubr.bf16.vlgmr.msra.gmra.mrb[16].mxu0 %v4749_v58  ;;  %3393 = vmatmul.mubr.bf16.vlgmr.msra.gmra.mrb[36].mxu1 %v4773_v43  ;;  %v2527_v58 = vld [vmem:[#allocation3 + $0x840] sm:$0xff] }
 0x810   :  { %3159 = vmatpush1.bf16.msra.mxu0 %v2491_v28  ;;  %3190 = vmatprep.mubr.bf16.mxu0 %v4753_v4  ;;  %v2533_v4 = vld [vmem:[#allocation3 + $0x870] sm:$0xff] }
 0x811   :  { %3160 = vmatprep.subr.bf16.mxu0 %v2499_v49 }
 0x814   :  { %3161 = vmatpush1.bf16.msra.mxu0 %v2498_v16  ;;  %v2645_v16 = vld [vmem:[#allocation3 + $0xbf0] sm:$0xff] }
 0x815   :  { %3162 = vmatprep.subr.bf16.mxu0 %v2506_v21  ;;  %v2652_v21 = vld [vmem:[#allocation3 + $0xc28] sm:$0xff] }
 0x818   :  { %3163 = vmatpush1.bf16.msra.mxu0 %v2505_v30  ;;  %v2660_v30 = vld [vmem:[#allocation3 + $0xc68] sm:$0xff] }
 0x819   :  { %3164 = vmatprep.subr.bf16.mxu0 %v2513_v42  ;;  %v2659_v42 = vld [vmem:[#allocation3 + $0xc60] sm:$0xff] }
 0x81c   :  { %3165 = vmatpush1.bf16.msra.mxu0 %v2512_v22  ;;  %v2667_v22 = vld [vmem:[#allocation3 + $0xca0] sm:$0xff] }
 0x81d   :  { %3166 = vmatprep.subr.bf16.mxu0 %v2520_v62 }
 0x820   :  { %3167 = vmatpush1.bf16.msra.mxu0 %v2519_v20 }
 0x821   :  { %3168 = vmatprep.subr.bf16.mxu0 %v2527_v58 }
 0x824   :  { %3169 = vmatpush1.bf16.msra.mxu0 %v2526_v1  ;;  %v2666_v1 = vld [vmem:[#allocation3 + $0xc98] sm:$0xff] }
 0x825   :  { %3170 = vmatprep.subr.bf16.mxu0 %v2534_v3 }
 0x828   :  { %3171 = vmatpush1.bf16.msra.mxu0 %v2533_v4  ;;  %v2674_v4 = vld [vmem:[#allocation3 + $0xcd8] sm:$0xff] }
 0x829   :  { %3172 = vmatprep.subr.bf16.mxu0 %v2541_v23  ;;  %v2673_v23 = vld [vmem:[#allocation3 + $0xcd0] sm:$0xff] }
 0x82c   :  { %3173 = vmatpush1.bf16.msra.mxu0 %v2540_v27  ;;  %v2681_v27 = vld [vmem:[#allocation3 + $0xd10] sm:$0xff] }
 0x82d   :  { %3174 = vmatprep.subr.bf16.mxu0 %v2548_v55  ;;  %v2680_v55 = vld [vmem:[#allocation3 + $0xd08] sm:$0xff] }
 0x830   :  { %3175 = vmatpush1.bf16.msra.mxu0 %v2547_v36  ;;  %v2688_v36 = vld [vmem:[#allocation3 + $0xd48] sm:$0xff] }
 0x831   :  { %3176 = vmatprep.subr.bf16.mxu0 %v2555_v8  ;;  %v2687_v8 = vld [vmem:[#allocation3 + $0xd40] sm:$0xff] }
 0x834   :  { %3177 = vmatpush1.bf16.msra.mxu0 %v2554_v29  ;;  %v2695_v29 = vld [vmem:[#allocation3 + $0xd80] sm:$0xff] }
 0x835   :  { %3178 = vmatprep.subr.bf16.mxu0 %v2562_v6  ;;  %v2694_v6 = vld [vmem:[#allocation3 + $0xd78] sm:$0xff] }
 0x838   :  { %3179 = vmatpush1.bf16.msra.mxu0 %v2561_v38  ;;  %v2702_v38 = vld [vmem:[#allocation3 + $0xdb8] sm:$0xff] }
 0x839   :  { %3180 = vmatprep.subr.bf16.mxu0 %v2569_v9 }
 0x83c   :  { %3181 = vmatpush1.bf16.msra.mxu0 %v2568_v32 }
 0x83d   :  { %3182 = vmatprep.subr.bf16.mxu0 %v2576_v7 }
 0x840   :  { %3183 = vmatpush1.bf16.msra.mxu0 %v2575_v10 }
 0x841   :  { %3184 = vmatprep.subr.bf16.mxu0 %v2583_v24  ;;  %v2701_v24 = vld [vmem:[#allocation3 + $0xdb0] sm:$0xff] }
 0x844   :  { %3185 = vmatpush1.bf16.msra.mxu0 %v2582_v39 }
 0x845   :  { %3186 = vmatprep.subr.bf16.mxu0 %v2590_v26  ;;  %v2709_v26 = vld [vmem:[#allocation3 + $0xdf0] sm:$0xff] }
 0x848   :  { %3187 = vmatpush1.bf16.msra.mxu0 %v2589_v40  ;;  %v2708_v40 = vld [vmem:[#allocation3 + $0xde8] sm:$0xff] }
 0x849   :  { %3188 = vmatprep.subr.bf16.mxu0 %v2597_v34  ;;  %v2740_v34 = vrot.slane %v4792_v12, %v4670_v19 }
 0x84c   :  { %3189 = vmatpush1.bf16.msra.mxu0 %v2596_v63 }
 0x84d   :  { %3199 = vmatprep.subr.bf16.mxu0 %v2604_v18 }
 0x84f   :  { %3191 = vmatmul.mubr.bf16.vlgmr.msra.gmra.mrb[16].mxu0 %v4761_v25  ;;  %v2639_v25 = vld [vmem:[#allocation3 + $0xbc0] sm:$0xff] }
 0x850   :  { %3200 = vmatpush1.bf16.msra.mxu0 %v2603_v35  ;;  %3231 = vmatprep.mubr.bf16.mxu0 %v4765_v0  ;;  %v2716_v0 = vrot.slane %v4792_v12, %v4493_v52 }
 0x851   :  { %3201 = vmatprep.subr.bf16.mxu0 %v2611_v37 }
 0x854   :  { %3202 = vmatpush1.bf16.msra.mxu0 %v2610_v11 }
 0x855   :  { %3203 = vmatprep.subr.bf16.mxu0 %v2618_v31 }
 0x858   :  { %3204 = vmatpush1.bf16.msra.mxu0 %v2617_v41 }
 0x859   :  { %3205 = vmatprep.subr.bf16.mxu0 %v2625_v51 }
 0x85c   :  { %3206 = vmatpush1.bf16.msra.mxu0 %v2624_v45 }
 0x85d   :  { %3207 = vmatprep.subr.bf16.mxu0 %v2632_v5 }
 0x860   :  { %3208 = vmatpush1.bf16.msra.mxu0 %v2631_v44 }
 0x861   :  { %3209 = vmatprep.subr.bf16.mxu0 %v2639_v25 }
 0x862   :  { %v2905_v13 = vpop.f32.mrb[12].mxu0  ;;  %v3069_v56 = vpop.f32.mrb[20].mxu1 }
 0x863   :  { %v3645_v46 = vadd.f32 %v2905_v13, %v2716_v0  ;;  %v3647_v59 = vadd.f32 %v3069_v56, %v2724_v48  ;;  %v2907_v60 = vpop.f32.mrb[13].mxu0  ;;  %v3071_v47 = vpop.f32.mrb[21].mxu1  ;;  %v2732_v56 = vrot.slane %v4792_v12, %v4664_v54 }
 0x864   :  { %v3646_v52 = vadd.f32 %v2907_v60, %v2720_v50  ;;  %v3648_v61 = vadd.f32 %v3071_v47, %v2728_v2  ;;  %v2909_v28 = vpop.f32.mrb[14].mxu0  ;;  %v3073_v14 = vpop.f32.mrb[22].mxu1  ;;  %3210 = vmatpush1.bf16.msra.mxu0 %v2638_v33 }
 0x865   :  { %3890 = vtanh.f32 %v3645_v46  ;;  %v2910_v49 = vpop.f32.mrb[15].mxu0  ;;  %v3074_v53 = vpop.f32.mrb[23].mxu1  ;;  %3211 = vmatprep.subr.bf16.mxu0 %v2646_v57  ;;  %v2736_v57 = vrot.slane %v4792_v12, %v4667_v17 }
 0x866   :  { %3892 = vtanh.f32 %v3647_v59 }
 0x867   :  { %3894 = vtanh.f32 %v3646_v52 }
 0x868   :  { %3896 = vtanh.f32 %v3648_v61  ;;  %3212 = vmatpush1.bf16.msra.mxu0 %v2645_v16 }
 0x869   :  { %3213 = vmatprep.subr.bf16.mxu0 %v2653_v15 }
 0x86c   :  { %3214 = vmatpush1.bf16.msra.mxu0 %v2652_v21 }
 0x86d   :  { %3215 = vmatprep.subr.bf16.mxu0 %v2660_v30 }
 0x86f   :  { %v3891_v62 = vpop.eup %3890 }
 0x870   :  { %v3893_v20 = vpop.eup %3892  ;;  %3407 = vst [vmem:[#allocation25] sm:$0xff] %v3891_v62  ;;  %3216 = vmatpush1.bf16.msra.mxu0 %v2659_v42 }
 0x871   :  { %v3895_v58 = vpop.eup %3894  ;;  %3409 = vst [vmem:[#allocation25 + $0x10] sm:$0xff] %v3893_v20  ;;  %3217 = vmatprep.subr.bf16.mxu0 %v2667_v22 }
 0x872   :  { %v3897_v3 = vpop.eup %3896  ;;  %3408 = vst [vmem:[#allocation25 + $0x8] sm:$0xff] %v3895_v58 }
 0x873   :  { %3410 = vst [vmem:[#allocation25 + $0x18] sm:$0xff] %v3897_v3 }
 0x874   :  { %3218 = vmatpush1.bf16.msra.mxu0 %v2666_v1 }
 0x875   :  { %3219 = vmatprep.subr.bf16.mxu0 %v2674_v4 }
 0x878   :  { %3220 = vmatpush1.bf16.msra.mxu0 %v2673_v23 }
 0x879   :  { %3221 = vmatprep.subr.bf16.mxu0 %v2681_v27 }
 0x87c   :  { %3222 = vmatpush1.bf16.msra.mxu0 %v2680_v55 }
 0x87d   :  { %3223 = vmatprep.subr.bf16.mxu0 %v2688_v36 }
 0x880   :  { %3224 = vmatpush1.bf16.msra.mxu0 %v2687_v8 }
 0x881   :  { %3225 = vmatprep.subr.bf16.mxu0 %v2695_v29 }
 0x882   :  { %v3561_v9 = vpop.f32.mrb[24].mxu1 }
 0x883   :  { %v3562_v32 = vpop.f32.mrb[25].mxu1 }
 0x884   :  { %3226 = vmatpush1.bf16.msra.mxu0 %v2694_v6  ;;  %v3563_v7 = vadd.f32 %v3562_v32, %v3561_v9  ;;  %v3564_v10 = vpop.f32.mrb[26].mxu1 }
 0x885   :  { %3227 = vmatprep.subr.bf16.mxu0 %v2702_v38  ;;  %v3565_v39 = vpop.f32.mrb[27].mxu1 }
 0x886   :  { %v3275_v63 = vadd.f32 %v3563_v7, %v2740_v34 }
 0x888   :  { %3228 = vmatpush1.bf16.msra.mxu0 %v2701_v24 }
 0x889   :  { %3229 = vmatprep.subr.bf16.mxu0 %v2709_v26 }
 0x88c   :  { %3230 = vmatpush1.bf16.msra.mxu0 %v2708_v40 }
 0x88f   :  { %3232 = vmatmul.mubr.bf16.vlgmr.msra.gmra.mrb[16].mxu0 %v4773_v43 }
 0x8a2   :  { %v3583_v18 = vpop.f32.mrb[28].mxu1 }
 0x8a3   :  { %v3584_v35 = vpop.f32.mrb[29].mxu1 }
 0x8a4   :  { %v3585_v37 = vadd.f32 %v3584_v35, %v3583_v18  ;;  %v3586_v11 = vpop.f32.mrb[30].mxu1 }
 0x8a5   :  { %v3587_v31 = vpop.f32.mrb[31].mxu1 }
 0x8a6   :  { %v3315_v41 = vadd.f32 %v3585_v37, %v3275_v63 }
 0x8c2   :  { %v3605_v51 = vpop.f32.mrb[32].mxu1 }
 0x8c3   :  { %v3606_v45 = vpop.f32.mrb[33].mxu1 }
 0x8c4   :  { %v3607_v5 = vadd.f32 %v3606_v45, %v3605_v51  ;;  %v3608_v44 = vpop.f32.mrb[34].mxu1 }
 0x8c5   :  { %v3609_v25 = vpop.f32.mrb[35].mxu1 }
 0x8c6   :  { %v3355_v0 = vadd.f32 %v3607_v5, %v3315_v41 }
 0x8e2   :  { %v3627_v48 = vpop.f32.mrb[36].mxu1 }
 0x8e3   :  { %v3628_v50 = vpop.f32.mrb[37].mxu1 }
 0x8e4   :  { %v3629_v2 = vadd.f32 %v3628_v50, %v3627_v48  ;;  %v3630_v43 = vpop.f32.mrb[38].mxu1 }
 0x8e5   :  { %v3631_v33 = vpop.f32.mrb[39].mxu1 }
 0x8e6   :  { %v3395_v13 = vadd.f32 %v3629_v2, %v3355_v0 }
 0x8e8   :  { %3898 = vtanh.f32 %v3395_v13 }
 0x8f2   :  { %v3899_v19 = vpop.eup %3898 }
 0x8f3   :  { %3413 = vst [vmem:[#allocation25 + $0x30] sm:$0xff] %v3899_v19 }
 0x962   :  { %v3233_v46 = vpop.f32.mrb[16].mxu0 }
 0x963   :  { %v3649_v59 = vadd.f32 %v3233_v46, %v2732_v56  ;;  %v3235_v60 = vpop.f32.mrb[17].mxu0 }
 0x964   :  { %v3650_v47 = vadd.f32 %v3235_v60, %v2736_v57  ;;  %v3237_v52 = vpop.f32.mrb[18].mxu0 }
 0x965   :  { %3900 = vtanh.f32 %v3649_v59  ;;  %v3238_v61 = vpop.f32.mrb[19].mxu0 }
 0x966   :  { %3902 = vtanh.f32 %v3650_v47 }
 0x96f   :  { %v3901_v28 = vpop.eup %3900 }
 0x970   :  { %v3903_v14 = vpop.eup %3902  ;;  %3411 = vst [vmem:[#allocation25 + $0x20] sm:$0xff] %v3901_v28 }
 0x971   :  { %3412 = vst [vmem:[#allocation25 + $0x28] sm:$0xff] %v3903_v14 }
 0x972   :  { %4179 = shalt.err (!%p4176_p2)
}
 0x973   :  { %s4180_s11 = scalar_lea.hbm %s4835_s14, 896 }
 0x974   :  { %p4181_p3 = scmp.ne.s32.totalorder %s4835_s14, %s4180_s11  ;;  %p4184_p4 = scmp.lt.u32.totalorder %s4180_s11, %s4835_s14 }
 0x976   :  { %p4186_p5 = pnand %p4184_p4, %p4181_p3 }
 0x978   :  { %4189 = shalt.err (!%p4186_p5)
}
 0x979   :  { %3423 = dma.vmem_to_hbm [thread:$0]  %s3421_s23, 896, %s4835_s14, [#allocation7]  }
 0x97a   :  { %4208 = dma.done.wait [#allocation7], 896  }
 0x97b   :  { %4209 = vsyncadd [#allocation7], 4294966400 }
 0x97c   :  { %3427 = vsyncpa [#allocation6], 1 }
 0x97d   :  { %3428 = vsyncpa [#allocation9], 1 }
 0x97e   :  { %3429 = vsyncpa [#allocation12], 1 }
 0x97f   :  { %3430 = vsyncpa [#allocation15], 1 }
 0x980   :  { %3431 = vsyncpa [#allocation18], 1 }
 0x981   :  { %3432 = vsyncpa [#allocation21], 1 }
 0x982   :  { %3433 = vsyncpa [#allocation24], 1 }
 0x983   :  { %3434 = vsyncpa [#allocation7], 1 }
 0x984   :  { %3435 = vsyncmov [#allocation4] }
 0x987   :  { %s3436_s22 = vpop.sfrf %3435 }
 0x988   :  { %p3538_p6 = scmp.ne.s32.totalorder %s3436_s22, 0 }
 0x98a   :  { %3440 = shalt.err (%p3538_p6)  }
 0x98b   :  { %3442 = vsyncmov [#allocation4 + $0x1] }
 0x98e   :  { %s3443_s25 = vpop.sfrf %3442 }
 0x98f   :  { %p3539_p7 = scmp.ne.s32.totalorder %s3443_s25, 0 }
 0x991   :  { %3447 = shalt.err (%p3539_p7)  }

</bundles_post_ra>
